<compile_context>
chip_gen: v7x
topology: tpu7x:2x2x1
jax: 0.10.0
libtpu: 0.0.40
codegen_flags: <defaults>
</compile_context>

<pallas_src>
import functools

import jax
import jax.numpy as jnp
from jax.experimental import pallas as pl
from jax.experimental.pallas import tpu as pltpu


def _round_up(x, m):
    return (x + m - 1) // m * m


def _default_vmem_limit():
    # ~15% headroom for compiler-internal scratch; falls back to a safe value.
    try:
        cap = int(pltpu.get_tpu_info().vmem_capacity_bytes)
        return max(32 * 1024 * 1024, int(cap * 0.85))
    except Exception:
        return 64 * 1024 * 1024


def choose_tn(dim, hidden, param_dtype=jnp.bfloat16,
              weight_vmem_budget=24 * 1024 * 1024):
    """Pick the hidden tile so double-buffered weight tiles fit the budget.
    Collapses the hidden axis to a single step when the whole (padded) hidden
    dimension fits; otherwise prefers 512/384/256 (fills the 256-deep MXU)."""
    bpe = jnp.dtype(param_dtype).itemsize
    per_tn = 2 * 3 * dim * bpe           # (dim,2tn)+(tn,dim), double-buffered
    tn_max = max(128, (weight_vmem_budget // per_tn) // 128 * 128)
    hidden_128 = _round_up(hidden, 128)
    if hidden_128 <= tn_max:
        return int(hidden_128)
    for cand in (512, 384, 256):
        if cand <= tn_max:
            return cand
    return 128


def _swiglu_from_fused(h, tn):
    # h: (tm, 2*tn) f32 MXU output; [:, :tn] = w1 path, [:, tn:] = w3 path.
    h1 = h[:, :tn]
    h3 = h[:, tn:]
    return (h1 * jax.nn.sigmoid(h1)) * h3      # SiLU gate in f32 (VPU + EUP)


def _ffn_kernel_single(x_ref, w13_ref, w2_ref, o_ref, *, tn):
    # Single hidden step: both matmuls, one lane-dense store, no scratch.
    h = jnp.dot(x_ref[...], w13_ref[...], preferred_element_type=jnp.float32)
    gated = _swiglu_from_fused(h, tn)
    o_ref[...] = jnp.dot(gated.astype(w2_ref.dtype), w2_ref[...],
                         preferred_element_type=jnp.float32).astype(o_ref.dtype)
    # TODO(synk): dropout with p > 0 (training mode) would need
    # pltpu.prng_seed / pltpu.prng_random_bits here; p = 0.0 => identity.


def _ffn_kernel_inplace_f32(x_ref, w13_ref, w2_ref, o_ref, *, tn):
    # f32 output is resident across j (constant block index) -> accumulate in
    # place, no VMEM scratch and no finalize copy sweep.
    j = pl.program_id(1)

    @pl.when(j == 0)
    def _init():
        o_ref[...] = jnp.zeros_like(o_ref)

    h = jnp.dot(x_ref[...], w13_ref[...], preferred_element_type=jnp.float32)
    gated = _swiglu_from_fused(h, tn)
    o_ref[...] += jnp.dot(gated.astype(w2_ref.dtype), w2_ref[...],
                          preferred_element_type=jnp.float32)


def _ffn_kernel_acc(x_ref, w13_ref, w2_ref, o_ref, acc_ref, *, tn):
    # Generic multi-step path (non-f32 outputs): f32 VMEM accumulator,
    # init at j==0, single lane-dense cast+store at the last j.
    j = pl.program_id(1)

    @pl.when(j == 0)
    def _init():
        acc_ref[...] = jnp.zeros_like(acc_ref)

    h = jnp.dot(x_ref[...], w13_ref[...], preferred_element_type=jnp.float32)
    gated = _swiglu_from_fused(h, tn)
    acc_ref[...] += jnp.dot(gated.astype(w2_ref.dtype), w2_ref[...],
                            preferred_element_type=jnp.float32)

    @pl.when(j == pl.num_programs(1) - 1)
    def _finalize():
        o_ref[...] = acc_ref[...].astype(o_ref.dtype)


def prepare_ffn_weights(w1, w2, w3, *, tn=None, param_dtype=jnp.bfloat16):
    """One-time (load-time) weight prep.

    Inputs (torch layout):  w1, w3: (hidden, dim);  w2: (dim, hidden)
    Returns:
      w13: (nt, dim, 2*tn)  -- tile j is [w1^T cols of tile j | w3^T cols of
                               tile j], stored CONTIGUOUSLY per tile so each
                               weight-tile DMA is a single large transfer;
      w2t: (hidden_p, dim)  -- w2^T, hidden padded to a multiple of tn (row
                               blocks are already contiguous).
    Zero-padding the hidden axis is exact: padded columns give a zero gated
    activation and multiply zero rows of w2^T.
    """
    hidden, dim = w1.shape
    assert w3.shape == (hidden, dim) and w2.shape == (dim, hidden)
    if tn is None:
        tn = choose_tn(dim, hidden, param_dtype)
    assert tn % 128 == 0
    hidden_p = _round_up(hidden, tn)
    pad = hidden_p - hidden
    w1t = jnp.pad(w1.T.astype(param_dtype), ((0, 0), (0, pad)))   # (dim, hp)
    w3t = jnp.pad(w3.T.astype(param_dtype), ((0, 0), (0, pad)))   # (dim, hp)
    w2t = jnp.pad(w2.T.astype(param_dtype), ((0, pad), (0, 0)))   # (hp, dim)
    nt = hidden_p // tn
    w13 = jnp.concatenate(
        [w1t.reshape(dim, nt, tn).transpose(1, 0, 2),
         w3t.reshape(dim, nt, tn).transpose(1, 0, 2)],
        axis=-1,
    )                                                              # (nt, dim, 2*tn)
    return w13, w2t


def feed_forward(x, w13, w2t, *, tm=512, out_dtype=None, vmem_limit_bytes=None):
    """SwiGLU FFN forward.  x: (..., dim); w13/w2t from prepare_ffn_weights.

    tm: row tile (sweep 384-1024 per generation; clamped for small/ragged M
    and split so the parallel axis keeps both v7x TensorCores busy)."""
    orig_shape = x.shape
    dim = orig_shape[-1]
    nt, dim_w, two_tn = w13.shape
    tn = two_tn // 2
    hidden_p = w2t.shape[0]
    assert dim_w == dim and w2t.shape == (hidden_p, dim) and nt * tn == hidden_p

    out_dtype = x.dtype if out_dtype is None else out_dtype
    compute_dtype = w13.dtype

    xm = x.reshape(-1, dim).astype(compute_dtype)
    M = xm.shape[0]

    tm = max(8, min(tm, _round_up(M, 8)))      # sublane-aligned, no over-tiling
    # Guarantee >=2 blocks on the "parallel" axis when M allows (v7x: 2 TCs).
    if M > 8 and _round_up(M, tm) // tm < 2:
        tm = _round_up(-(-M // 2), 8)
    Mp = _round_up(M, tm)                       # ragged M: pad rows
    if Mp != M:
        xm = jnp.pad(xm, ((0, Mp - M), (0, 0)))

    ni, nj = Mp // tm, nt
    grid = (ni, nj)

    if nj == 1:
        kernel = functools.partial(_ffn_kernel_single, tn=tn)
        scratch_shapes = []
    elif jnp.dtype(out_dtype) == jnp.dtype(jnp.float32):
        kernel = functools.partial(_ffn_kernel_inplace_f32, tn=tn)
        scratch_shapes = []
    else:
        kernel = functools.partial(_ffn_kernel_acc, tn=tn)
        scratch_shapes = [pltpu.VMEM((tm, dim), jnp.float32)]

    if vmem_limit_bytes is None:
        vmem_limit_bytes = _default_vmem_limit()

    out = pl.pallas_call(
        kernel,
        out_shape=jax.ShapeDtypeStruct((Mp, dim), out_dtype),
        grid_spec=pltpu.PrefetchScalarGridSpec(
            num_scalar_prefetch=0,
            grid=grid,
            in_specs=[
                # x row tile: block index constant across j -> stays resident.
                pl.BlockSpec((tm, dim), lambda i, j: (i, 0)),
                # fused [w1^T | w3^T] tile, contiguous per tile, streamed over j.
                pl.BlockSpec((None, dim, 2 * tn), lambda i, j: (j, 0, 0)),
                # w2^T row block (contiguous), streamed over j.
                pl.BlockSpec((tn, dim), lambda i, j: (j, 0)),
            ],
            out_specs=pl.BlockSpec((tm, dim), lambda i, j: (i, 0)),
            scratch_shapes=scratch_shapes,
        ),
        compiler_params=pltpu.CompilerParams(
            dimension_semantics=("parallel", "arbitrary"),
            vmem_limit_bytes=vmem_limit_bytes,
        ),
    )(xm, w13, w2t)

    if Mp != M:
        out = out[:M]
    return out.reshape(orig_shape[:-1] + (dim,))


if __name__ == "__main__":
    # Small shapes consistent with ModelArgs defaults (dim=512, hidden_dim=1376).
    batch, seq, dim, hidden = 2, 8, 512, 1376

    key = jax.random.PRNGKey(0)
    kx, k1, k2, k3 = jax.random.split(key, 4)

    x = jax.random.normal(kx, (batch, seq, dim), dtype=jnp.float32)
    # nn.Linear-style init scale ~ 1/sqrt(fan_in); deterministic synthetic init.
    w1 = jax.random.normal(k1, (hidden, dim), dtype=jnp.float32) / (dim ** 0.5)
    w3 = jax.random.normal(k3, (hidden, dim), dtype=jnp.float32) / (dim ** 0.5)
    w2 = jax.random.normal(k2, (dim, hidden), dtype=jnp.float32) / (hidden ** 0.5)

    # One-time weight preparation (load-time glue, not the per-call hot path).
    # Auto tn: hidden pads to 1408 and fits the VMEM budget -> single hidden step.
    w13, w2t = prepare_ffn_weights(w1, w2, w3, param_dtype=jnp.bfloat16)

    y = feed_forward(x, w13, w2t)
    jax.block_until_ready(y)

    # Pure-JAX reference mirroring the kernel's precision policy
    # (bf16 operands, f32 accumulation; eval mode, dropout p=0.0 is identity).
    xb = x.astype(jnp.bfloat16)
    h1 = jnp.dot(xb, w1.T.astype(jnp.bfloat16), preferred_element_type=jnp.float32)
    h3 = jnp.dot(xb, w3.T.astype(jnp.bfloat16), preferred_element_type=jnp.float32)
    gated = (jax.nn.silu(h1) * h3).astype(jnp.bfloat16)
    ref = jnp.dot(gated, w2.T.astype(jnp.bfloat16),
                  preferred_element_type=jnp.float32).astype(x.dtype)

    assert y.shape == x.shape
    assert jnp.allclose(y, ref, atol=2e-2, rtol=2e-2), "mismatch vs reference"

    print("KERNEL_OK")
</pallas_src>

<mosaic_0001>
module attributes {stable_mosaic.version = 11 : i64} {
  func.func @_ffn_kernel_single(%arg0: i32, %arg1: i32, %arg2: memref<8x512xbf16, #tpu.memory_space<vmem>>, %arg3: memref<1x512x2816xbf16, #tpu.memory_space<vmem>>, %arg4: memref<1408x512xbf16, #tpu.memory_space<vmem>>, %arg5: memref<8x512xf32, #tpu.memory_space<vmem>>) attributes {dimension_semantics = [#tpu.dimension_semantics<parallel>, #tpu.dimension_semantics<arbitrary>], iteration_bounds = array<i64: 2, 1>, scalar_prefetch = 0 : i64, scratch_operands = 0 : i64, tpu.core_type = #tpu.core_type<tc>, window_params = [{transform_indices = @transform_0, window_bounds = array<i64: 8, 512>}, {transform_indices = @transform_1, window_bounds = array<i64: 1, 512, 2816>}, {transform_indices = @transform_2, window_bounds = array<i64: 1408, 512>}, {transform_indices = @transform_3, window_bounds = array<i64: 8, 512>}]} {
    %c0 = arith.constant 0 : index
    %c0_0 = arith.constant 0 : index
    %0 = vector.load %arg2[%c0, %c0_0] : memref<8x512xbf16, #tpu.memory_space<vmem>>, vector<8x512xbf16>
    %c0_1 = arith.constant 0 : index
    %c0_2 = arith.constant 0 : index
    %c0_3 = arith.constant 0 : index
    %1 = vector.load %arg3[%c0_1, %c0_2, %c0_3] : memref<1x512x2816xbf16, #tpu.memory_space<vmem>>, vector<1x512x2816xbf16>
    %2 = vector.shape_cast %1 : vector<1x512x2816xbf16> to vector<512x2816xbf16>
    %cst = arith.constant dense<0.000000e+00> : vector<8x2816xf32>
    %3 = tpu.matmul %0, %2, %cst {dimension_numbers = #tpu.dot_dimension_numbers<[1], [0], [0], [1], [0, 0, 1, 1], [], []>} : vector<8x512xbf16>, vector<512x2816xbf16>, vector<8x2816xf32> -> vector<8x2816xf32>
    %4 = vector.extract_strided_slice %3 {offsets = [0, 0], sizes = [8, 1408], strides = [1, 1]} : vector<8x2816xf32> to vector<8x1408xf32>
    %5 = vector.extract_strided_slice %3 {offsets = [0, 1408], sizes = [8, 1408], strides = [1, 1]} : vector<8x2816xf32> to vector<8x1408xf32>
    %6 = arith.negf %4 : vector<8x1408xf32>
    %7 = math.exp %6 : vector<8x1408xf32>
    %cst_4 = arith.constant 1.000000e+00 : f32
    %8 = vector.broadcast %cst_4 : f32 to vector<8x1408xf32>
    %9 = arith.addf %8, %7 : vector<8x1408xf32>
    %10 = arith.divf %8, %9 : vector<8x1408xf32>
    %11 = arith.mulf %4, %10 : vector<8x1408xf32>
    %12 = arith.mulf %11, %5 : vector<8x1408xf32>
    %13 = arith.truncf %12 : vector<8x1408xf32> to vector<8x1408xbf16>
    %c0_5 = arith.constant 0 : index
    %c0_6 = arith.constant 0 : index
    %14 = vector.load %arg4[%c0_5, %c0_6] : memref<1408x512xbf16, #tpu.memory_space<vmem>>, vector<1408x512xbf16>
    %cst_7 = arith.constant dense<0.000000e+00> : vector<8x512xf32>
    %15 = tpu.matmul %13, %14, %cst_7 {dimension_numbers = #tpu.dot_dimension_numbers<[1], [0], [0], [1], [0, 0, 1, 1], [], []>} : vector<8x1408xbf16>, vector<1408x512xbf16>, vector<8x512xf32> -> vector<8x512xf32>
    %c0_8 = arith.constant 0 : index
    %c0_9 = arith.constant 0 : index
    %16 = vector.load %arg5[%c0_8, %c0_9] : memref<8x512xf32, #tpu.memory_space<vmem>>, vector<8x512xf32>
    tpu.vector_store %arg5[%c0_8, %c0_9], %15 {strides = array<i32>} : memref<8x512xf32, #tpu.memory_space<vmem>>, vector<8x512xf32>,
    return
  }
  func.func @transform_0(%arg0: i32, %arg1: i32) -> (i32, i32) {
    %c0_i32 = arith.constant 0 : i32
    %c0_i32_0 = arith.constant 0 : i32
    return %arg0, %c0_i32 : i32, i32
  }
  func.func @transform_1(%arg0: i32, %arg1: i32) -> (i32, i32, i32) {
    %c0_i32 = arith.constant 0 : i32
    %c0_i32_0 = arith.constant 0 : i32
    %c0_i32_1 = arith.constant 0 : i32
    return %arg1, %c0_i32, %c0_i32_0 : i32, i32, i32
  }
  func.func @transform_2(%arg0: i32, %arg1: i32) -> (i32, i32) {
    %c0_i32 = arith.constant 0 : i32
    %c0_i32_0 = arith.constant 0 : i32
    return %arg1, %c0_i32 : i32, i32
  }
  func.func @transform_3(%arg0: i32, %arg1: i32) -> (i32, i32) {
    %c0_i32 = arith.constant 0 : i32
    %c0_i32_0 = arith.constant 0 : i32
    return %arg0, %c0_i32 : i32, i32
  }
}

</mosaic_0001>

<bundles_post_ra>
// kernel: tpu_custom_call.1
= control target key start
LH: loop header
LB: loop body
LE: loop exit
PB: predicated region body
PF: predicated region fallthrough
CT: control target
= control target key end

     0   :  { %8 = vsyncpa [#allocation3], 0  ;;  %s11696_s0 = inlined_call_operand.hbm [shape: bf16[16,512], index: 0, kind: input, shape index: {}]   ;;  %s11697_s1 = inlined_call_operand.hbm [shape: bf16[1,512,2816], index: 1, kind: input, shape index: {}]   ;;  %s11698_s2 = inlined_call_operand.hbm [shape: bf16[1408,512], index: 2, kind: input, shape index: {}]   ;;  %s11699_s3 = inlined_call_operand.hbm [shape: f32[16,512], index: 3, kind: output, shape index: {}]  }
   0x1   :  { %10 = vsyncpa [#allocation3 + $0x1], 0 }
   0x2   :  { %11 = vsyncpa [#allocation6], 0 }
   0x3   :  { %12 = vsyncpa [#allocation4], 0 }
   0x4   :  { %14 = vsyncpa [#allocation4 + $0x1], 0  ;;  %s11309_s12 = smov 0   ;;  %s11311_s13 = smov 0  }
   0x5   :  { %s11313_s14 = smov 0   ;;  %s11315_s15 = smov 0  }
   0x6   :  { %s11317_s16 = smov 0   ;;  %s11319_s17 = smov 0  }
   0x7 LB: > { %s8212_s18 = sadd.s32 4294967295, %s11278_s17   ;;  %s8213_s19 = sadd.s32 4294967294, %s11278_s17   ;;  %s11278_s17 = sphi %s11319_s17, %s20_s17   ;;  %s11274_s16 = sphi %s11317_s16, %s11721_s16   ;;  %s11270_s15 = sphi %s11315_s15, %s11720_s15   ;;  %s11266_s14 = sphi %s11313_s14, %s11719_s14   ;;  %s11262_s13 = sphi %s11311_s13, %s11718_s13   ;;  %s11258_s12 = sphi %s11309_s12, %s11717_s12  }
   0x8   : > { %p52_p0 = scmp.ne.s32.totalorder %s11262_s13, %s11258_s12  ;;  %p11343_p1 = scmp.eq.s32.totalorder %s8212_s18, 0 }
   0x9   : > { %p11347_p2 = scmp.eq.s32.totalorder %s8212_s18, 1  ;;  %p134_p3 = scmp.eq.s32.totalorder %s8213_s19, 1 }
   0xa   : > { %s11704_s20 = scalar_select %p11343_p1, 1, 0 }
   0xb   : > { %p11353_p4 = por %p11343_p1, %p52_p0  ;;  %p8214_p5 = scmp.ge.s32.totalorder %s11278_s17, 1 }
   0xc   : > { %p11358_p6 = por %p134_p3, %p52_p0  ;;  %p141_p7 = scmp.lt.s32.totalorder %s11278_s17, 3 }
   0xd   : > { %s11706_s22 = scalar_select %p11353_p4, 1, 0 }
   0xe   : > { %s11707_s23 = scalar_select %p11358_p6, 1, 0 }
   0xf   : > { %p11363_p8 = pnand %p8214_p5, %p141_p7  ;;  %s11280_s25 = smov [#allocation5]  }
  0x10   : > { %s156_s26 = sshll.u32 %s11280_s25, 4  ;;  %s11281_s28 = smov [#allocation7]   ;;  %s11367_s26 = int_to_ptr.vmem [resolvable:$true] %s156_s26 }
  0x11   : > { %p9398_p9 = pneg %p11363_p8  ;;  %s173_s29 = sshll.u32 %s11281_s28, 4  ;;  %s11378_s29 = int_to_ptr.vmem [resolvable:$true] %s173_s29 }
  0x12   : > { %s11106_s5 = scalar_lea.hbm %s11697_s1, 90112 }
  0x13   : > { %p11374_p11 = pnand %p9398_p9, %p11343_p1  ;;  %p11107_p12 = scmp.ne.s32.totalorder %s11697_s1, %s11106_s5 }
  0x14   : > { %p11113_p5 = scmp.lt.u32.totalorder %s11106_s5, %s11697_s1 }
  0x15   : > { %p11108_p13 = pneg %p11374_p11 }
  0x17   : > { %p11109_p0 = pnand %p11108_p13, %p11107_p12 }
  0x19   : > { %p11110_p3 = pneg %p11109_p0 }
  0x1b   : > { %p11115_p7 = pnand %p11113_p5, %p11110_p3 }
  0x1d   : > { %11118 = shalt.err (!%p11115_p7)
}
  0x1e   : > { %s11119_s10 = scalar_lea.vmem %s11367_s26, 90112  ;;  %p11127_p1 = scmp.lt.s32.totalorder %s11367_s26, %s11367_s26 }
  0x1f   : > { %p11120_p9 = scmp.ne.s32.totalorder %s11367_s26, %s11119_s10  ;;  %p11128_p12 = scmp.lt.s32.totalorder %s11119_s10, %s11119_s10 }
  0x21   : > { %p11122_p10 = pnand %p11120_p9, %p11108_p13  ;;  %p11129_p0 = por %p11128_p12, %p11127_p1 }
  0x23   : > { %p11123_p6 = pneg %p11122_p10 }
  0x25   : > { %p11130_p4 = pnand %p11129_p0, %p11123_p6 }
  0x27   : > { %11133 = shalt.err (!%p11130_p4)
}
  0x28   : > { %s11282_s11 = smov 1408   ;;  %s11283_s18 = smov 88  }
  0x29   : > { %9401 = dma.hbm_to_vmem [thread:$0]  (!%p11374_p11), %s11697_s1, 90112, %s11367_s26, [#allocation6], %s11282_s11, %s11282_s11, %s11283_s18  }
  0x2a   : > { %s11134_s4 = scalar_lea.hbm %s11698_s2, 45056 }
  0x2b   : > { %p11135_p1 = scmp.ne.s32.totalorder %s11698_s2, %s11134_s4  ;;  %p11141_p10 = scmp.lt.u32.totalorder %s11134_s4, %s11698_s2 }
  0x2d   : > { %p11137_p4 = pnand %p11135_p1, %p11108_p13 }
  0x2f   : > { %p11138_p6 = pneg %p11137_p4 }
  0x31   : > { %p11143_p3 = pnand %p11141_p10, %p11138_p6 }
  0x33   : > { %11146 = shalt.err (!%p11143_p3)
}
  0x34   : > { %s11147_s26 = scalar_lea.vmem %s11378_s29, 45056  ;;  %p11155_p12 = scmp.lt.s32.totalorder %s11378_s29, %s11378_s29 }
  0x35   : > { %p11148_p5 = scmp.ne.s32.totalorder %s11378_s29, %s11147_s26  ;;  %p11156_p0 = scmp.lt.s32.totalorder %s11147_s26, %s11147_s26 }
  0x37   : > { %p11150_p7 = pnand %p11148_p5, %p11108_p13  ;;  %p11157_p1 = por %p11156_p0, %p11155_p12 }
  0x39   : > { %p11151_p9 = pneg %p11150_p7 }
  0x3b   : > { %p11158_p4 = pnand %p11157_p1, %p11151_p9 }
  0x3d   : > { %11161 = shalt.err (!%p11158_p4)
}
  0x3e   : > { %s11284_s9 = smov 256   ;;  %s11285_s10 = smov 16  }
  0x3f   : > { %9404 = dma.hbm_to_vmem [thread:$0]  (!%p11374_p11), %s11698_s2, 45056, %s11378_s29, [#allocation6], %s11284_s9, %s11284_s9, %s11285_s10  }
  0x40   : > { %s32_s19 = sadd.s32 1, %s11274_s16  ;;  %s39_s25 = sadd.s32 1, %s11266_s14 }
  0x41   : > { %p34_p13 = scmp.ge.s32.totalorder %s32_s19, 2  ;;  %p46_p6 = scmp.ne.s32.totalorder %s11266_s14, %s11262_s13 }
  0x42   : > { %p47_p10 = scmp.eq.s32.totalorder %s11278_s17, 0  ;;  %p9415_p3 = scmp.lt.s32.totalorder %s11278_s17, 2 }
  0x43   : > { %s11723_s19 = smov (%p34_p13, %s32_s19), 0  ;;  %p11442_p7 = por %p11347_p2, %p46_p6 }
  0x44   : > { %p48_p5 = por %p47_p10, %p46_p6  ;;  %s36_s27 = ssub.s32 %s11274_s16, %s11723_s19 }
  0x45   : > { %s11710_s28 = scalar_select %p11442_p7, 1, 0 }
  0x46   : > { %s187_s30 = sand.u32 1, %s11266_s14   ;;  %p37_p9 = scmp.eq.s32.totalorder %s36_s27, 0 }
  0x47   : > { %s8218_s29 = sshll.u32 %s187_s30, 4  ;;  %s9302_s4 = sshll.u32 %s11274_s16, 8 }
  0x48   : > { %s11451_s5 = scalar_select %p37_p9, %s11266_s14, %s39_s25  }
  0x49   : > { %s11456_s8 = scalar_lea.hbm %s11696_s0, %s9302_s4  ;;  %s191_s21 = scalar_lea.vmem [#allocation2], %s8218_s29 }
  0x4a   : > { %s199_s26 = sshll.u32 %s191_s21, 4  ;;  %p11460_p2 = pnand %p9415_p3, %p48_p5  ;;  %s11464_s26 = int_to_ptr.vmem [resolvable:$true] %s199_s26 }
  0x4b   : > { %s188_s10 = scalar_lea.sflag [#allocation3], %s187_s30  ;;  %s11162_s11 = scalar_lea.hbm %s11456_s8, 256 }
  0x4c   : > { %p11163_p11 = scmp.ne.s32.totalorder %s11456_s8, %s11162_s11  ;;  %p11164_p12 = pneg %p11460_p2 }
  0x4d   : > { %s11167_s27 = scalar_lea.hbm %s11696_s0, 512  ;;  %p11168_p4 = scmp.lt.u32.totalorder %s11456_s8, %s11696_s0 }
  0x4e   : > { %p11165_p0 = pnand %p11164_p12, %p11163_p11  ;;  %p11169_p13 = scmp.lt.u32.totalorder %s11167_s27, %s11162_s11 }
  0x4f   : > { %p11171_p10 = scmp.lt.u32.totalorder %s11162_s11, %s11456_s8 }
  0x50   : > { %p11166_p1 = pneg %p11165_p0  ;;  %p11170_p6 = por %p11169_p13, %p11168_p4 }
  0x52   : > { %p11172_p3 = por %p11171_p10, %p11170_p6 }
  0x54   : > { %p11173_p5 = pnand %p11172_p3, %p11166_p1 }
  0x56   : > { %11176 = shalt.err (!%p11173_p5)
}
  0x57   : > { %s11177_s30 = scalar_lea.vmem %s11464_s26, 256  ;;  %s11286_s6 = smov [#allocation2]  }
  0x58   : > { %p11178_p9 = scmp.ne.s32.totalorder %s11464_s26, %s11177_s30  ;;  %s11182_s7 = sshll.u32 %s11286_s6, 4  ;;  %s11183_s7 = int_to_ptr.vmem [resolvable:$false] %s11182_s7 }
  0x59   : > { %s11184_s21 = scalar_lea.vmem %s11183_s7, 512  ;;  %p11185_p7 = scmp.lt.s32.totalorder %s11464_s26, %s11183_s7 }
  0x5a   : > { %p11180_p11 = pnand %p11178_p9, %p11164_p12  ;;  %p11186_p4 = scmp.lt.s32.totalorder %s11184_s21, %s11177_s30 }
  0x5c   : > { %p11181_p0 = pneg %p11180_p11  ;;  %p11187_p13 = por %p11186_p4, %p11185_p7 }
  0x5e   : > { %p11188_p6 = pnand %p11187_p13, %p11181_p0 }
  0x60   : > { %11191 = shalt.err (!%p11188_p6)
}
  0x61   : > { %9408 = dma.hbm_to_vmem [thread:$0]  (!%p11460_p2), %s11456_s8, 256, %s11464_s26, %s188_s10  }
  0x62   : > { %208 = sbr.rel (%p11363_p8) target bundleno = 1395 (0x573), region = 32  ;;  %s11494_s11 = sand.u32 (!%p11363_p8), 1, %s11262_s13  }
  0x63   : > { %s8222_s18 = sshll.u32 (!%p11363_p8), %s11494_s11, 4  ;;  %s211_s25 = scalar_lea.sflag (!%p11363_p8), [#allocation3], %s11494_s11 }
  0x64   : > { %s11498_s27 = scalar_lea.vmem (!%p11363_p8), [#allocation2], %s8222_s18  ;;  %p11712_p7 = scmp.ne.s32.totalorder (!%p11363_p8), %s11706_s22, 0 }
  0x69   : > { %11245 = dma.done.wait (%p11712_p7), %s211_s25, 256  }
  0x6a   : > { %11247 = vsyncadd (%p11712_p7), %s211_s25, 4294967040  ;;  %p11713_p2 = scmp.ne.s32.totalorder %s11704_s20, 0 }
  0x6c   : > { %11249 = dma.done.wait (%p11713_p2), [#allocation6], 135168  }
  0x6d   : > { %11251 = vsyncadd (%p11713_p2), [#allocation6], 4294832128  ;;  %v9474_v0 = vld [vmem:[#allocation5 + $0x4] ss:$88 sps:$4 sm:$0xff]   ;;  %v9478_v2 = vld [vmem:[#allocation5] ss:$88 sps:$4 sm:$0xff]  }
  0x6e   : > { %v9476_v1 = vld [vmem:[#allocation5 + $0xb04] ss:$88 sps:$4 sm:$0xff]   ;;  %4487 = vmatprep.subr.bf16.mxu1 %v9474_v0  ;;  %v9479_v3 = vld [vmem:[#allocation5 + $0xb00] ss:$88 sps:$4 sm:$0xff]   ;;  %v9480_v4 = vld [vmem:[#allocation5 + $0xb4] ss:$88 sps:$4 sm:$0xff]  }
  0x6f   : > { %4528 = vmatprep.subr.bf16.mxu0 %v9476_v1  ;;  %4488 = vmatpush1.bf16.msra.mxu1 %v9478_v2  ;;  %v9482_v5 = vld [vmem:[#allocation5 + $0xbb4] ss:$88 sps:$4 sm:$0xff]   ;;  %v9484_v6 = vld [vmem:[#allocation5 + $0xb0] ss:$88 sps:$4 sm:$0xff]   ;;  %v9486_v8 = vld [vmem:[#allocation5 + $0x164] ss:$88 sps:$4 sm:$0xff]  }
  0x70   : > { %4529 = vmatpush1.bf16.msra.mxu0 %v9479_v3  ;;  %4489 = vmatprep.subr.bf16.mxu1 %v9480_v4  ;;  %v9485_v7 = vld [vmem:[#allocation5 + $0xbb0] ss:$88 sps:$4 sm:$0xff]   ;;  %v9488_v9 = vld [vmem:[#allocation5 + $0xc64] ss:$88 sps:$4 sm:$0xff]   ;;  %v9490_v10 = vld [vmem:[#allocation5 + $0x160] ss:$88 sps:$4 sm:$0xff]  }
  0x71   : > { %4530 = vmatprep.subr.bf16.mxu0 %v9482_v5  ;;  %v9491_v11 = vld [vmem:[#allocation5 + $0xc60] ss:$88 sps:$4 sm:$0xff]   ;;  %v9492_v12 = vld [vmem:[#allocation5 + $0x214] ss:$88 sps:$4 sm:$0xff]   ;;  %v9496_v14 = vld [vmem:[#allocation5 + $0x210] ss:$88 sps:$4 sm:$0xff]  }
  0x72   : > { %v9494_v13 = vld [vmem:[#allocation5 + $0xd14] ss:$88 sps:$4 sm:$0xff]   ;;  %v9497_v15 = vld [vmem:[#allocation5 + $0xd10] ss:$88 sps:$4 sm:$0xff]   ;;  %v9498_v16 = vld [vmem:[#allocation5 + $0x2c4] ss:$88 sps:$4 sm:$0xff]  }
  0x73   : > { %4490 = vmatpush1.bf16.msra.mxu1 %v9484_v6  ;;  %v9500_v17 = vld [vmem:[#allocation5 + $0xdc4] ss:$88 sps:$4 sm:$0xff]   ;;  %v9502_v18 = vld [vmem:[#allocation5 + $0x2c0] ss:$88 sps:$4 sm:$0xff]   ;;  %v9504_v20 = vld [vmem:[#allocation5 + $0x374] ss:$88 sps:$4 sm:$0xff]  }
  0x74   : > { %4531 = vmatpush1.bf16.msra.mxu0 %v9485_v7  ;;  %4491 = vmatprep.subr.bf16.mxu1 %v9486_v8  ;;  %v9503_v19 = vld [vmem:[#allocation5 + $0xdc0] ss:$88 sps:$4 sm:$0xff]   ;;  %v9506_v21 = vld [vmem:[#allocation5 + $0xe74] ss:$88 sps:$4 sm:$0xff]   ;;  %v9508_v22 = vld [vmem:[#allocation5 + $0x370] ss:$88 sps:$4 sm:$0xff]  }
  0x75   : > { %4532 = vmatprep.subr.bf16.mxu0 %v9488_v9  ;;  %v9509_v23 = vld [vmem:[#allocation5 + $0xe70] ss:$88 sps:$4 sm:$0xff]   ;;  %v9510_v24 = vld [vmem:[#allocation5 + $0x424] ss:$88 sps:$4 sm:$0xff]   ;;  %v9514_v26 = vld [vmem:[#allocation5 + $0x420] ss:$88 sps:$4 sm:$0xff]  }
  0x76   : > { %v9512_v25 = vld [vmem:[#allocation5 + $0xf24] ss:$88 sps:$4 sm:$0xff]   ;;  %v9515_v27 = vld [vmem:[#allocation5 + $0xf20] ss:$88 sps:$4 sm:$0xff]   ;;  %v9516_v28 = vld [vmem:[#allocation5 + $0x4d4] ss:$88 sps:$4 sm:$0xff]  }
  0x77   : > { %4492 = vmatpush1.bf16.msra.mxu1 %v9490_v10  ;;  %v9518_v29 = vld [vmem:[#allocation5 + $0xfd4] ss:$88 sps:$4 sm:$0xff]   ;;  %v9520_v30 = vld [vmem:[#allocation5 + $0x4d0] ss:$88 sps:$4 sm:$0xff]   ;;  %v9522_v32 = vld [vmem:[#allocation5 + $0x584] ss:$88 sps:$4 sm:$0xff]  }
  0x78   : > { %4533 = vmatpush1.bf16.msra.mxu0 %v9491_v11  ;;  %4493 = vmatprep.subr.bf16.mxu1 %v9492_v12  ;;  %v9521_v31 = vld [vmem:[#allocation5 + $0xfd0] ss:$88 sps:$4 sm:$0xff]   ;;  %v9524_v33 = vld [vmem:[#allocation5 + $0x1084] ss:$88 sps:$4 sm:$0xff]   ;;  %v9526_v34 = vld [vmem:[#allocation5 + $0x580] ss:$88 sps:$4 sm:$0xff]  }
  0x79   : > { %4534 = vmatprep.subr.bf16.mxu0 %v9494_v13  ;;  %v9527_v35 = vld [vmem:[#allocation5 + $0x1080] ss:$88 sps:$4 sm:$0xff]   ;;  %v9528_v36 = vld [vmem:[#allocation5 + $0x634] ss:$88 sps:$4 sm:$0xff]   ;;  %v9532_v38 = vld [vmem:[#allocation5 + $0x630] ss:$88 sps:$4 sm:$0xff]  }
  0x7a   : > { %v9530_v37 = vld [vmem:[#allocation5 + $0x1134] ss:$88 sps:$4 sm:$0xff]   ;;  %v9533_v39 = vld [vmem:[#allocation5 + $0x1130] ss:$88 sps:$4 sm:$0xff]   ;;  %v9534_v40 = vld [vmem:[#allocation5 + $0x6e4] ss:$88 sps:$4 sm:$0xff]  }
  0x7b   : > { %4494 = vmatpush1.bf16.msra.mxu1 %v9496_v14  ;;  %v9536_v41 = vld [vmem:[#allocation5 + $0x11e4] ss:$88 sps:$4 sm:$0xff]   ;;  %v9538_v42 = vld [vmem:[#allocation5 + $0x6e0] ss:$88 sps:$4 sm:$0xff]   ;;  %v9540_v44 = vld [vmem:[#allocation5 + $0x794] ss:$88 sps:$4 sm:$0xff]  }
  0x7c   : > { %4535 = vmatpush1.bf16.msra.mxu0 %v9497_v15  ;;  %4495 = vmatprep.subr.bf16.mxu1 %v9498_v16  ;;  %v9539_v43 = vld [vmem:[#allocation5 + $0x11e0] ss:$88 sps:$4 sm:$0xff]   ;;  %v9542_v45 = vld [vmem:[#allocation5 + $0x1294] ss:$88 sps:$4 sm:$0xff]   ;;  %v9544_v49 = vld [vmem:[#allocation5 + $0x790] ss:$88 sps:$4 sm:$0xff]  }
  0x7d   : > { %4536 = vmatprep.subr.bf16.mxu0 %v9500_v17  ;;  %v247_v46 = vld [vmem:[%s11498_s27] sm:$0xff]  ;;  %v248_v48 = vld [vmem:[%s11498_s27 + $0x8] sm:$0xff]  ;;  %s8225_s20 = sshll.u32 %s11494_s11, 5  ;;  %s9303_s8 = sshll.u32 %s11270_s15, 9 }
  0x7e   : > { %v11509_v47 = vcombine.high %v247_v46, %v247_v46  ;;  %v9545_v50 = vld [vmem:[#allocation5 + $0x1290] ss:$88 sps:$4 sm:$0xff]   ;;  %v11512_v51 = vcombine.high %v248_v48, %v248_v48  ;;  %v9546_v52 = vld [vmem:[#allocation5 + $0x844] ss:$88 sps:$4 sm:$0xff]   ;;  %v9550_v54 = vld [vmem:[#allocation5 + $0x840] ss:$88 sps:$4 sm:$0xff]   ;;  %v11516_v6 = vcombine.low %v247_v46, %v247_v46  ;;  %v11518_v7 = vcombine.low %v248_v48, %v248_v48  ;;  %s11649_s10 = scalar_lea.hbm %s11699_s3, %s9303_s8 }
  0x7f   : > { %4496 = vmatpush1.bf16.msra.mxu1 %v9502_v18  ;;  %v9548_v53 = vld [vmem:[#allocation5 + $0x1344] ss:$88 sps:$4 sm:$0xff]   ;;  %v9551_v55 = vld [vmem:[#allocation5 + $0x1340] ss:$88 sps:$4 sm:$0xff]   ;;  %v9552_v56 = vld [vmem:[#allocation5 + $0x8f4] ss:$88 sps:$4 sm:$0xff]  }
  0x80   : > { %4537 = vmatpush1.bf16.msra.mxu0 %v9503_v19  ;;  %4497 = vmatprep.subr.bf16.mxu1 %v9504_v20  ;;  %v9554_v57 = vld [vmem:[#allocation5 + $0x13f4] ss:$88 sps:$4 sm:$0xff]   ;;  %v9556_v58 = vld [vmem:[#allocation5 + $0x8f0] ss:$88 sps:$4 sm:$0xff]   ;;  %v9558_v60 = vld [vmem:[#allocation5 + $0x9a4] ss:$88 sps:$4 sm:$0xff]  }
  0x81   : > { %4538 = vmatprep.subr.bf16.mxu0 %v9506_v21  ;;  %4519 = vmatprep.mubr.bf16.mxu1 %v11509_v47  ;;  %v9557_v59 = vld [vmem:[#allocation5 + $0x13f0] ss:$88 sps:$4 sm:$0xff]   ;;  %v9560_v61 = vld [vmem:[#allocation5 + $0x14a4] ss:$88 sps:$4 sm:$0xff]   ;;  %v9562_v62 = vld [vmem:[#allocation5 + $0x9a0] ss:$88 sps:$4 sm:$0xff]  }
  0x82   : > { %4560 = vmatprep.mubr.bf16.mxu0 %v11512_v51  ;;  %v9563_v63 = vld [vmem:[#allocation5 + $0x14a0] ss:$88 sps:$4 sm:$0xff]   ;;  %v9564_v0 = vld [vmem:[#allocation5 + $0xa54] ss:$88 sps:$4 sm:$0xff]   ;;  %v9568_v2 = vld [vmem:[#allocation5 + $0xa50] ss:$88 sps:$4 sm:$0xff]  }
  0x83   : > { %4498 = vmatpush1.bf16.msra.mxu1 %v9508_v22  ;;  %v9566_v1 = vld [vmem:[#allocation5 + $0x1554] ss:$88 sps:$4 sm:$0xff]   ;;  %v9569_v3 = vld [vmem:[#allocation5 + $0x1550] ss:$88 sps:$4 sm:$0xff]   ;;  %v9585_v11 = vld [vmem:[#allocation5 + $0xc4] ss:$88 sps:$4 sm:$0xff]  }
  0x84   : > { %4539 = vmatpush1.bf16.msra.mxu0 %v9509_v23  ;;  %4499 = vmatprep.subr.bf16.mxu1 %v9510_v24  ;;  %v9576_v4 = vld [vmem:[#allocation5 + $0xc] ss:$88 sps:$4 sm:$0xff]   ;;  %v9574_v8 = vld [vmem:[#allocation5 + $0x8] ss:$88 sps:$4 sm:$0xff]   ;;  %v9582_v10 = vld [vmem:[#allocation5 + $0xbc] ss:$88 sps:$4 sm:$0xff]  }
  0x85   : > { %4540 = vmatprep.subr.bf16.mxu0 %v9512_v25  ;;  %v9579_v5 = vld [vmem:[#allocation5 + $0x14] ss:$88 sps:$4 sm:$0xff]   ;;  %v9577_v9 = vld [vmem:[#allocation5 + $0x10] ss:$88 sps:$4 sm:$0xff]   ;;  %v9583_v13 = vld [vmem:[#allocation5 + $0xc0] ss:$88 sps:$4 sm:$0xff]  }
  0x86   : > { %v9580_v12 = vld [vmem:[#allocation5 + $0xb8] ss:$88 sps:$4 sm:$0xff]   ;;  %v9588_v14 = vld [vmem:[#allocation5 + $0x16c] ss:$88 sps:$4 sm:$0xff]   ;;  %v9586_v16 = vld [vmem:[#allocation5 + $0x168] ss:$88 sps:$4 sm:$0xff]  }
  0x87   : > { %4500 = vmatpush1.bf16.msra.mxu1 %v9514_v26  ;;  %v9591_v15 = vld [vmem:[#allocation5 + $0x174] ss:$88 sps:$4 sm:$0xff]   ;;  %v9589_v17 = vld [vmem:[#allocation5 + $0x170] ss:$88 sps:$4 sm:$0xff]   ;;  %v9597_v19 = vld [vmem:[#allocation5 + $0x224] ss:$88 sps:$4 sm:$0xff]  }
  0x88   : > { %4541 = vmatpush1.bf16.msra.mxu0 %v9515_v27  ;;  %4501 = vmatprep.subr.bf16.mxu1 %v9516_v28  ;;  %v9594_v18 = vld [vmem:[#allocation5 + $0x21c] ss:$88 sps:$4 sm:$0xff]   ;;  %v9592_v20 = vld [vmem:[#allocation5 + $0x218] ss:$88 sps:$4 sm:$0xff]   ;;  %v9600_v22 = vld [vmem:[#allocation5 + $0x2cc] ss:$88 sps:$4 sm:$0xff]  }
  0x89   : > { %4542 = vmatprep.subr.bf16.mxu0 %v9518_v29  ;;  %v9595_v21 = vld [vmem:[#allocation5 + $0x220] ss:$88 sps:$4 sm:$0xff]   ;;  %v9603_v23 = vld [vmem:[#allocation5 + $0x2d4] ss:$88 sps:$4 sm:$0xff]   ;;  %v9601_v25 = vld [vmem:[#allocation5 + $0x2d0] ss:$88 sps:$4 sm:$0xff]  }
  0x8a   : > { %v9598_v24 = vld [vmem:[#allocation5 + $0x2c8] ss:$88 sps:$4 sm:$0xff]   ;;  %v9606_v26 = vld [vmem:[#allocation5 + $0x37c] ss:$88 sps:$4 sm:$0xff]   ;;  %v9604_v28 = vld [vmem:[#allocation5 + $0x378] ss:$88 sps:$4 sm:$0xff]  }
  0x8b   : > { %4502 = vmatpush1.bf16.msra.mxu1 %v9520_v30  ;;  %v9609_v27 = vld [vmem:[#allocation5 + $0x384] ss:$88 sps:$4 sm:$0xff]   ;;  %v9607_v29 = vld [vmem:[#allocation5 + $0x380] ss:$88 sps:$4 sm:$0xff]   ;;  %v9639_v48 = vld [vmem:[#allocation5 + $0x6f4] ss:$88 sps:$4 sm:$0xff]  }
  0x8c   : > { %4543 = vmatpush1.bf16.msra.mxu0 %v9521_v31  ;;  %4503 = vmatprep.subr.bf16.mxu1 %v9522_v32  ;;  %v9612_v30 = vld [vmem:[#allocation5 + $0x42c] ss:$88 sps:$4 sm:$0xff]   ;;  %v9610_v32 = vld [vmem:[#allocation5 + $0x428] ss:$88 sps:$4 sm:$0xff]   ;;  %s244_s22 = scalar_lea.vmem [#allocation8], %s8225_s20  ;;  %s8097_s15 = scalar_lea.sflag [#allocation4], %s11494_s11 }
  0x8d   : > { %4544 = vmatprep.subr.bf16.mxu0 %v9524_v33  ;;  %v9615_v31 = vld [vmem:[#allocation5 + $0x434] ss:$88 sps:$4 sm:$0xff]   ;;  %v9613_v33 = vld [vmem:[#allocation5 + $0x430] ss:$88 sps:$4 sm:$0xff]   ;;  %s8111_s24 = sshll.u32 %s244_s22, 4  ;;  %p11714_p12 = scmp.ne.s32.totalorder %s11710_s28, 0  ;;  %s11644_s24 = int_to_ptr.vmem [resolvable:$true] %s8111_s24 }
  0x8e   : > { %v9636_v46 = vld [vmem:[#allocation5 + $0x6ec] ss:$88 sps:$4 sm:$0xff]   ;;  %s11192_s29 = scalar_lea.vmem %s11644_s24, 512  ;;  %s11288_s4 = smov [#allocation8]  }
  0x8f   : > { %4504 = vmatpush1.bf16.msra.mxu1 %v9526_v34  ;;  %v9618_v34 = vld [vmem:[#allocation5 + $0x4dc] ss:$88 sps:$4 sm:$0xff]   ;;  %p11193_p8 = scmp.ne.s32.totalorder %s11644_s24, %s11192_s29  ;;  %s11196_s30 = sshll.u32 %s11288_s4, 4  ;;  %s11197_s30 = int_to_ptr.vmem [resolvable:$false] %s11196_s30 }
  0x90   : > { %4545 = vmatpush1.bf16.msra.mxu0 %v9527_v35  ;;  %4505 = vmatprep.subr.bf16.mxu1 %v9528_v36  ;;  %v9621_v35 = vld [vmem:[#allocation5 + $0x4e4] ss:$88 sps:$4 sm:$0xff]   ;;  %v9616_v36 = vld [vmem:[#allocation5 + $0x4d8] ss:$88 sps:$4 sm:$0xff]   ;;  %s11198_s6 = scalar_lea.vmem %s11197_s30, 1024  ;;  %p11199_p3 = scmp.lt.s32.totalorder %s11644_s24, %s11197_s30 }
  0x91   : > { %4546 = vmatprep.subr.bf16.mxu0 %v9530_v37  ;;  %v9619_v37 = vld [vmem:[#allocation5 + $0x4e0] ss:$88 sps:$4 sm:$0xff]   ;;  %p11194_p1 = pnand %p11193_p8, %p11714_p12  ;;  %p11200_p5 = scmp.lt.s32.totalorder %s11198_s6, %s11192_s29 }
  0x93   : > { %4506 = vmatpush1.bf16.msra.mxu1 %v9532_v38  ;;  %v9624_v38 = vld [vmem:[#allocation5 + $0x58c] ss:$88 sps:$4 sm:$0xff]   ;;  %p11195_p10 = pneg %p11194_p1  ;;  %p11201_p9 = por %p11200_p5, %p11199_p3 }
  0x94   : > { %4547 = vmatpush1.bf16.msra.mxu0 %v9533_v39  ;;  %4507 = vmatprep.subr.bf16.mxu1 %v9534_v40  ;;  %v9627_v39 = vld [vmem:[#allocation5 + $0x594] ss:$88 sps:$4 sm:$0xff]   ;;  %v9622_v40 = vld [vmem:[#allocation5 + $0x588] ss:$88 sps:$4 sm:$0xff]  }
  0x95   : > { %4548 = vmatprep.subr.bf16.mxu0 %v9536_v41  ;;  %v9625_v41 = vld [vmem:[#allocation5 + $0x590] ss:$88 sps:$4 sm:$0xff]   ;;  %p11202_p11 = pnand %p11201_p9, %p11195_p10 }
  0x97   : > { %4508 = vmatpush1.bf16.msra.mxu1 %v9538_v42  ;;  %v9630_v42 = vld [vmem:[#allocation5 + $0x63c] ss:$88 sps:$4 sm:$0xff]  }
  0x98   : > { %4549 = vmatpush1.bf16.msra.mxu0 %v9539_v43  ;;  %4509 = vmatprep.subr.bf16.mxu1 %v9540_v44  ;;  %v9633_v43 = vld [vmem:[#allocation5 + $0x644] ss:$88 sps:$4 sm:$0xff]   ;;  %v9628_v44 = vld [vmem:[#allocation5 + $0x638] ss:$88 sps:$4 sm:$0xff]  }
  0x99   : > { %4550 = vmatprep.subr.bf16.mxu0 %v9542_v45  ;;  %v9631_v45 = vld [vmem:[#allocation5 + $0x640] ss:$88 sps:$4 sm:$0xff]  }
  0x9b   : > { %4510 = vmatpush1.bf16.msra.mxu1 %v9544_v49  ;;  %v9634_v49 = vld [vmem:[#allocation5 + $0x6e8] ss:$88 sps:$4 sm:$0xff]  }
  0x9c   : > { %4551 = vmatpush1.bf16.msra.mxu0 %v9545_v50  ;;  %4511 = vmatprep.subr.bf16.mxu1 %v9546_v52  ;;  %v9637_v50 = vld [vmem:[#allocation5 + $0x6f0] ss:$88 sps:$4 sm:$0xff]   ;;  %v9642_v52 = vld [vmem:[#allocation5 + $0x79c] ss:$88 sps:$4 sm:$0xff]  }
  0x9d   : > { %4552 = vmatprep.subr.bf16.mxu0 %v9548_v53  ;;  %v9645_v53 = vld [vmem:[#allocation5 + $0x7a4] ss:$88 sps:$4 sm:$0xff]  }
  0x9f   : > { %4512 = vmatpush1.bf16.msra.mxu1 %v9550_v54  ;;  %v9640_v54 = vld [vmem:[#allocation5 + $0x798] ss:$88 sps:$4 sm:$0xff]  }
  0xa0   : > { %4553 = vmatpush1.bf16.msra.mxu0 %v9551_v55  ;;  %4513 = vmatprep.subr.bf16.mxu1 %v9552_v56  ;;  %v9643_v55 = vld [vmem:[#allocation5 + $0x7a0] ss:$88 sps:$4 sm:$0xff]   ;;  %v9648_v56 = vld [vmem:[#allocation5 + $0x84c] ss:$88 sps:$4 sm:$0xff]  }
  0xa1   : > { %4554 = vmatprep.subr.bf16.mxu0 %v9554_v57  ;;  %v9651_v57 = vld [vmem:[#allocation5 + $0x854] ss:$88 sps:$4 sm:$0xff]  }
  0xa3   : > { %4514 = vmatpush1.bf16.msra.mxu1 %v9556_v58  ;;  %v9646_v58 = vld [vmem:[#allocation5 + $0x848] ss:$88 sps:$4 sm:$0xff]  }
  0xa4   : > { %4555 = vmatpush1.bf16.msra.mxu0 %v9557_v59  ;;  %4515 = vmatprep.subr.bf16.mxu1 %v9558_v60  ;;  %v9649_v59 = vld [vmem:[#allocation5 + $0x850] ss:$88 sps:$4 sm:$0xff]   ;;  %v9654_v60 = vld [vmem:[#allocation5 + $0x8fc] ss:$88 sps:$4 sm:$0xff]  }
  0xa5   : > { %4556 = vmatprep.subr.bf16.mxu0 %v9560_v61  ;;  %v9657_v61 = vld [vmem:[#allocation5 + $0x904] ss:$88 sps:$4 sm:$0xff]  }
  0xa7   : > { %4516 = vmatpush1.bf16.msra.mxu1 %v9562_v62  ;;  %v9652_v62 = vld [vmem:[#allocation5 + $0x8f8] ss:$88 sps:$4 sm:$0xff]  }
  0xa8   : > { %4557 = vmatpush1.bf16.msra.mxu0 %v9563_v63  ;;  %4517 = vmatprep.subr.bf16.mxu1 %v9564_v0  ;;  %v9655_v63 = vld [vmem:[#allocation5 + $0x900] ss:$88 sps:$4 sm:$0xff]   ;;  %v9660_v0 = vld [vmem:[#allocation5 + $0x9ac] ss:$88 sps:$4 sm:$0xff]  }
  0xa9   : > { %4558 = vmatprep.subr.bf16.mxu0 %v9566_v1  ;;  %v9663_v1 = vld [vmem:[#allocation5 + $0x9b4] ss:$88 sps:$4 sm:$0xff]  }
  0xab   : > { %4518 = vmatpush1.bf16.msra.mxu1 %v9568_v2  ;;  %v9658_v2 = vld [vmem:[#allocation5 + $0x9a8] ss:$88 sps:$4 sm:$0xff]  }
  0xac   : > { %4559 = vmatpush1.bf16.msra.mxu0 %v9569_v3  ;;  %4569 = vmatprep.subr.bf16.mxu1 %v9576_v4  ;;  %v9661_v3 = vld [vmem:[#allocation5 + $0x9b0] ss:$88 sps:$4 sm:$0xff]   ;;  %v9666_v4 = vld [vmem:[#allocation5 + $0xa5c] ss:$88 sps:$4 sm:$0xff]  }
  0xad   : > { %4651 = vmatprep.subr.bf16.mxu0 %v9579_v5  ;;  %v9669_v5 = vld [vmem:[#allocation5 + $0xa64] ss:$88 sps:$4 sm:$0xff]  }
  0xae   : > { %4520 = vmatmul.mubr.bf16.vlgmr.msra.gmra.mrb[0].mxu1 %v11516_v6 }
  0xaf   : > { %4561 = vmatmul.mubr.bf16.vlgmr.msra.gmra.mrb[0].mxu0 %v11518_v7  ;;  %4570 = vmatpush1.bf16.msra.mxu1 %v9574_v8  ;;  %v9664_v8 = vld [vmem:[#allocation5 + $0xa58] ss:$88 sps:$4 sm:$0xff]  }
  0xb0   : > { %4652 = vmatpush1.bf16.msra.mxu0 %v9577_v9  ;;  %4571 = vmatprep.subr.bf16.mxu1 %v9582_v10  ;;  %v9667_v9 = vld [vmem:[#allocation5 + $0xa60] ss:$88 sps:$4 sm:$0xff]   ;;  %v9672_v10 = vld [vmem:[#allocation5 + $0xb0c] ss:$88 sps:$4 sm:$0xff]  }
  0xb1   : > { %4653 = vmatprep.subr.bf16.mxu0 %v9585_v11  ;;  %4601 = vmatprep.mubr.bf16.mxu1 %v11509_v47  ;;  %v9675_v11 = vld [vmem:[#allocation5 + $0xb14] ss:$88 sps:$4 sm:$0xff]  }
  0xb2   : > { %4683 = vmatprep.mubr.bf16.mxu0 %v11509_v47 }
  0xb3   : > { %4572 = vmatpush1.bf16.msra.mxu1 %v9580_v12  ;;  %v9670_v12 = vld [vmem:[#allocation5 + $0xb08] ss:$88 sps:$4 sm:$0xff]  }
  0xb4   : > { %4654 = vmatpush1.bf16.msra.mxu0 %v9583_v13  ;;  %4573 = vmatprep.subr.bf16.mxu1 %v9588_v14  ;;  %v9673_v13 = vld [vmem:[#allocation5 + $0xb10] ss:$88 sps:$4 sm:$0xff]   ;;  %v9678_v14 = vld [vmem:[#allocation5 + $0xbbc] ss:$88 sps:$4 sm:$0xff]  }
  0xb5   : > { %4655 = vmatprep.subr.bf16.mxu0 %v9591_v15  ;;  %v9681_v15 = vld [vmem:[#allocation5 + $0xbc4] ss:$88 sps:$4 sm:$0xff]  }
  0xb7   : > { %4574 = vmatpush1.bf16.msra.mxu1 %v9586_v16  ;;  %v9676_v16 = vld [vmem:[#allocation5 + $0xbb8] ss:$88 sps:$4 sm:$0xff]  }
  0xb8   : > { %4656 = vmatpush1.bf16.msra.mxu0 %v9589_v17  ;;  %4575 = vmatprep.subr.bf16.mxu1 %v9594_v18  ;;  %v9679_v17 = vld [vmem:[#allocation5 + $0xbc0] ss:$88 sps:$4 sm:$0xff]   ;;  %v9684_v18 = vld [vmem:[#allocation5 + $0xc6c] ss:$88 sps:$4 sm:$0xff]  }
  0xb9   : > { %4657 = vmatprep.subr.bf16.mxu0 %v9597_v19  ;;  %v9687_v19 = vld [vmem:[#allocation5 + $0xc74] ss:$88 sps:$4 sm:$0xff]  }
  0xbb   : > { %4576 = vmatpush1.bf16.msra.mxu1 %v9592_v20  ;;  %v9682_v20 = vld [vmem:[#allocation5 + $0xc68] ss:$88 sps:$4 sm:$0xff]  }
  0xbc   : > { %4658 = vmatpush1.bf16.msra.mxu0 %v9595_v21  ;;  %4577 = vmatprep.subr.bf16.mxu1 %v9600_v22  ;;  %v9685_v21 = vld [vmem:[#allocation5 + $0xc70] ss:$88 sps:$4 sm:$0xff]   ;;  %v9690_v22 = vld [vmem:[#allocation5 + $0xd1c] ss:$88 sps:$4 sm:$0xff]  }
  0xbd   : > { %4659 = vmatprep.subr.bf16.mxu0 %v9603_v23  ;;  %v9693_v23 = vld [vmem:[#allocation5 + $0xd24] ss:$88 sps:$4 sm:$0xff]  }
  0xbf   : > { %4578 = vmatpush1.bf16.msra.mxu1 %v9598_v24  ;;  %v9688_v24 = vld [vmem:[#allocation5 + $0xd18] ss:$88 sps:$4 sm:$0xff]  }
  0xc0   : > { %4660 = vmatpush1.bf16.msra.mxu0 %v9601_v25  ;;  %4579 = vmatprep.subr.bf16.mxu1 %v9606_v26  ;;  %v9691_v25 = vld [vmem:[#allocation5 + $0xd20] ss:$88 sps:$4 sm:$0xff]   ;;  %v9696_v26 = vld [vmem:[#allocation5 + $0xdcc] ss:$88 sps:$4 sm:$0xff]  }
  0xc1   : > { %4661 = vmatprep.subr.bf16.mxu0 %v9609_v27  ;;  %v9699_v27 = vld [vmem:[#allocation5 + $0xdd4] ss:$88 sps:$4 sm:$0xff]  }
  0xc3   : > { %4580 = vmatpush1.bf16.msra.mxu1 %v9604_v28  ;;  %v9694_v28 = vld [vmem:[#allocation5 + $0xdc8] ss:$88 sps:$4 sm:$0xff]  }
  0xc4   : > { %4662 = vmatpush1.bf16.msra.mxu0 %v9607_v29  ;;  %4581 = vmatprep.subr.bf16.mxu1 %v9612_v30  ;;  %v9697_v29 = vld [vmem:[#allocation5 + $0xdd0] ss:$88 sps:$4 sm:$0xff]   ;;  %v9702_v30 = vld [vmem:[#allocation5 + $0xe7c] ss:$88 sps:$4 sm:$0xff]  }
  0xc5   : > { %4663 = vmatprep.subr.bf16.mxu0 %v9615_v31  ;;  %v9705_v31 = vld [vmem:[#allocation5 + $0xe84] ss:$88 sps:$4 sm:$0xff]  }
  0xc7   : > { %4582 = vmatpush1.bf16.msra.mxu1 %v9610_v32  ;;  %v9700_v32 = vld [vmem:[#allocation5 + $0xe78] ss:$88 sps:$4 sm:$0xff]  }
  0xc8   : > { %4664 = vmatpush1.bf16.msra.mxu0 %v9613_v33  ;;  %4583 = vmatprep.subr.bf16.mxu1 %v9618_v34  ;;  %v9703_v33 = vld [vmem:[#allocation5 + $0xe80] ss:$88 sps:$4 sm:$0xff]   ;;  %v9708_v34 = vld [vmem:[#allocation5 + $0xf2c] ss:$88 sps:$4 sm:$0xff]  }
  0xc9   : > { %4665 = vmatprep.subr.bf16.mxu0 %v9621_v35  ;;  %v9711_v35 = vld [vmem:[#allocation5 + $0xf34] ss:$88 sps:$4 sm:$0xff]  }
  0xcb   : > { %4584 = vmatpush1.bf16.msra.mxu1 %v9616_v36  ;;  %v9706_v36 = vld [vmem:[#allocation5 + $0xf28] ss:$88 sps:$4 sm:$0xff]  }
  0xcc   : > { %4666 = vmatpush1.bf16.msra.mxu0 %v9619_v37  ;;  %4585 = vmatprep.subr.bf16.mxu1 %v9624_v38  ;;  %v9709_v37 = vld [vmem:[#allocation5 + $0xf30] ss:$88 sps:$4 sm:$0xff]   ;;  %v9714_v38 = vld [vmem:[#allocation5 + $0xfdc] ss:$88 sps:$4 sm:$0xff]  }
  0xcd   : > { %4667 = vmatprep.subr.bf16.mxu0 %v9627_v39  ;;  %v9717_v39 = vld [vmem:[#allocation5 + $0xfe4] ss:$88 sps:$4 sm:$0xff]  }
  0xcf   : > { %4586 = vmatpush1.bf16.msra.mxu1 %v9622_v40  ;;  %v9712_v40 = vld [vmem:[#allocation5 + $0xfd8] ss:$88 sps:$4 sm:$0xff]  }
  0xd0   : > { %4668 = vmatpush1.bf16.msra.mxu0 %v9625_v41  ;;  %4587 = vmatprep.subr.bf16.mxu1 %v9630_v42  ;;  %v9715_v41 = vld [vmem:[#allocation5 + $0xfe0] ss:$88 sps:$4 sm:$0xff]   ;;  %v9720_v42 = vld [vmem:[#allocation5 + $0x108c] ss:$88 sps:$4 sm:$0xff]  }
  0xd1   : > { %4669 = vmatprep.subr.bf16.mxu0 %v9633_v43  ;;  %v9723_v43 = vld [vmem:[#allocation5 + $0x1094] ss:$88 sps:$4 sm:$0xff]  }
  0xd3   : > { %4588 = vmatpush1.bf16.msra.mxu1 %v9628_v44  ;;  %v9718_v44 = vld [vmem:[#allocation5 + $0x1088] ss:$88 sps:$4 sm:$0xff]  }
  0xd4   : > { %4670 = vmatpush1.bf16.msra.mxu0 %v9631_v45  ;;  %4589 = vmatprep.subr.bf16.mxu1 %v9636_v46  ;;  %v9721_v45 = vld [vmem:[#allocation5 + $0x1090] ss:$88 sps:$4 sm:$0xff]   ;;  %v9726_v46 = vld [vmem:[#allocation5 + $0x113c] ss:$88 sps:$4 sm:$0xff]  }
  0xd5   : > { %4671 = vmatprep.subr.bf16.mxu0 %v9639_v48  ;;  %v9729_v48 = vld [vmem:[#allocation5 + $0x1144] ss:$88 sps:$4 sm:$0xff]  }
  0xd7   : > { %4590 = vmatpush1.bf16.msra.mxu1 %v9634_v49  ;;  %v9724_v49 = vld [vmem:[#allocation5 + $0x1138] ss:$88 sps:$4 sm:$0xff]  }
  0xd8   : > { %4672 = vmatpush1.bf16.msra.mxu0 %v9637_v50  ;;  %4591 = vmatprep.subr.bf16.mxu1 %v9642_v52  ;;  %v9727_v50 = vld [vmem:[#allocation5 + $0x1140] ss:$88 sps:$4 sm:$0xff]   ;;  %v9732_v52 = vld [vmem:[#allocation5 + $0x11ec] ss:$88 sps:$4 sm:$0xff]  }
  0xd9   : > { %4673 = vmatprep.subr.bf16.mxu0 %v9645_v53  ;;  %v9735_v53 = vld [vmem:[#allocation5 + $0x11f4] ss:$88 sps:$4 sm:$0xff]  }
  0xdb   : > { %4592 = vmatpush1.bf16.msra.mxu1 %v9640_v54  ;;  %v9730_v54 = vld [vmem:[#allocation5 + $0x11e8] ss:$88 sps:$4 sm:$0xff]  }
  0xdc   : > { %4674 = vmatpush1.bf16.msra.mxu0 %v9643_v55  ;;  %4593 = vmatprep.subr.bf16.mxu1 %v9648_v56  ;;  %v9733_v55 = vld [vmem:[#allocation5 + $0x11f0] ss:$88 sps:$4 sm:$0xff]   ;;  %v9738_v56 = vld [vmem:[#allocation5 + $0x129c] ss:$88 sps:$4 sm:$0xff]  }
  0xdd   : > { %4675 = vmatprep.subr.bf16.mxu0 %v9651_v57  ;;  %v9741_v57 = vld [vmem:[#allocation5 + $0x12a4] ss:$88 sps:$4 sm:$0xff]  }
  0xdf   : > { %4594 = vmatpush1.bf16.msra.mxu1 %v9646_v58  ;;  %v9736_v58 = vld [vmem:[#allocation5 + $0x1298] ss:$88 sps:$4 sm:$0xff]  }
  0xe0   : > { %4676 = vmatpush1.bf16.msra.mxu0 %v9649_v59  ;;  %4595 = vmatprep.subr.bf16.mxu1 %v9654_v60  ;;  %v9739_v59 = vld [vmem:[#allocation5 + $0x12a0] ss:$88 sps:$4 sm:$0xff]   ;;  %v9744_v60 = vld [vmem:[#allocation5 + $0x134c] ss:$88 sps:$4 sm:$0xff]  }
  0xe1   : > { %4677 = vmatprep.subr.bf16.mxu0 %v9657_v61  ;;  %v9747_v61 = vld [vmem:[#allocation5 + $0x1354] ss:$88 sps:$4 sm:$0xff]  }
  0xe3   : > { %4596 = vmatpush1.bf16.msra.mxu1 %v9652_v62  ;;  %v9742_v62 = vld [vmem:[#allocation5 + $0x1348] ss:$88 sps:$4 sm:$0xff]  }
  0xe4   : > { %4678 = vmatpush1.bf16.msra.mxu0 %v9655_v63  ;;  %4597 = vmatprep.subr.bf16.mxu1 %v9660_v0  ;;  %v9745_v63 = vld [vmem:[#allocation5 + $0x1350] ss:$88 sps:$4 sm:$0xff]   ;;  %v9750_v0 = vld [vmem:[#allocation5 + $0x13fc] ss:$88 sps:$4 sm:$0xff]  }
  0xe5   : > { %4679 = vmatprep.subr.bf16.mxu0 %v9663_v1  ;;  %v9753_v1 = vld [vmem:[#allocation5 + $0x1404] ss:$88 sps:$4 sm:$0xff]  }
  0xe7   : > { %4598 = vmatpush1.bf16.msra.mxu1 %v9658_v2  ;;  %v9748_v2 = vld [vmem:[#allocation5 + $0x13f8] ss:$88 sps:$4 sm:$0xff]  }
  0xe8   : > { %4680 = vmatpush1.bf16.msra.mxu0 %v9661_v3  ;;  %4599 = vmatprep.subr.bf16.mxu1 %v9666_v4  ;;  %v9751_v3 = vld [vmem:[#allocation5 + $0x1400] ss:$88 sps:$4 sm:$0xff]   ;;  %v9756_v4 = vld [vmem:[#allocation5 + $0x14ac] ss:$88 sps:$4 sm:$0xff]  }
  0xe9   : > { %4681 = vmatprep.subr.bf16.mxu0 %v9669_v5  ;;  %v9759_v5 = vld [vmem:[#allocation5 + $0x14b4] ss:$88 sps:$4 sm:$0xff]  }
  0xeb   : > { %4600 = vmatpush1.bf16.msra.mxu1 %v9664_v8  ;;  %v9754_v8 = vld [vmem:[#allocation5 + $0x14a8] ss:$88 sps:$4 sm:$0xff]  }
  0xec   : > { %4682 = vmatpush1.bf16.msra.mxu0 %v9667_v9  ;;  %4610 = vmatprep.subr.bf16.mxu1 %v9672_v10  ;;  %v9757_v9 = vld [vmem:[#allocation5 + $0x14b0] ss:$88 sps:$4 sm:$0xff]   ;;  %v9762_v10 = vld [vmem:[#allocation5 + $0x155c] ss:$88 sps:$4 sm:$0xff]  }
  0xed   : > { %4692 = vmatprep.subr.bf16.mxu0 %v9675_v11  ;;  %v9765_v11 = vld [vmem:[#allocation5 + $0x1564] ss:$88 sps:$4 sm:$0xff]  }
  0xee   : > { %4602 = vmatmul.mubr.bf16.vlgmr.msra.gmra.mrb[4].mxu1 %v11516_v6 }
  0xef   : > { %4684 = vmatmul.mubr.bf16.vlgmr.msra.gmra.mrb[4].mxu0 %v11516_v6  ;;  %4611 = vmatpush1.bf16.msra.mxu1 %v9670_v12  ;;  %v9760_v12 = vld [vmem:[#allocation5 + $0x1558] ss:$88 sps:$4 sm:$0xff]  }
  0xf0   : > { %4693 = vmatpush1.bf16.msra.mxu0 %v9673_v13  ;;  %4612 = vmatprep.subr.bf16.mxu1 %v9678_v14  ;;  %v9763_v13 = vld [vmem:[#allocation5 + $0x1560] ss:$88 sps:$4 sm:$0xff]   ;;  %v9768_v14 = vld [vmem:[#allocation5 + $0x1c] ss:$88 sps:$4 sm:$0xff]  }
  0xf1   : > { %4694 = vmatprep.subr.bf16.mxu0 %v9681_v15  ;;  %4642 = vmatprep.mubr.bf16.mxu1 %v11512_v51  ;;  %v9771_v15 = vld [vmem:[#allocation5 + $0x24] ss:$88 sps:$4 sm:$0xff]  }
  0xf2   : > { %4724 = vmatprep.mubr.bf16.mxu0 %v11512_v51 }
  0xf3   : > { %4613 = vmatpush1.bf16.msra.mxu1 %v9676_v16  ;;  %v9766_v16 = vld [vmem:[#allocation5 + $0x18] ss:$88 sps:$4 sm:$0xff]  }
  0xf4   : > { %4695 = vmatpush1.bf16.msra.mxu0 %v9679_v17  ;;  %4614 = vmatprep.subr.bf16.mxu1 %v9684_v18  ;;  %v9769_v17 = vld [vmem:[#allocation5 + $0x20] ss:$88 sps:$4 sm:$0xff]   ;;  %v9774_v18 = vld [vmem:[#allocation5 + $0xcc] ss:$88 sps:$4 sm:$0xff]  }
  0xf5   : > { %4696 = vmatprep.subr.bf16.mxu0 %v9687_v19  ;;  %v9777_v19 = vld [vmem:[#allocation5 + $0xd4] ss:$88 sps:$4 sm:$0xff]  }
  0xf7   : > { %4615 = vmatpush1.bf16.msra.mxu1 %v9682_v20  ;;  %v9772_v20 = vld [vmem:[#allocation5 + $0xc8] ss:$88 sps:$4 sm:$0xff]  }
  0xf8   : > { %4697 = vmatpush1.bf16.msra.mxu0 %v9685_v21  ;;  %4616 = vmatprep.subr.bf16.mxu1 %v9690_v22  ;;  %v9775_v21 = vld [vmem:[#allocation5 + $0xd0] ss:$88 sps:$4 sm:$0xff]   ;;  %v9780_v22 = vld [vmem:[#allocation5 + $0x17c] ss:$88 sps:$4 sm:$0xff]  }
  0xf9   : > { %4698 = vmatprep.subr.bf16.mxu0 %v9693_v23  ;;  %v9783_v23 = vld [vmem:[#allocation5 + $0x184] ss:$88 sps:$4 sm:$0xff]  }
  0xfb   : > { %4617 = vmatpush1.bf16.msra.mxu1 %v9688_v24  ;;  %v9778_v24 = vld [vmem:[#allocation5 + $0x178] ss:$88 sps:$4 sm:$0xff]  }
  0xfc   : > { %4699 = vmatpush1.bf16.msra.mxu0 %v9691_v25  ;;  %4618 = vmatprep.subr.bf16.mxu1 %v9696_v26  ;;  %v9781_v25 = vld [vmem:[#allocation5 + $0x180] ss:$88 sps:$4 sm:$0xff]   ;;  %v9786_v26 = vld [vmem:[#allocation5 + $0x22c] ss:$88 sps:$4 sm:$0xff]  }
  0xfd   : > { %4700 = vmatprep.subr.bf16.mxu0 %v9699_v27  ;;  %v9789_v27 = vld [vmem:[#allocation5 + $0x234] ss:$88 sps:$4 sm:$0xff]  }
  0xff   : > { %4619 = vmatpush1.bf16.msra.mxu1 %v9694_v28  ;;  %v9784_v28 = vld [vmem:[#allocation5 + $0x228] ss:$88 sps:$4 sm:$0xff]  }
 0x100   : > { %4701 = vmatpush1.bf16.msra.mxu0 %v9697_v29  ;;  %4620 = vmatprep.subr.bf16.mxu1 %v9702_v30  ;;  %v9787_v29 = vld [vmem:[#allocation5 + $0x230] ss:$88 sps:$4 sm:$0xff]   ;;  %v9792_v30 = vld [vmem:[#allocation5 + $0x2dc] ss:$88 sps:$4 sm:$0xff]  }
 0x101   : > { %4702 = vmatprep.subr.bf16.mxu0 %v9705_v31  ;;  %v9795_v31 = vld [vmem:[#allocation5 + $0x2e4] ss:$88 sps:$4 sm:$0xff]  }
 0x103   : > { %4621 = vmatpush1.bf16.msra.mxu1 %v9700_v32  ;;  %v9790_v32 = vld [vmem:[#allocation5 + $0x2d8] ss:$88 sps:$4 sm:$0xff]  }
 0x104   : > { %4703 = vmatpush1.bf16.msra.mxu0 %v9703_v33  ;;  %4622 = vmatprep.subr.bf16.mxu1 %v9708_v34  ;;  %v9793_v33 = vld [vmem:[#allocation5 + $0x2e0] ss:$88 sps:$4 sm:$0xff]   ;;  %v9798_v34 = vld [vmem:[#allocation5 + $0x38c] ss:$88 sps:$4 sm:$0xff]  }
 0x105   : > { %4704 = vmatprep.subr.bf16.mxu0 %v9711_v35  ;;  %v9801_v35 = vld [vmem:[#allocation5 + $0x394] ss:$88 sps:$4 sm:$0xff]  }
 0x107   : > { %4623 = vmatpush1.bf16.msra.mxu1 %v9706_v36  ;;  %v9796_v36 = vld [vmem:[#allocation5 + $0x388] ss:$88 sps:$4 sm:$0xff]  }
 0x108   : > { %4705 = vmatpush1.bf16.msra.mxu0 %v9709_v37  ;;  %4624 = vmatprep.subr.bf16.mxu1 %v9714_v38  ;;  %v9799_v37 = vld [vmem:[#allocation5 + $0x390] ss:$88 sps:$4 sm:$0xff]   ;;  %v9804_v38 = vld [vmem:[#allocation5 + $0x43c] ss:$88 sps:$4 sm:$0xff]  }
 0x109   : > { %4706 = vmatprep.subr.bf16.mxu0 %v9717_v39  ;;  %v9807_v39 = vld [vmem:[#allocation5 + $0x444] ss:$88 sps:$4 sm:$0xff]  }
 0x10b   : > { %4625 = vmatpush1.bf16.msra.mxu1 %v9712_v40  ;;  %v9802_v40 = vld [vmem:[#allocation5 + $0x438] ss:$88 sps:$4 sm:$0xff]  }
 0x10c   : > { %4707 = vmatpush1.bf16.msra.mxu0 %v9715_v41  ;;  %4626 = vmatprep.subr.bf16.mxu1 %v9720_v42  ;;  %v9805_v41 = vld [vmem:[#allocation5 + $0x440] ss:$88 sps:$4 sm:$0xff]   ;;  %v9810_v42 = vld [vmem:[#allocation5 + $0x4ec] ss:$88 sps:$4 sm:$0xff]  }
 0x10d   : > { %4708 = vmatprep.subr.bf16.mxu0 %v9723_v43  ;;  %v9813_v43 = vld [vmem:[#allocation5 + $0x4f4] ss:$88 sps:$4 sm:$0xff]  }
 0x10f   : > { %4627 = vmatpush1.bf16.msra.mxu1 %v9718_v44  ;;  %v9808_v44 = vld [vmem:[#allocation5 + $0x4e8] ss:$88 sps:$4 sm:$0xff]  }
 0x110   : > { %4709 = vmatpush1.bf16.msra.mxu0 %v9721_v45  ;;  %4628 = vmatprep.subr.bf16.mxu1 %v9726_v46  ;;  %v9811_v45 = vld [vmem:[#allocation5 + $0x4f0] ss:$88 sps:$4 sm:$0xff]   ;;  %v9816_v46 = vld [vmem:[#allocation5 + $0x59c] ss:$88 sps:$4 sm:$0xff]  }
 0x111   : > { %4710 = vmatprep.subr.bf16.mxu0 %v9729_v48  ;;  %v9819_v48 = vld [vmem:[#allocation5 + $0x5a4] ss:$88 sps:$4 sm:$0xff]  }
 0x113   : > { %4629 = vmatpush1.bf16.msra.mxu1 %v9724_v49  ;;  %v9814_v49 = vld [vmem:[#allocation5 + $0x598] ss:$88 sps:$4 sm:$0xff]  }
 0x114   : > { %4711 = vmatpush1.bf16.msra.mxu0 %v9727_v50  ;;  %4630 = vmatprep.subr.bf16.mxu1 %v9732_v52  ;;  %v9817_v50 = vld [vmem:[#allocation5 + $0x5a0] ss:$88 sps:$4 sm:$0xff]   ;;  %v9822_v52 = vld [vmem:[#allocation5 + $0x64c] ss:$88 sps:$4 sm:$0xff]  }
 0x115   : > { %4712 = vmatprep.subr.bf16.mxu0 %v9735_v53  ;;  %v9825_v53 = vld [vmem:[#allocation5 + $0x654] ss:$88 sps:$4 sm:$0xff]  }
 0x117   : > { %4631 = vmatpush1.bf16.msra.mxu1 %v9730_v54  ;;  %v9820_v54 = vld [vmem:[#allocation5 + $0x648] ss:$88 sps:$4 sm:$0xff]  }
 0x118   : > { %4713 = vmatpush1.bf16.msra.mxu0 %v9733_v55  ;;  %4632 = vmatprep.subr.bf16.mxu1 %v9738_v56  ;;  %v9823_v55 = vld [vmem:[#allocation5 + $0x650] ss:$88 sps:$4 sm:$0xff]   ;;  %v9828_v56 = vld [vmem:[#allocation5 + $0x6fc] ss:$88 sps:$4 sm:$0xff]  }
 0x119   : > { %4714 = vmatprep.subr.bf16.mxu0 %v9741_v57  ;;  %v9831_v57 = vld [vmem:[#allocation5 + $0x704] ss:$88 sps:$4 sm:$0xff]  }
 0x11b   : > { %4633 = vmatpush1.bf16.msra.mxu1 %v9736_v58  ;;  %v9826_v58 = vld [vmem:[#allocation5 + $0x6f8] ss:$88 sps:$4 sm:$0xff]  }
 0x11c   : > { %4715 = vmatpush1.bf16.msra.mxu0 %v9739_v59  ;;  %4634 = vmatprep.subr.bf16.mxu1 %v9744_v60  ;;  %v9829_v59 = vld [vmem:[#allocation5 + $0x700] ss:$88 sps:$4 sm:$0xff]   ;;  %v9834_v60 = vld [vmem:[#allocation5 + $0x7ac] ss:$88 sps:$4 sm:$0xff]  }
 0x11d   : > { %4716 = vmatprep.subr.bf16.mxu0 %v9747_v61  ;;  %v9837_v61 = vld [vmem:[#allocation5 + $0x7b4] ss:$88 sps:$4 sm:$0xff]  }
 0x11f   : > { %4635 = vmatpush1.bf16.msra.mxu1 %v9742_v62  ;;  %v9832_v62 = vld [vmem:[#allocation5 + $0x7a8] ss:$88 sps:$4 sm:$0xff]  }
 0x120   : > { %4717 = vmatpush1.bf16.msra.mxu0 %v9745_v63  ;;  %4636 = vmatprep.subr.bf16.mxu1 %v9750_v0  ;;  %v9835_v63 = vld [vmem:[#allocation5 + $0x7b0] ss:$88 sps:$4 sm:$0xff]   ;;  %v9840_v0 = vld [vmem:[#allocation5 + $0x85c] ss:$88 sps:$4 sm:$0xff]  }
 0x121   : > { %4718 = vmatprep.subr.bf16.mxu0 %v9753_v1  ;;  %v9843_v1 = vld [vmem:[#allocation5 + $0x864] ss:$88 sps:$4 sm:$0xff]  }
 0x123   : > { %4637 = vmatpush1.bf16.msra.mxu1 %v9748_v2  ;;  %v9838_v2 = vld [vmem:[#allocation5 + $0x858] ss:$88 sps:$4 sm:$0xff]  }
 0x124   : > { %4719 = vmatpush1.bf16.msra.mxu0 %v9751_v3  ;;  %4638 = vmatprep.subr.bf16.mxu1 %v9756_v4  ;;  %v9841_v3 = vld [vmem:[#allocation5 + $0x860] ss:$88 sps:$4 sm:$0xff]   ;;  %v9846_v4 = vld [vmem:[#allocation5 + $0x90c] ss:$88 sps:$4 sm:$0xff]  }
 0x125   : > { %4720 = vmatprep.subr.bf16.mxu0 %v9759_v5  ;;  %v9849_v5 = vld [vmem:[#allocation5 + $0x914] ss:$88 sps:$4 sm:$0xff]  }
 0x127   : > { %4639 = vmatpush1.bf16.msra.mxu1 %v9754_v8  ;;  %v9844_v8 = vld [vmem:[#allocation5 + $0x908] ss:$88 sps:$4 sm:$0xff]  }
 0x128   : > { %4721 = vmatpush1.bf16.msra.mxu0 %v9757_v9  ;;  %4640 = vmatprep.subr.bf16.mxu1 %v9762_v10  ;;  %v9847_v9 = vld [vmem:[#allocation5 + $0x910] ss:$88 sps:$4 sm:$0xff]   ;;  %v9852_v10 = vld [vmem:[#allocation5 + $0x9bc] ss:$88 sps:$4 sm:$0xff]  }
 0x129   : > { %4722 = vmatprep.subr.bf16.mxu0 %v9765_v11  ;;  %v9855_v11 = vld [vmem:[#allocation5 + $0x9c4] ss:$88 sps:$4 sm:$0xff]  }
 0x12b   : > { %4641 = vmatpush1.bf16.msra.mxu1 %v9760_v12  ;;  %v9850_v12 = vld [vmem:[#allocation5 + $0x9b8] ss:$88 sps:$4 sm:$0xff]  }
 0x12c   : > { %4723 = vmatpush1.bf16.msra.mxu0 %v9763_v13  ;;  %4733 = vmatprep.subr.bf16.mxu1 %v9768_v14  ;;  %v9853_v13 = vld [vmem:[#allocation5 + $0x9c0] ss:$88 sps:$4 sm:$0xff]   ;;  %v9858_v14 = vld [vmem:[#allocation5 + $0xa6c] ss:$88 sps:$4 sm:$0xff]  }
 0x12d   : > { %4815 = vmatprep.subr.bf16.mxu0 %v9771_v15  ;;  %v9861_v15 = vld [vmem:[#allocation5 + $0xa74] ss:$88 sps:$4 sm:$0xff]  }
 0x12e   : > { %4643 = vmatmul.mubr.bf16.vlgmr.msra.gmra.mrb[4].mxu1 %v11518_v7 }
 0x12f   : > { %4725 = vmatmul.mubr.bf16.vlgmr.msra.gmra.mrb[4].mxu0 %v11518_v7  ;;  %4734 = vmatpush1.bf16.msra.mxu1 %v9766_v16  ;;  %v9856_v16 = vld [vmem:[#allocation5 + $0xa68] ss:$88 sps:$4 sm:$0xff]  }
 0x130   : > { %4816 = vmatpush1.bf16.msra.mxu0 %v9769_v17  ;;  %4735 = vmatprep.subr.bf16.mxu1 %v9774_v18  ;;  %v9859_v17 = vld [vmem:[#allocation5 + $0xa70] ss:$88 sps:$4 sm:$0xff]   ;;  %v9864_v18 = vld [vmem:[#allocation5 + $0xb1c] ss:$88 sps:$4 sm:$0xff]  }
 0x131   : > { %4817 = vmatprep.subr.bf16.mxu0 %v9777_v19  ;;  %4765 = vmatprep.mubr.bf16.mxu1 %v11509_v47  ;;  %v9867_v19 = vld [vmem:[#allocation5 + $0xb24] ss:$88 sps:$4 sm:$0xff]  }
 0x132   : > { %4847 = vmatprep.mubr.bf16.mxu0 %v11509_v47 }
 0x133   : > { %4736 = vmatpush1.bf16.msra.mxu1 %v9772_v20  ;;  %v9862_v20 = vld [vmem:[#allocation5 + $0xb18] ss:$88 sps:$4 sm:$0xff]  }
 0x134   : > { %4818 = vmatpush1.bf16.msra.mxu0 %v9775_v21  ;;  %4737 = vmatprep.subr.bf16.mxu1 %v9780_v22  ;;  %v9865_v21 = vld [vmem:[#allocation5 + $0xb20] ss:$88 sps:$4 sm:$0xff]   ;;  %v9870_v22 = vld [vmem:[#allocation5 + $0xbcc] ss:$88 sps:$4 sm:$0xff]  }
 0x135   : > { %4819 = vmatprep.subr.bf16.mxu0 %v9783_v23  ;;  %v9873_v23 = vld [vmem:[#allocation5 + $0xbd4] ss:$88 sps:$4 sm:$0xff]  }
 0x137   : > { %4738 = vmatpush1.bf16.msra.mxu1 %v9778_v24  ;;  %v9868_v24 = vld [vmem:[#allocation5 + $0xbc8] ss:$88 sps:$4 sm:$0xff]  }
 0x138   : > { %4820 = vmatpush1.bf16.msra.mxu0 %v9781_v25  ;;  %4739 = vmatprep.subr.bf16.mxu1 %v9786_v26  ;;  %v9871_v25 = vld [vmem:[#allocation5 + $0xbd0] ss:$88 sps:$4 sm:$0xff]   ;;  %v9876_v26 = vld [vmem:[#allocation5 + $0xc7c] ss:$88 sps:$4 sm:$0xff]  }
 0x139   : > { %4821 = vmatprep.subr.bf16.mxu0 %v9789_v27  ;;  %v9879_v27 = vld [vmem:[#allocation5 + $0xc84] ss:$88 sps:$4 sm:$0xff]  }
 0x13b   : > { %4740 = vmatpush1.bf16.msra.mxu1 %v9784_v28  ;;  %v9874_v28 = vld [vmem:[#allocation5 + $0xc78] ss:$88 sps:$4 sm:$0xff]  }
 0x13c   : > { %4822 = vmatpush1.bf16.msra.mxu0 %v9787_v29  ;;  %4741 = vmatprep.subr.bf16.mxu1 %v9792_v30  ;;  %v9877_v29 = vld [vmem:[#allocation5 + $0xc80] ss:$88 sps:$4 sm:$0xff]   ;;  %v9882_v30 = vld [vmem:[#allocation5 + $0xd2c] ss:$88 sps:$4 sm:$0xff]  }
 0x13d   : > { %4823 = vmatprep.subr.bf16.mxu0 %v9795_v31  ;;  %v9885_v31 = vld [vmem:[#allocation5 + $0xd34] ss:$88 sps:$4 sm:$0xff]  }
 0x13f   : > { %4742 = vmatpush1.bf16.msra.mxu1 %v9790_v32  ;;  %v9880_v32 = vld [vmem:[#allocation5 + $0xd28] ss:$88 sps:$4 sm:$0xff]  }
 0x140   : > { %4824 = vmatpush1.bf16.msra.mxu0 %v9793_v33  ;;  %4743 = vmatprep.subr.bf16.mxu1 %v9798_v34  ;;  %v9883_v33 = vld [vmem:[#allocation5 + $0xd30] ss:$88 sps:$4 sm:$0xff]   ;;  %v9888_v34 = vld [vmem:[#allocation5 + $0xddc] ss:$88 sps:$4 sm:$0xff]  }
 0x141   : > { %4825 = vmatprep.subr.bf16.mxu0 %v9801_v35  ;;  %v9891_v35 = vld [vmem:[#allocation5 + $0xde4] ss:$88 sps:$4 sm:$0xff]  }
 0x143   : > { %4744 = vmatpush1.bf16.msra.mxu1 %v9796_v36  ;;  %v9886_v36 = vld [vmem:[#allocation5 + $0xdd8] ss:$88 sps:$4 sm:$0xff]  }
 0x144   : > { %4826 = vmatpush1.bf16.msra.mxu0 %v9799_v37  ;;  %4745 = vmatprep.subr.bf16.mxu1 %v9804_v38  ;;  %v9889_v37 = vld [vmem:[#allocation5 + $0xde0] ss:$88 sps:$4 sm:$0xff]   ;;  %v9894_v38 = vld [vmem:[#allocation5 + $0xe8c] ss:$88 sps:$4 sm:$0xff]  }
 0x145   : > { %4827 = vmatprep.subr.bf16.mxu0 %v9807_v39  ;;  %v9897_v39 = vld [vmem:[#allocation5 + $0xe94] ss:$88 sps:$4 sm:$0xff]  }
 0x147   : > { %4746 = vmatpush1.bf16.msra.mxu1 %v9802_v40  ;;  %v9892_v40 = vld [vmem:[#allocation5 + $0xe88] ss:$88 sps:$4 sm:$0xff]  }
 0x148   : > { %4828 = vmatpush1.bf16.msra.mxu0 %v9805_v41  ;;  %4747 = vmatprep.subr.bf16.mxu1 %v9810_v42  ;;  %v9895_v41 = vld [vmem:[#allocation5 + $0xe90] ss:$88 sps:$4 sm:$0xff]   ;;  %v9900_v42 = vld [vmem:[#allocation5 + $0xf3c] ss:$88 sps:$4 sm:$0xff]  }
 0x149   : > { %4829 = vmatprep.subr.bf16.mxu0 %v9813_v43  ;;  %v9903_v43 = vld [vmem:[#allocation5 + $0xf44] ss:$88 sps:$4 sm:$0xff]  }
 0x14b   : > { %4748 = vmatpush1.bf16.msra.mxu1 %v9808_v44 }
 0x14c   : > { %4830 = vmatpush1.bf16.msra.mxu0 %v9811_v45  ;;  %4749 = vmatprep.subr.bf16.mxu1 %v9816_v46 }
 0x14d   : > { %4831 = vmatprep.subr.bf16.mxu0 %v9819_v48 }
 0x14f   : > { %4750 = vmatpush1.bf16.msra.mxu1 %v9814_v49 }
 0x150   : > { %4832 = vmatpush1.bf16.msra.mxu0 %v9817_v50  ;;  %4751 = vmatprep.subr.bf16.mxu1 %v9822_v52  ;;  %v9898_v50 = vld [vmem:[#allocation5 + $0xf38] ss:$88 sps:$4 sm:$0xff]  }
 0x151   : > { %4833 = vmatprep.subr.bf16.mxu0 %v9825_v53 }
 0x153   : > { %4752 = vmatpush1.bf16.msra.mxu1 %v9820_v54 }
 0x154   : > { %4834 = vmatpush1.bf16.msra.mxu0 %v9823_v55  ;;  %4753 = vmatprep.subr.bf16.mxu1 %v9828_v56  ;;  %v9901_v55 = vld [vmem:[#allocation5 + $0xf40] ss:$88 sps:$4 sm:$0xff]   ;;  %v9906_v56 = vld [vmem:[#allocation5 + $0xfec] ss:$88 sps:$4 sm:$0xff]  }
 0x155   : > { %4835 = vmatprep.subr.bf16.mxu0 %v9831_v57 }
 0x157   : > { %4754 = vmatpush1.bf16.msra.mxu1 %v9826_v58 }
 0x158   : > { %4836 = vmatpush1.bf16.msra.mxu0 %v9829_v59  ;;  %4755 = vmatprep.subr.bf16.mxu1 %v9834_v60  ;;  %v9909_v59 = vld [vmem:[#allocation5 + $0xff4] ss:$88 sps:$4 sm:$0xff]   ;;  %v9904_v60 = vld [vmem:[#allocation5 + $0xfe8] ss:$88 sps:$4 sm:$0xff]  }
 0x159   : > { %4837 = vmatprep.subr.bf16.mxu0 %v9837_v61  ;;  %v9907_v61 = vld [vmem:[#allocation5 + $0xff0] ss:$88 sps:$4 sm:$0xff]  }
 0x15b   : > { %4756 = vmatpush1.bf16.msra.mxu1 %v9832_v62  ;;  %v9912_v62 = vld [vmem:[#allocation5 + $0x109c] ss:$88 sps:$4 sm:$0xff]  }
 0x15c   : > { %4838 = vmatpush1.bf16.msra.mxu0 %v9835_v63  ;;  %4757 = vmatprep.subr.bf16.mxu1 %v9840_v0  ;;  %v9915_v63 = vld [vmem:[#allocation5 + $0x10a4] ss:$88 sps:$4 sm:$0xff]   ;;  %v9910_v0 = vld [vmem:[#allocation5 + $0x1098] ss:$88 sps:$4 sm:$0xff]  }
 0x15d   : > { %4839 = vmatprep.subr.bf16.mxu0 %v9843_v1  ;;  %v9913_v1 = vld [vmem:[#allocation5 + $0x10a0] ss:$88 sps:$4 sm:$0xff]  }
 0x15f   : > { %4758 = vmatpush1.bf16.msra.mxu1 %v9838_v2  ;;  %v9918_v2 = vld [vmem:[#allocation5 + $0x114c] ss:$88 sps:$4 sm:$0xff]  }
 0x160   : > { %4840 = vmatpush1.bf16.msra.mxu0 %v9841_v3  ;;  %4759 = vmatprep.subr.bf16.mxu1 %v9846_v4  ;;  %v9921_v3 = vld [vmem:[#allocation5 + $0x1154] ss:$88 sps:$4 sm:$0xff]   ;;  %v9916_v4 = vld [vmem:[#allocation5 + $0x1148] ss:$88 sps:$4 sm:$0xff]  }
 0x161   : > { %4841 = vmatprep.subr.bf16.mxu0 %v9849_v5  ;;  %v9919_v5 = vld [vmem:[#allocation5 + $0x1150] ss:$88 sps:$4 sm:$0xff]  }
 0x163   : > { %4760 = vmatpush1.bf16.msra.mxu1 %v9844_v8  ;;  %v9924_v8 = vld [vmem:[#allocation5 + $0x11fc] ss:$88 sps:$4 sm:$0xff]  }
 0x164   : > { %4842 = vmatpush1.bf16.msra.mxu0 %v9847_v9  ;;  %4761 = vmatprep.subr.bf16.mxu1 %v9852_v10  ;;  %v9927_v9 = vld [vmem:[#allocation5 + $0x1204] ss:$88 sps:$4 sm:$0xff]   ;;  %v9922_v10 = vld [vmem:[#allocation5 + $0x11f8] ss:$88 sps:$4 sm:$0xff]  }
 0x165   : > { %4843 = vmatprep.subr.bf16.mxu0 %v9855_v11  ;;  %v9925_v11 = vld [vmem:[#allocation5 + $0x1200] ss:$88 sps:$4 sm:$0xff]  }
 0x167   : > { %4762 = vmatpush1.bf16.msra.mxu1 %v9850_v12  ;;  %v9930_v12 = vld [vmem:[#allocation5 + $0x12ac] ss:$88 sps:$4 sm:$0xff]  }
 0x168   : > { %4844 = vmatpush1.bf16.msra.mxu0 %v9853_v13  ;;  %4763 = vmatprep.subr.bf16.mxu1 %v9858_v14  ;;  %v9933_v13 = vld [vmem:[#allocation5 + $0x12b4] ss:$88 sps:$4 sm:$0xff]   ;;  %v9928_v14 = vld [vmem:[#allocation5 + $0x12a8] ss:$88 sps:$4 sm:$0xff]  }
 0x169   : > { %4845 = vmatprep.subr.bf16.mxu0 %v9861_v15  ;;  %v9931_v15 = vld [vmem:[#allocation5 + $0x12b0] ss:$88 sps:$4 sm:$0xff]  }
 0x16b   : > { %4764 = vmatpush1.bf16.msra.mxu1 %v9856_v16  ;;  %v9936_v16 = vld [vmem:[#allocation5 + $0x135c] ss:$88 sps:$4 sm:$0xff]  }
 0x16c   : > { %4846 = vmatpush1.bf16.msra.mxu0 %v9859_v17  ;;  %4774 = vmatprep.subr.bf16.mxu1 %v9864_v18  ;;  %v9939_v17 = vld [vmem:[#allocation5 + $0x1364] ss:$88 sps:$4 sm:$0xff]   ;;  %v9934_v18 = vld [vmem:[#allocation5 + $0x1358] ss:$88 sps:$4 sm:$0xff]  }
 0x16d   : > { %4856 = vmatprep.subr.bf16.mxu0 %v9867_v19  ;;  %v9937_v19 = vld [vmem:[#allocation5 + $0x1360] ss:$88 sps:$4 sm:$0xff]  }
 0x16e   : > { %4766 = vmatmul.mubr.bf16.vlgmr.msra.gmra.mrb[8].mxu1 %v11516_v6 }
 0x16f   : > { %4848 = vmatmul.mubr.bf16.vlgmr.msra.gmra.mrb[8].mxu0 %v11516_v6  ;;  %4775 = vmatpush1.bf16.msra.mxu1 %v9862_v20  ;;  %v9942_v20 = vld [vmem:[#allocation5 + $0x140c] ss:$88 sps:$4 sm:$0xff]  }
 0x170   : > { %4857 = vmatpush1.bf16.msra.mxu0 %v9865_v21  ;;  %4776 = vmatprep.subr.bf16.mxu1 %v9870_v22  ;;  %v9945_v21 = vld [vmem:[#allocation5 + $0x1414] ss:$88 sps:$4 sm:$0xff]   ;;  %v9940_v22 = vld [vmem:[#allocation5 + $0x1408] ss:$88 sps:$4 sm:$0xff]  }
 0x171   : > { %4858 = vmatprep.subr.bf16.mxu0 %v9873_v23  ;;  %4806 = vmatprep.mubr.bf16.mxu1 %v11512_v51  ;;  %v9943_v23 = vld [vmem:[#allocation5 + $0x1410] ss:$88 sps:$4 sm:$0xff]  }
 0x172   : > { %4888 = vmatprep.mubr.bf16.mxu0 %v11512_v51 }
 0x173   : > { %4777 = vmatpush1.bf16.msra.mxu1 %v9868_v24  ;;  %v9948_v24 = vld [vmem:[#allocation5 + $0x14bc] ss:$88 sps:$4 sm:$0xff]  }
 0x174   : > { %4859 = vmatpush1.bf16.msra.mxu0 %v9871_v25  ;;  %4778 = vmatprep.subr.bf16.mxu1 %v9876_v26  ;;  %v9951_v25 = vld [vmem:[#allocation5 + $0x14c4] ss:$88 sps:$4 sm:$0xff]   ;;  %v9946_v26 = vld [vmem:[#allocation5 + $0x14b8] ss:$88 sps:$4 sm:$0xff]  }
 0x175   : > { %4860 = vmatprep.subr.bf16.mxu0 %v9879_v27  ;;  %v9949_v27 = vld [vmem:[#allocation5 + $0x14c0] ss:$88 sps:$4 sm:$0xff]  }
 0x177   : > { %4779 = vmatpush1.bf16.msra.mxu1 %v9874_v28  ;;  %v9954_v28 = vld [vmem:[#allocation5 + $0x156c] ss:$88 sps:$4 sm:$0xff]  }
 0x178   : > { %4861 = vmatpush1.bf16.msra.mxu0 %v9877_v29  ;;  %4780 = vmatprep.subr.bf16.mxu1 %v9882_v30  ;;  %v9957_v29 = vld [vmem:[#allocation5 + $0x1574] ss:$88 sps:$4 sm:$0xff]   ;;  %v9952_v30 = vld [vmem:[#allocation5 + $0x1568] ss:$88 sps:$4 sm:$0xff]  }
 0x179   : > { %4862 = vmatprep.subr.bf16.mxu0 %v9885_v31  ;;  %v9955_v31 = vld [vmem:[#allocation5 + $0x1570] ss:$88 sps:$4 sm:$0xff]  }
 0x17b   : > { %4781 = vmatpush1.bf16.msra.mxu1 %v9880_v32  ;;  %v9960_v32 = vld [vmem:[#allocation5 + $0x2c] ss:$88 sps:$4 sm:$0xff]  }
 0x17c   : > { %4863 = vmatpush1.bf16.msra.mxu0 %v9883_v33  ;;  %4782 = vmatprep.subr.bf16.mxu1 %v9888_v34  ;;  %v9963_v33 = vld [vmem:[#allocation5 + $0x34] ss:$88 sps:$4 sm:$0xff]   ;;  %v9958_v34 = vld [vmem:[#allocation5 + $0x28] ss:$88 sps:$4 sm:$0xff]  }
 0x17d   : > { %4864 = vmatprep.subr.bf16.mxu0 %v9891_v35  ;;  %v9961_v35 = vld [vmem:[#allocation5 + $0x30] ss:$88 sps:$4 sm:$0xff]  }
 0x17f   : > { %4783 = vmatpush1.bf16.msra.mxu1 %v9886_v36  ;;  %v9966_v36 = vld [vmem:[#allocation5 + $0xdc] ss:$88 sps:$4 sm:$0xff]  }
 0x180   : > { %4865 = vmatpush1.bf16.msra.mxu0 %v9889_v37  ;;  %4784 = vmatprep.subr.bf16.mxu1 %v9894_v38  ;;  %v9969_v37 = vld [vmem:[#allocation5 + $0xe4] ss:$88 sps:$4 sm:$0xff]   ;;  %v9964_v38 = vld [vmem:[#allocation5 + $0xd8] ss:$88 sps:$4 sm:$0xff]  }
 0x181   : > { %4866 = vmatprep.subr.bf16.mxu0 %v9897_v39  ;;  %v4521_v44 = vpop.f32.mrb[0].mxu1  ;;  %v9967_v39 = vld [vmem:[#allocation5 + $0xe0] ss:$88 sps:$4 sm:$0xff]  }
 0x182   : > { %v4562_v45 = vpop.f32.mrb[0].mxu0  ;;  %v4523_v48 = vpop.f32.mrb[1].mxu1 }
 0x183   : > { %v11536_v46 = vadd.f32 %v4562_v45, %v4521_v44  ;;  %v4564_v49 = vpop.f32.mrb[1].mxu0  ;;  %v4525_v53 = vpop.f32.mrb[2].mxu1  ;;  %4785 = vmatpush1.bf16.msra.mxu1 %v9892_v40  ;;  %v9972_v40 = vld [vmem:[#allocation5 + $0x18c] ss:$88 sps:$4 sm:$0xff]   ;;  %v9978_v44 = vld [vmem:[#allocation5 + $0x23c] ss:$88 sps:$4 sm:$0xff]  }
 0x184   : > { %v11538_v52 = vadd.f32 %v4564_v49, %v4523_v48  ;;  %v4566_v54 = vpop.f32.mrb[2].mxu0  ;;  %4867 = vmatpush1.bf16.msra.mxu0 %v9895_v41  ;;  %v4526_v57 = vpop.f32.mrb[3].mxu1  ;;  %4786 = vmatprep.subr.bf16.mxu1 %v9900_v42  ;;  %v9975_v41 = vld [vmem:[#allocation5 + $0x194] ss:$88 sps:$4 sm:$0xff]   ;;  %v9970_v42 = vld [vmem:[#allocation5 + $0x188] ss:$88 sps:$4 sm:$0xff]  }
 0x185   : > { %v4567_v58 = vpop.f32.mrb[3].mxu0  ;;  %4868 = vmatprep.subr.bf16.mxu0 %v9903_v43  ;;  %v9973_v43 = vld [vmem:[#allocation5 + $0x190] ss:$88 sps:$4 sm:$0xff]   ;;  %v9981_v45 = vld [vmem:[#allocation5 + $0x244] ss:$88 sps:$4 sm:$0xff]  }
 0x186   : > { %v9976_v48 = vld [vmem:[#allocation5 + $0x238] ss:$88 sps:$4 sm:$0xff]   ;;  %v9987_v53 = vld [vmem:[#allocation5 + $0x2f4] ss:$88 sps:$4 sm:$0xff]   ;;  %v9982_v54 = vld [vmem:[#allocation5 + $0x2e8] ss:$88 sps:$4 sm:$0xff]  }
 0x187   : > { %4787 = vmatpush1.bf16.msra.mxu1 %v9898_v50  ;;  %v9979_v49 = vld [vmem:[#allocation5 + $0x240] ss:$88 sps:$4 sm:$0xff]   ;;  %v9984_v50 = vld [vmem:[#allocation5 + $0x2ec] ss:$88 sps:$4 sm:$0xff]  }
 0x188   : > { %4869 = vmatpush1.bf16.msra.mxu0 %v9901_v55  ;;  %4788 = vmatprep.subr.bf16.mxu1 %v9906_v56  ;;  %v9985_v55 = vld [vmem:[#allocation5 + $0x2f0] ss:$88 sps:$4 sm:$0xff]   ;;  %v9990_v56 = vld [vmem:[#allocation5 + $0x39c] ss:$88 sps:$4 sm:$0xff]  }
 0x189   : > { %4870 = vmatprep.subr.bf16.mxu0 %v9909_v59  ;;  %v9993_v57 = vld [vmem:[#allocation5 + $0x3a4] ss:$88 sps:$4 sm:$0xff]   ;;  %v9988_v58 = vld [vmem:[#allocation5 + $0x398] ss:$88 sps:$4 sm:$0xff]  }
 0x18a   : > { %v9991_v59 = vld [vmem:[#allocation5 + $0x3a0] ss:$88 sps:$4 sm:$0xff]  }
 0x18b   : > { %4789 = vmatpush1.bf16.msra.mxu1 %v9904_v60  ;;  %v9996_v60 = vld [vmem:[#allocation5 + $0x44c] ss:$88 sps:$4 sm:$0xff]  }
 0x18c   : > { %4871 = vmatpush1.bf16.msra.mxu0 %v9907_v61  ;;  %4790 = vmatprep.subr.bf16.mxu1 %v9912_v62  ;;  %v9999_v61 = vld [vmem:[#allocation5 + $0x454] ss:$88 sps:$4 sm:$0xff]   ;;  %v9994_v62 = vld [vmem:[#allocation5 + $0x448] ss:$88 sps:$4 sm:$0xff]  }
 0x18d   : > { %4872 = vmatprep.subr.bf16.mxu0 %v9915_v63  ;;  %v9997_v63 = vld [vmem:[#allocation5 + $0x450] ss:$88 sps:$4 sm:$0xff]  }
 0x18f   : > { %4791 = vmatpush1.bf16.msra.mxu1 %v9910_v0  ;;  %v10002_v0 = vld [vmem:[#allocation5 + $0x4fc] ss:$88 sps:$4 sm:$0xff]  }
 0x190   : > { %4873 = vmatpush1.bf16.msra.mxu0 %v9913_v1  ;;  %4792 = vmatprep.subr.bf16.mxu1 %v9918_v2  ;;  %v10005_v1 = vld [vmem:[#allocation5 + $0x504] ss:$88 sps:$4 sm:$0xff]   ;;  %v10000_v2 = vld [vmem:[#allocation5 + $0x4f8] ss:$88 sps:$4 sm:$0xff]  }
 0x191   : > { %4874 = vmatprep.subr.bf16.mxu0 %v9921_v3  ;;  %v10003_v3 = vld [vmem:[#allocation5 + $0x500] ss:$88 sps:$4 sm:$0xff]  }
 0x193   : > { %4793 = vmatpush1.bf16.msra.mxu1 %v9916_v4  ;;  %v10008_v4 = vld [vmem:[#allocation5 + $0x5ac] ss:$88 sps:$4 sm:$0xff]  }
 0x194   : > { %4875 = vmatpush1.bf16.msra.mxu0 %v9919_v5  ;;  %4794 = vmatprep.subr.bf16.mxu1 %v9924_v8  ;;  %v10011_v5 = vld [vmem:[#allocation5 + $0x5b4] ss:$88 sps:$4 sm:$0xff]   ;;  %v10006_v8 = vld [vmem:[#allocation5 + $0x5a8] ss:$88 sps:$4 sm:$0xff]  }
 0x195   : > { %4876 = vmatprep.subr.bf16.mxu0 %v9927_v9  ;;  %v10009_v9 = vld [vmem:[#allocation5 + $0x5b0] ss:$88 sps:$4 sm:$0xff]  }
 0x197   : > { %4795 = vmatpush1.bf16.msra.mxu1 %v9922_v10  ;;  %v10014_v10 = vld [vmem:[#allocation5 + $0x65c] ss:$88 sps:$4 sm:$0xff]  }
 0x198   : > { %4877 = vmatpush1.bf16.msra.mxu0 %v9925_v11  ;;  %4796 = vmatprep.subr.bf16.mxu1 %v9930_v12  ;;  %v10017_v11 = vld [vmem:[#allocation5 + $0x664] ss:$88 sps:$4 sm:$0xff]   ;;  %v10012_v12 = vld [vmem:[#allocation5 + $0x658] ss:$88 sps:$4 sm:$0xff]  }
 0x199   : > { %4878 = vmatprep.subr.bf16.mxu0 %v9933_v13  ;;  %v10015_v13 = vld [vmem:[#allocation5 + $0x660] ss:$88 sps:$4 sm:$0xff]  }
 0x19b   : > { %4797 = vmatpush1.bf16.msra.mxu1 %v9928_v14  ;;  %v10020_v14 = vld [vmem:[#allocation5 + $0x70c] ss:$88 sps:$4 sm:$0xff]  }
 0x19c   : > { %4879 = vmatpush1.bf16.msra.mxu0 %v9931_v15  ;;  %4798 = vmatprep.subr.bf16.mxu1 %v9936_v16  ;;  %v10023_v15 = vld [vmem:[#allocation5 + $0x714] ss:$88 sps:$4 sm:$0xff]   ;;  %v10018_v16 = vld [vmem:[#allocation5 + $0x708] ss:$88 sps:$4 sm:$0xff]  }
 0x19d   : > { %4880 = vmatprep.subr.bf16.mxu0 %v9939_v17  ;;  %v10021_v17 = vld [vmem:[#allocation5 + $0x710] ss:$88 sps:$4 sm:$0xff]  }
 0x19f   : > { %4799 = vmatpush1.bf16.msra.mxu1 %v9934_v18  ;;  %v10026_v18 = vld [vmem:[#allocation5 + $0x7bc] ss:$88 sps:$4 sm:$0xff]  }
 0x1a0   : > { %4881 = vmatpush1.bf16.msra.mxu0 %v9937_v19  ;;  %4800 = vmatprep.subr.bf16.mxu1 %v9942_v20  ;;  %v10029_v19 = vld [vmem:[#allocation5 + $0x7c4] ss:$88 sps:$4 sm:$0xff]   ;;  %v10024_v20 = vld [vmem:[#allocation5 + $0x7b8] ss:$88 sps:$4 sm:$0xff]  }
 0x1a1   : > { %4882 = vmatprep.subr.bf16.mxu0 %v9945_v21  ;;  %v10027_v21 = vld [vmem:[#allocation5 + $0x7c0] ss:$88 sps:$4 sm:$0xff]  }
 0x1a3   : > { %4801 = vmatpush1.bf16.msra.mxu1 %v9940_v22  ;;  %v10032_v22 = vld [vmem:[#allocation5 + $0x86c] ss:$88 sps:$4 sm:$0xff]  }
 0x1a4   : > { %4883 = vmatpush1.bf16.msra.mxu0 %v9943_v23  ;;  %4802 = vmatprep.subr.bf16.mxu1 %v9948_v24  ;;  %v10035_v23 = vld [vmem:[#allocation5 + $0x874] ss:$88 sps:$4 sm:$0xff]   ;;  %v10030_v24 = vld [vmem:[#allocation5 + $0x868] ss:$88 sps:$4 sm:$0xff]  }
 0x1a5   : > { %4884 = vmatprep.subr.bf16.mxu0 %v9951_v25  ;;  %v10033_v25 = vld [vmem:[#allocation5 + $0x870] ss:$88 sps:$4 sm:$0xff]  }
 0x1a7   : > { %4803 = vmatpush1.bf16.msra.mxu1 %v9946_v26  ;;  %v10038_v26 = vld [vmem:[#allocation5 + $0x91c] ss:$88 sps:$4 sm:$0xff]  }
 0x1a8   : > { %4885 = vmatpush1.bf16.msra.mxu0 %v9949_v27  ;;  %4804 = vmatprep.subr.bf16.mxu1 %v9954_v28  ;;  %v10041_v27 = vld [vmem:[#allocation5 + $0x924] ss:$88 sps:$4 sm:$0xff]   ;;  %v10036_v28 = vld [vmem:[#allocation5 + $0x918] ss:$88 sps:$4 sm:$0xff]  }
 0x1a9   : > { %4886 = vmatprep.subr.bf16.mxu0 %v9957_v29  ;;  %v10039_v29 = vld [vmem:[#allocation5 + $0x920] ss:$88 sps:$4 sm:$0xff]  }
 0x1ab   : > { %4805 = vmatpush1.bf16.msra.mxu1 %v9952_v30  ;;  %v10044_v30 = vld [vmem:[#allocation5 + $0x9cc] ss:$88 sps:$4 sm:$0xff]  }
 0x1ac   : > { %4887 = vmatpush1.bf16.msra.mxu0 %v9955_v31  ;;  %4897 = vmatprep.subr.bf16.mxu1 %v9960_v32  ;;  %v10047_v31 = vld [vmem:[#allocation5 + $0x9d4] ss:$88 sps:$4 sm:$0xff]   ;;  %v10042_v32 = vld [vmem:[#allocation5 + $0x9c8] ss:$88 sps:$4 sm:$0xff]  }
 0x1ad   : > { %4979 = vmatprep.subr.bf16.mxu0 %v9963_v33  ;;  %v10045_v33 = vld [vmem:[#allocation5 + $0x9d0] ss:$88 sps:$4 sm:$0xff]  }
 0x1ae   : > { %4807 = vmatmul.mubr.bf16.vlgmr.msra.gmra.mrb[8].mxu1 %v11518_v7 }
 0x1af   : > { %4889 = vmatmul.mubr.bf16.vlgmr.msra.gmra.mrb[8].mxu0 %v11518_v7  ;;  %4898 = vmatpush1.bf16.msra.mxu1 %v9958_v34  ;;  %v10050_v34 = vld [vmem:[#allocation5 + $0xa7c] ss:$88 sps:$4 sm:$0xff]  }
 0x1b0   : > { %4980 = vmatpush1.bf16.msra.mxu0 %v9961_v35  ;;  %4899 = vmatprep.subr.bf16.mxu1 %v9966_v36  ;;  %v10053_v35 = vld [vmem:[#allocation5 + $0xa84] ss:$88 sps:$4 sm:$0xff]   ;;  %v10048_v36 = vld [vmem:[#allocation5 + $0xa78] ss:$88 sps:$4 sm:$0xff]  }
 0x1b1   : > { %4981 = vmatprep.subr.bf16.mxu0 %v9969_v37  ;;  %4929 = vmatprep.mubr.bf16.mxu1 %v11509_v47  ;;  %v10051_v37 = vld [vmem:[#allocation5 + $0xa80] ss:$88 sps:$4 sm:$0xff]  }
 0x1b2   : > { %5011 = vmatprep.mubr.bf16.mxu0 %v11509_v47 }
 0x1b3   : > { %4900 = vmatpush1.bf16.msra.mxu1 %v9964_v38  ;;  %v10056_v38 = vld [vmem:[#allocation5 + $0xb2c] ss:$88 sps:$4 sm:$0xff]  }
 0x1b4   : > { %4982 = vmatpush1.bf16.msra.mxu0 %v9967_v39  ;;  %4901 = vmatprep.subr.bf16.mxu1 %v9972_v40  ;;  %v10059_v39 = vld [vmem:[#allocation5 + $0xb34] ss:$88 sps:$4 sm:$0xff]   ;;  %v10054_v40 = vld [vmem:[#allocation5 + $0xb28] ss:$88 sps:$4 sm:$0xff]  }
 0x1b5   : > { %4983 = vmatprep.subr.bf16.mxu0 %v9975_v41  ;;  %v10057_v41 = vld [vmem:[#allocation5 + $0xb30] ss:$88 sps:$4 sm:$0xff]  }
 0x1b7   : > { %4902 = vmatpush1.bf16.msra.mxu1 %v9970_v42  ;;  %v10062_v42 = vld [vmem:[#allocation5 + $0xbdc] ss:$88 sps:$4 sm:$0xff]  }
 0x1b8   : > { %4984 = vmatpush1.bf16.msra.mxu0 %v9973_v43  ;;  %4903 = vmatprep.subr.bf16.mxu1 %v9978_v44  ;;  %v10065_v43 = vld [vmem:[#allocation5 + $0xbe4] ss:$88 sps:$4 sm:$0xff]   ;;  %v10060_v44 = vld [vmem:[#allocation5 + $0xbd8] ss:$88 sps:$4 sm:$0xff]  }
 0x1b9   : > { %4985 = vmatprep.subr.bf16.mxu0 %v9981_v45  ;;  %v10063_v45 = vld [vmem:[#allocation5 + $0xbe0] ss:$88 sps:$4 sm:$0xff]  }
 0x1bb   : > { %4904 = vmatpush1.bf16.msra.mxu1 %v9976_v48  ;;  %v10068_v48 = vld [vmem:[#allocation5 + $0xc8c] ss:$88 sps:$4 sm:$0xff]  }
 0x1bc   : > { %4986 = vmatpush1.bf16.msra.mxu0 %v9979_v49  ;;  %4905 = vmatprep.subr.bf16.mxu1 %v9984_v50  ;;  %v10071_v49 = vld [vmem:[#allocation5 + $0xc94] ss:$88 sps:$4 sm:$0xff]   ;;  %v10066_v50 = vld [vmem:[#allocation5 + $0xc88] ss:$88 sps:$4 sm:$0xff]  }
 0x1bd   : > { %4987 = vmatprep.subr.bf16.mxu0 %v9987_v53  ;;  %v10069_v53 = vld [vmem:[#allocation5 + $0xc90] ss:$88 sps:$4 sm:$0xff]  }
 0x1bf   : > { %4906 = vmatpush1.bf16.msra.mxu1 %v9982_v54  ;;  %v10074_v54 = vld [vmem:[#allocation5 + $0xd3c] ss:$88 sps:$4 sm:$0xff]  }
 0x1c0   : > { %4988 = vmatpush1.bf16.msra.mxu0 %v9985_v55  ;;  %4907 = vmatprep.subr.bf16.mxu1 %v9990_v56  ;;  %v10077_v55 = vld [vmem:[#allocation5 + $0xd44] ss:$88 sps:$4 sm:$0xff]   ;;  %v10072_v56 = vld [vmem:[#allocation5 + $0xd38] ss:$88 sps:$4 sm:$0xff]  }
 0x1c1   : > { %4989 = vmatprep.subr.bf16.mxu0 %v9993_v57  ;;  %v10075_v57 = vld [vmem:[#allocation5 + $0xd40] ss:$88 sps:$4 sm:$0xff]  }
 0x1c3   : > { %4908 = vmatpush1.bf16.msra.mxu1 %v9988_v58  ;;  %v10080_v58 = vld [vmem:[#allocation5 + $0xdec] ss:$88 sps:$4 sm:$0xff]  }
 0x1c4   : > { %4990 = vmatpush1.bf16.msra.mxu0 %v9991_v59  ;;  %4909 = vmatprep.subr.bf16.mxu1 %v9996_v60  ;;  %v10083_v59 = vld [vmem:[#allocation5 + $0xdf4] ss:$88 sps:$4 sm:$0xff]   ;;  %v10078_v60 = vld [vmem:[#allocation5 + $0xde8] ss:$88 sps:$4 sm:$0xff]  }
 0x1c5   : > { %4991 = vmatprep.subr.bf16.mxu0 %v9999_v61  ;;  %v10081_v61 = vld [vmem:[#allocation5 + $0xdf0] ss:$88 sps:$4 sm:$0xff]  }
 0x1c7   : > { %4910 = vmatpush1.bf16.msra.mxu1 %v9994_v62  ;;  %v10086_v62 = vld [vmem:[#allocation5 + $0xe9c] ss:$88 sps:$4 sm:$0xff]  }
 0x1c8   : > { %4992 = vmatpush1.bf16.msra.mxu0 %v9997_v63  ;;  %4911 = vmatprep.subr.bf16.mxu1 %v10002_v0  ;;  %v10089_v63 = vld [vmem:[#allocation5 + $0xea4] ss:$88 sps:$4 sm:$0xff]   ;;  %v10084_v0 = vld [vmem:[#allocation5 + $0xe98] ss:$88 sps:$4 sm:$0xff]  }
 0x1c9   : > { %4993 = vmatprep.subr.bf16.mxu0 %v10005_v1  ;;  %v10087_v1 = vld [vmem:[#allocation5 + $0xea0] ss:$88 sps:$4 sm:$0xff]  }
 0x1cb   : > { %4912 = vmatpush1.bf16.msra.mxu1 %v10000_v2  ;;  %v10092_v2 = vld [vmem:[#allocation5 + $0xf4c] ss:$88 sps:$4 sm:$0xff]  }
 0x1cc   : > { %4994 = vmatpush1.bf16.msra.mxu0 %v10003_v3  ;;  %4913 = vmatprep.subr.bf16.mxu1 %v10008_v4  ;;  %v10095_v3 = vld [vmem:[#allocation5 + $0xf54] ss:$88 sps:$4 sm:$0xff]  }
 0x1cd   : > { %4995 = vmatprep.subr.bf16.mxu0 %v10011_v5 }
 0x1cf   : > { %4914 = vmatpush1.bf16.msra.mxu1 %v10006_v8 }
 0x1d0   : > { %4996 = vmatpush1.bf16.msra.mxu0 %v10009_v9  ;;  %4915 = vmatprep.subr.bf16.mxu1 %v10014_v10 }
 0x1d1   : > { %4997 = vmatprep.subr.bf16.mxu0 %v10017_v11 }
 0x1d3   : > { %4916 = vmatpush1.bf16.msra.mxu1 %v10012_v12  ;;  %v10090_v12 = vld [vmem:[#allocation5 + $0xf48] ss:$88 sps:$4 sm:$0xff]  }
 0x1d4   : > { %4998 = vmatpush1.bf16.msra.mxu0 %v10015_v13  ;;  %4917 = vmatprep.subr.bf16.mxu1 %v10020_v14  ;;  %v10093_v13 = vld [vmem:[#allocation5 + $0xf50] ss:$88 sps:$4 sm:$0xff]  }
 0x1d5   : > { %4999 = vmatprep.subr.bf16.mxu0 %v10023_v15 }
 0x1d7   : > { %4918 = vmatpush1.bf16.msra.mxu1 %v10018_v16  ;;  %v10098_v16 = vld [vmem:[#allocation5 + $0xffc] ss:$88 sps:$4 sm:$0xff]  }
 0x1d8   : > { %5000 = vmatpush1.bf16.msra.mxu0 %v10021_v17  ;;  %4919 = vmatprep.subr.bf16.mxu1 %v10026_v18  ;;  %v10101_v17 = vld [vmem:[#allocation5 + $0x1004] ss:$88 sps:$4 sm:$0xff]   ;;  %v10096_v18 = vld [vmem:[#allocation5 + $0xff8] ss:$88 sps:$4 sm:$0xff]  }
 0x1d9   : > { %5001 = vmatprep.subr.bf16.mxu0 %v10029_v19  ;;  %v10099_v19 = vld [vmem:[#allocation5 + $0x1000] ss:$88 sps:$4 sm:$0xff]  }
 0x1db   : > { %4920 = vmatpush1.bf16.msra.mxu1 %v10024_v20  ;;  %v10104_v20 = vld [vmem:[#allocation5 + $0x10ac] ss:$88 sps:$4 sm:$0xff]  }
 0x1dc   : > { %5002 = vmatpush1.bf16.msra.mxu0 %v10027_v21  ;;  %4921 = vmatprep.subr.bf16.mxu1 %v10032_v22  ;;  %v10107_v21 = vld [vmem:[#allocation5 + $0x10b4] ss:$88 sps:$4 sm:$0xff]   ;;  %v10102_v22 = vld [vmem:[#allocation5 + $0x10a8] ss:$88 sps:$4 sm:$0xff]  }
 0x1dd   : > { %5003 = vmatprep.subr.bf16.mxu0 %v10035_v23  ;;  %v10105_v23 = vld [vmem:[#allocation5 + $0x10b0] ss:$88 sps:$4 sm:$0xff]  }
 0x1df   : > { %4922 = vmatpush1.bf16.msra.mxu1 %v10030_v24  ;;  %v10110_v24 = vld [vmem:[#allocation5 + $0x115c] ss:$88 sps:$4 sm:$0xff]  }
 0x1e0   : > { %5004 = vmatpush1.bf16.msra.mxu0 %v10033_v25  ;;  %4923 = vmatprep.subr.bf16.mxu1 %v10038_v26  ;;  %v10113_v25 = vld [vmem:[#allocation5 + $0x1164] ss:$88 sps:$4 sm:$0xff]   ;;  %v10108_v26 = vld [vmem:[#allocation5 + $0x1158] ss:$88 sps:$4 sm:$0xff]  }
 0x1e1   : > { %5005 = vmatprep.subr.bf16.mxu0 %v10041_v27  ;;  %v10111_v27 = vld [vmem:[#allocation5 + $0x1160] ss:$88 sps:$4 sm:$0xff]  }
 0x1e3   : > { %4924 = vmatpush1.bf16.msra.mxu1 %v10036_v28  ;;  %v10116_v28 = vld [vmem:[#allocation5 + $0x120c] ss:$88 sps:$4 sm:$0xff]  }
 0x1e4   : > { %5006 = vmatpush1.bf16.msra.mxu0 %v10039_v29  ;;  %4925 = vmatprep.subr.bf16.mxu1 %v10044_v30  ;;  %v10119_v29 = vld [vmem:[#allocation5 + $0x1214] ss:$88 sps:$4 sm:$0xff]   ;;  %v10114_v30 = vld [vmem:[#allocation5 + $0x1208] ss:$88 sps:$4 sm:$0xff]  }
 0x1e5   : > { %5007 = vmatprep.subr.bf16.mxu0 %v10047_v31  ;;  %v10117_v31 = vld [vmem:[#allocation5 + $0x1210] ss:$88 sps:$4 sm:$0xff]  }
 0x1e7   : > { %4926 = vmatpush1.bf16.msra.mxu1 %v10042_v32  ;;  %v10122_v32 = vld [vmem:[#allocation5 + $0x12bc] ss:$88 sps:$4 sm:$0xff]  }
 0x1e8   : > { %5008 = vmatpush1.bf16.msra.mxu0 %v10045_v33  ;;  %4927 = vmatprep.subr.bf16.mxu1 %v10050_v34  ;;  %v10125_v33 = vld [vmem:[#allocation5 + $0x12c4] ss:$88 sps:$4 sm:$0xff]   ;;  %v10120_v34 = vld [vmem:[#allocation5 + $0x12b8] ss:$88 sps:$4 sm:$0xff]  }
 0x1e9   : > { %5009 = vmatprep.subr.bf16.mxu0 %v10053_v35  ;;  %v10123_v35 = vld [vmem:[#allocation5 + $0x12c0] ss:$88 sps:$4 sm:$0xff]  }
 0x1eb   : > { %4928 = vmatpush1.bf16.msra.mxu1 %v10048_v36  ;;  %v10128_v36 = vld [vmem:[#allocation5 + $0x136c] ss:$88 sps:$4 sm:$0xff]  }
 0x1ec   : > { %5010 = vmatpush1.bf16.msra.mxu0 %v10051_v37  ;;  %4938 = vmatprep.subr.bf16.mxu1 %v10056_v38  ;;  %v10131_v37 = vld [vmem:[#allocation5 + $0x1374] ss:$88 sps:$4 sm:$0xff]   ;;  %v10126_v38 = vld [vmem:[#allocation5 + $0x1368] ss:$88 sps:$4 sm:$0xff]  }
 0x1ed   : > { %5020 = vmatprep.subr.bf16.mxu0 %v10059_v39  ;;  %v10129_v39 = vld [vmem:[#allocation5 + $0x1370] ss:$88 sps:$4 sm:$0xff]  }
 0x1ee   : > { %4930 = vmatmul.mubr.bf16.vlgmr.msra.gmra.mrb[12].mxu1 %v11516_v6 }
 0x1ef   : > { %5012 = vmatmul.mubr.bf16.vlgmr.msra.gmra.mrb[12].mxu0 %v11516_v6  ;;  %4939 = vmatpush1.bf16.msra.mxu1 %v10054_v40  ;;  %v10134_v40 = vld [vmem:[#allocation5 + $0x141c] ss:$88 sps:$4 sm:$0xff]  }
 0x1f0   : > { %5021 = vmatpush1.bf16.msra.mxu0 %v10057_v41  ;;  %4940 = vmatprep.subr.bf16.mxu1 %v10062_v42  ;;  %v10137_v41 = vld [vmem:[#allocation5 + $0x1424] ss:$88 sps:$4 sm:$0xff]   ;;  %v10132_v42 = vld [vmem:[#allocation5 + $0x1418] ss:$88 sps:$4 sm:$0xff]  }
 0x1f1   : > { %5022 = vmatprep.subr.bf16.mxu0 %v10065_v43  ;;  %4970 = vmatprep.mubr.bf16.mxu1 %v11512_v51  ;;  %v10135_v43 = vld [vmem:[#allocation5 + $0x1420] ss:$88 sps:$4 sm:$0xff]  }
 0x1f2   : > { %5052 = vmatprep.mubr.bf16.mxu0 %v11512_v51 }
 0x1f3   : > { %4941 = vmatpush1.bf16.msra.mxu1 %v10060_v44  ;;  %v10140_v44 = vld [vmem:[#allocation5 + $0x14cc] ss:$88 sps:$4 sm:$0xff]  }
 0x1f4   : > { %5023 = vmatpush1.bf16.msra.mxu0 %v10063_v45  ;;  %4942 = vmatprep.subr.bf16.mxu1 %v10068_v48  ;;  %v10143_v45 = vld [vmem:[#allocation5 + $0x14d4] ss:$88 sps:$4 sm:$0xff]   ;;  %v10138_v48 = vld [vmem:[#allocation5 + $0x14c8] ss:$88 sps:$4 sm:$0xff]  }
 0x1f5   : > { %5024 = vmatprep.subr.bf16.mxu0 %v10071_v49  ;;  %v10141_v49 = vld [vmem:[#allocation5 + $0x14d0] ss:$88 sps:$4 sm:$0xff]  }
 0x1f7   : > { %4943 = vmatpush1.bf16.msra.mxu1 %v10066_v50  ;;  %v10146_v50 = vld [vmem:[#allocation5 + $0x157c] ss:$88 sps:$4 sm:$0xff]  }
 0x1f8   : > { %5025 = vmatpush1.bf16.msra.mxu0 %v10069_v53  ;;  %4944 = vmatprep.subr.bf16.mxu1 %v10074_v54  ;;  %v10149_v53 = vld [vmem:[#allocation5 + $0x1584] ss:$88 sps:$4 sm:$0xff]   ;;  %v10144_v54 = vld [vmem:[#allocation5 + $0x1578] ss:$88 sps:$4 sm:$0xff]  }
 0x1f9   : > { %5026 = vmatprep.subr.bf16.mxu0 %v10077_v55  ;;  %v10147_v55 = vld [vmem:[#allocation5 + $0x1580] ss:$88 sps:$4 sm:$0xff]  }
 0x1fb   : > { %4945 = vmatpush1.bf16.msra.mxu1 %v10072_v56  ;;  %v10152_v56 = vld [vmem:[#allocation5 + $0x3c] ss:$88 sps:$4 sm:$0xff]  }
 0x1fc   : > { %5027 = vmatpush1.bf16.msra.mxu0 %v10075_v57  ;;  %4946 = vmatprep.subr.bf16.mxu1 %v10080_v58  ;;  %v10155_v57 = vld [vmem:[#allocation5 + $0x44] ss:$88 sps:$4 sm:$0xff]   ;;  %v10150_v58 = vld [vmem:[#allocation5 + $0x38] ss:$88 sps:$4 sm:$0xff]  }
 0x1fd   : > { %5028 = vmatprep.subr.bf16.mxu0 %v10083_v59  ;;  %v10153_v59 = vld [vmem:[#allocation5 + $0x40] ss:$88 sps:$4 sm:$0xff]  }
 0x1ff   : > { %4947 = vmatpush1.bf16.msra.mxu1 %v10078_v60  ;;  %v10158_v60 = vld [vmem:[#allocation5 + $0xec] ss:$88 sps:$4 sm:$0xff]  }
 0x200   : > { %5029 = vmatpush1.bf16.msra.mxu0 %v10081_v61  ;;  %4948 = vmatprep.subr.bf16.mxu1 %v10086_v62  ;;  %v10161_v61 = vld [vmem:[#allocation5 + $0xf4] ss:$88 sps:$4 sm:$0xff]   ;;  %v10156_v62 = vld [vmem:[#allocation5 + $0xe8] ss:$88 sps:$4 sm:$0xff]  }
 0x201   : > { %5030 = vmatprep.subr.bf16.mxu0 %v10089_v63  ;;  %v11548_v4 = vpop.f32.mrb[4].mxu1  ;;  %v10159_v63 = vld [vmem:[#allocation5 + $0xf0] ss:$88 sps:$4 sm:$0xff]  }
 0x202   : > { %v11550_v5 = vpop.f32.mrb[4].mxu0  ;;  %v11552_v8 = vpop.f32.mrb[5].mxu1 }
 0x203   : > { %v11554_v9 = vpop.f32.mrb[5].mxu0  ;;  %v4648_v10 = vpop.f32.mrb[6].mxu1  ;;  %4949 = vmatpush1.bf16.msra.mxu1 %v10084_v0  ;;  %v10164_v0 = vld [vmem:[#allocation5 + $0x19c] ss:$88 sps:$4 sm:$0xff]  }
 0x204   : > { %v4730_v11 = vpop.f32.mrb[6].mxu0  ;;  %5031 = vmatpush1.bf16.msra.mxu0 %v10087_v1  ;;  %v4649_v14 = vpop.f32.mrb[7].mxu1  ;;  %4950 = vmatprep.subr.bf16.mxu1 %v10092_v2  ;;  %v10167_v1 = vld [vmem:[#allocation5 + $0x1a4] ss:$88 sps:$4 sm:$0xff]   ;;  %v10162_v2 = vld [vmem:[#allocation5 + $0x198] ss:$88 sps:$4 sm:$0xff]  }
 0x205   : > { %v4731_v15 = vpop.f32.mrb[7].mxu0  ;;  %5032 = vmatprep.subr.bf16.mxu0 %v10095_v3  ;;  %v10165_v3 = vld [vmem:[#allocation5 + $0x1a0] ss:$88 sps:$4 sm:$0xff]   ;;  %v10170_v10 = vld [vmem:[#allocation5 + $0x24c] ss:$88 sps:$4 sm:$0xff]  }
 0x206   : > { %v10173_v11 = vld [vmem:[#allocation5 + $0x254] ss:$88 sps:$4 sm:$0xff]   ;;  %v10179_v15 = vld [vmem:[#allocation5 + $0x304] ss:$88 sps:$4 sm:$0xff]  }
 0x207   : > { %4951 = vmatpush1.bf16.msra.mxu1 %v10090_v12  ;;  %v10168_v12 = vld [vmem:[#allocation5 + $0x248] ss:$88 sps:$4 sm:$0xff]   ;;  %v10176_v14 = vld [vmem:[#allocation5 + $0x2fc] ss:$88 sps:$4 sm:$0xff]  }
 0x208   : > { %5033 = vmatpush1.bf16.msra.mxu0 %v10093_v13  ;;  %4952 = vmatprep.subr.bf16.mxu1 %v10098_v16  ;;  %v10171_v13 = vld [vmem:[#allocation5 + $0x250] ss:$88 sps:$4 sm:$0xff]  }
 0x209   : > { %5034 = vmatprep.subr.bf16.mxu0 %v10101_v17  ;;  %v10174_v16 = vld [vmem:[#allocation5 + $0x2f8] ss:$88 sps:$4 sm:$0xff]  }
 0x20a   : > { %v10177_v17 = vld [vmem:[#allocation5 + $0x300] ss:$88 sps:$4 sm:$0xff]  }
 0x20b   : > { %4953 = vmatpush1.bf16.msra.mxu1 %v10096_v18  ;;  %v10182_v18 = vld [vmem:[#allocation5 + $0x3ac] ss:$88 sps:$4 sm:$0xff]  }
 0x20c   : > { %5035 = vmatpush1.bf16.msra.mxu0 %v10099_v19  ;;  %4954 = vmatprep.subr.bf16.mxu1 %v10104_v20  ;;  %v10185_v19 = vld [vmem:[#allocation5 + $0x3b4] ss:$88 sps:$4 sm:$0xff]   ;;  %v10180_v20 = vld [vmem:[#allocation5 + $0x3a8] ss:$88 sps:$4 sm:$0xff]  }
 0x20d   : > { %5036 = vmatprep.subr.bf16.mxu0 %v10107_v21  ;;  %v10183_v21 = vld [vmem:[#allocation5 + $0x3b0] ss:$88 sps:$4 sm:$0xff]  }
 0x20f   : > { %4955 = vmatpush1.bf16.msra.mxu1 %v10102_v22  ;;  %v10188_v22 = vld [vmem:[#allocation5 + $0x45c] ss:$88 sps:$4 sm:$0xff]  }
 0x210   : > { %5037 = vmatpush1.bf16.msra.mxu0 %v10105_v23  ;;  %4956 = vmatprep.subr.bf16.mxu1 %v10110_v24  ;;  %v10191_v23 = vld [vmem:[#allocation5 + $0x464] ss:$88 sps:$4 sm:$0xff]   ;;  %v10186_v24 = vld [vmem:[#allocation5 + $0x458] ss:$88 sps:$4 sm:$0xff]  }
 0x211   : > { %5038 = vmatprep.subr.bf16.mxu0 %v10113_v25  ;;  %v10189_v25 = vld [vmem:[#allocation5 + $0x460] ss:$88 sps:$4 sm:$0xff]  }
 0x213   : > { %4957 = vmatpush1.bf16.msra.mxu1 %v10108_v26  ;;  %v10194_v26 = vld [vmem:[#allocation5 + $0x50c] ss:$88 sps:$4 sm:$0xff]  }
 0x214   : > { %5039 = vmatpush1.bf16.msra.mxu0 %v10111_v27  ;;  %4958 = vmatprep.subr.bf16.mxu1 %v10116_v28  ;;  %v10197_v27 = vld [vmem:[#allocation5 + $0x514] ss:$88 sps:$4 sm:$0xff]   ;;  %v10192_v28 = vld [vmem:[#allocation5 + $0x508] ss:$88 sps:$4 sm:$0xff]  }
 0x215   : > { %5040 = vmatprep.subr.bf16.mxu0 %v10119_v29  ;;  %v10195_v29 = vld [vmem:[#allocation5 + $0x510] ss:$88 sps:$4 sm:$0xff]  }
 0x217   : > { %4959 = vmatpush1.bf16.msra.mxu1 %v10114_v30  ;;  %v10200_v30 = vld [vmem:[#allocation5 + $0x5bc] ss:$88 sps:$4 sm:$0xff]  }
 0x218   : > { %5041 = vmatpush1.bf16.msra.mxu0 %v10117_v31  ;;  %4960 = vmatprep.subr.bf16.mxu1 %v10122_v32  ;;  %v10203_v31 = vld [vmem:[#allocation5 + $0x5c4] ss:$88 sps:$4 sm:$0xff]   ;;  %v10198_v32 = vld [vmem:[#allocation5 + $0x5b8] ss:$88 sps:$4 sm:$0xff]  }
 0x219   : > { %5042 = vmatprep.subr.bf16.mxu0 %v10125_v33  ;;  %v10201_v33 = vld [vmem:[#allocation5 + $0x5c0] ss:$88 sps:$4 sm:$0xff]  }
 0x21b   : > { %4961 = vmatpush1.bf16.msra.mxu1 %v10120_v34  ;;  %v10206_v34 = vld [vmem:[#allocation5 + $0x66c] ss:$88 sps:$4 sm:$0xff]  }
 0x21c   : > { %5043 = vmatpush1.bf16.msra.mxu0 %v10123_v35  ;;  %4962 = vmatprep.subr.bf16.mxu1 %v10128_v36  ;;  %v10209_v35 = vld [vmem:[#allocation5 + $0x674] ss:$88 sps:$4 sm:$0xff]   ;;  %v10204_v36 = vld [vmem:[#allocation5 + $0x668] ss:$88 sps:$4 sm:$0xff]  }
 0x21d   : > { %5044 = vmatprep.subr.bf16.mxu0 %v10131_v37  ;;  %v10207_v37 = vld [vmem:[#allocation5 + $0x670] ss:$88 sps:$4 sm:$0xff]  }
 0x21f   : > { %4963 = vmatpush1.bf16.msra.mxu1 %v10126_v38  ;;  %v10212_v38 = vld [vmem:[#allocation5 + $0x71c] ss:$88 sps:$4 sm:$0xff]  }
 0x220   : > { %5045 = vmatpush1.bf16.msra.mxu0 %v10129_v39  ;;  %4964 = vmatprep.subr.bf16.mxu1 %v10134_v40  ;;  %v10215_v39 = vld [vmem:[#allocation5 + $0x724] ss:$88 sps:$4 sm:$0xff]   ;;  %v10210_v40 = vld [vmem:[#allocation5 + $0x718] ss:$88 sps:$4 sm:$0xff]  }
 0x221   : > { %5046 = vmatprep.subr.bf16.mxu0 %v10137_v41  ;;  %v10213_v41 = vld [vmem:[#allocation5 + $0x720] ss:$88 sps:$4 sm:$0xff]  }
 0x223   : > { %4965 = vmatpush1.bf16.msra.mxu1 %v10132_v42  ;;  %v10218_v42 = vld [vmem:[#allocation5 + $0x7cc] ss:$88 sps:$4 sm:$0xff]  }
 0x224   : > { %5047 = vmatpush1.bf16.msra.mxu0 %v10135_v43  ;;  %4966 = vmatprep.subr.bf16.mxu1 %v10140_v44  ;;  %v10221_v43 = vld [vmem:[#allocation5 + $0x7d4] ss:$88 sps:$4 sm:$0xff]   ;;  %v10216_v44 = vld [vmem:[#allocation5 + $0x7c8] ss:$88 sps:$4 sm:$0xff]  }
 0x225   : > { %5048 = vmatprep.subr.bf16.mxu0 %v10143_v45  ;;  %v10219_v45 = vld [vmem:[#allocation5 + $0x7d0] ss:$88 sps:$4 sm:$0xff]  }
 0x227   : > { %4967 = vmatpush1.bf16.msra.mxu1 %v10138_v48  ;;  %v10224_v48 = vld [vmem:[#allocation5 + $0x87c] ss:$88 sps:$4 sm:$0xff]  }
 0x228   : > { %5049 = vmatpush1.bf16.msra.mxu0 %v10141_v49  ;;  %4968 = vmatprep.subr.bf16.mxu1 %v10146_v50  ;;  %v10227_v49 = vld [vmem:[#allocation5 + $0x884] ss:$88 sps:$4 sm:$0xff]   ;;  %v10222_v50 = vld [vmem:[#allocation5 + $0x878] ss:$88 sps:$4 sm:$0xff]  }
 0x229   : > { %5050 = vmatprep.subr.bf16.mxu0 %v10149_v53  ;;  %v10225_v53 = vld [vmem:[#allocation5 + $0x880] ss:$88 sps:$4 sm:$0xff]  }
 0x22b   : > { %4969 = vmatpush1.bf16.msra.mxu1 %v10144_v54  ;;  %v10230_v54 = vld [vmem:[#allocation5 + $0x92c] ss:$88 sps:$4 sm:$0xff]  }
 0x22c   : > { %5051 = vmatpush1.bf16.msra.mxu0 %v10147_v55  ;;  %5061 = vmatprep.subr.bf16.mxu1 %v10152_v56  ;;  %v10233_v55 = vld [vmem:[#allocation5 + $0x934] ss:$88 sps:$4 sm:$0xff]   ;;  %v10228_v56 = vld [vmem:[#allocation5 + $0x928] ss:$88 sps:$4 sm:$0xff]  }
 0x22d   : > { %5143 = vmatprep.subr.bf16.mxu0 %v10155_v57  ;;  %v10231_v57 = vld [vmem:[#allocation5 + $0x930] ss:$88 sps:$4 sm:$0xff]  }
 0x22e   : > { %4971 = vmatmul.mubr.bf16.vlgmr.msra.gmra.mrb[12].mxu1 %v11518_v7 }
 0x22f   : > { %5053 = vmatmul.mubr.bf16.vlgmr.msra.gmra.mrb[12].mxu0 %v11518_v7  ;;  %5062 = vmatpush1.bf16.msra.mxu1 %v10150_v58  ;;  %v10236_v58 = vld [vmem:[#allocation5 + $0x9dc] ss:$88 sps:$4 sm:$0xff]  }
 0x230   : > { %5144 = vmatpush1.bf16.msra.mxu0 %v10153_v59  ;;  %5063 = vmatprep.subr.bf16.mxu1 %v10158_v60  ;;  %v10239_v59 = vld [vmem:[#allocation5 + $0x9e4] ss:$88 sps:$4 sm:$0xff]   ;;  %v10234_v60 = vld [vmem:[#allocation5 + $0x9d8] ss:$88 sps:$4 sm:$0xff]  }
 0x231   : > { %5145 = vmatprep.subr.bf16.mxu0 %v10161_v61  ;;  %5093 = vmatprep.mubr.bf16.mxu1 %v11509_v47  ;;  %v10237_v61 = vld [vmem:[#allocation5 + $0x9e0] ss:$88 sps:$4 sm:$0xff]  }
 0x232   : > { %5175 = vmatprep.mubr.bf16.mxu0 %v11509_v47 }
 0x233   : > { %5064 = vmatpush1.bf16.msra.mxu1 %v10156_v62  ;;  %v10242_v62 = vld [vmem:[#allocation5 + $0xa8c] ss:$88 sps:$4 sm:$0xff]  }
 0x234   : > { %5146 = vmatpush1.bf16.msra.mxu0 %v10159_v63  ;;  %5065 = vmatprep.subr.bf16.mxu1 %v10164_v0  ;;  %v10245_v63 = vld [vmem:[#allocation5 + $0xa94] ss:$88 sps:$4 sm:$0xff]   ;;  %v10240_v0 = vld [vmem:[#allocation5 + $0xa88] ss:$88 sps:$4 sm:$0xff]  }
 0x235   : > { %5147 = vmatprep.subr.bf16.mxu0 %v10167_v1  ;;  %v10243_v1 = vld [vmem:[#allocation5 + $0xa90] ss:$88 sps:$4 sm:$0xff]  }
 0x237   : > { %5066 = vmatpush1.bf16.msra.mxu1 %v10162_v2  ;;  %v10248_v2 = vld [vmem:[#allocation5 + $0xb3c] ss:$88 sps:$4 sm:$0xff]  }
 0x238   : > { %5148 = vmatpush1.bf16.msra.mxu0 %v10165_v3  ;;  %5067 = vmatprep.subr.bf16.mxu1 %v10170_v10  ;;  %v10251_v3 = vld [vmem:[#allocation5 + $0xb44] ss:$88 sps:$4 sm:$0xff]   ;;  %v10246_v10 = vld [vmem:[#allocation5 + $0xb38] ss:$88 sps:$4 sm:$0xff]  }
 0x239   : > { %5149 = vmatprep.subr.bf16.mxu0 %v10173_v11  ;;  %v10249_v11 = vld [vmem:[#allocation5 + $0xb40] ss:$88 sps:$4 sm:$0xff]  }
 0x23b   : > { %5068 = vmatpush1.bf16.msra.mxu1 %v10168_v12  ;;  %v10254_v12 = vld [vmem:[#allocation5 + $0xbec] ss:$88 sps:$4 sm:$0xff]  }
 0x23c   : > { %5150 = vmatpush1.bf16.msra.mxu0 %v10171_v13  ;;  %5069 = vmatprep.subr.bf16.mxu1 %v10176_v14  ;;  %v10257_v13 = vld [vmem:[#allocation5 + $0xbf4] ss:$88 sps:$4 sm:$0xff]   ;;  %v10252_v14 = vld [vmem:[#allocation5 + $0xbe8] ss:$88 sps:$4 sm:$0xff]  }
 0x23d   : > { %5151 = vmatprep.subr.bf16.mxu0 %v10179_v15  ;;  %v10255_v15 = vld [vmem:[#allocation5 + $0xbf0] ss:$88 sps:$4 sm:$0xff]  }
 0x23f   : > { %5070 = vmatpush1.bf16.msra.mxu1 %v10174_v16  ;;  %v10260_v16 = vld [vmem:[#allocation5 + $0xc9c] ss:$88 sps:$4 sm:$0xff]  }
 0x240   : > { %5152 = vmatpush1.bf16.msra.mxu0 %v10177_v17  ;;  %5071 = vmatprep.subr.bf16.mxu1 %v10182_v18  ;;  %v10263_v17 = vld [vmem:[#allocation5 + $0xca4] ss:$88 sps:$4 sm:$0xff]   ;;  %v10258_v18 = vld [vmem:[#allocation5 + $0xc98] ss:$88 sps:$4 sm:$0xff]  }
 0x241   : > { %5153 = vmatprep.subr.bf16.mxu0 %v10185_v19  ;;  %v10261_v19 = vld [vmem:[#allocation5 + $0xca0] ss:$88 sps:$4 sm:$0xff]  }
 0x243   : > { %5072 = vmatpush1.bf16.msra.mxu1 %v10180_v20  ;;  %v10266_v20 = vld [vmem:[#allocation5 + $0xd4c] ss:$88 sps:$4 sm:$0xff]  }
 0x244   : > { %5154 = vmatpush1.bf16.msra.mxu0 %v10183_v21  ;;  %5073 = vmatprep.subr.bf16.mxu1 %v10188_v22  ;;  %v10269_v21 = vld [vmem:[#allocation5 + $0xd54] ss:$88 sps:$4 sm:$0xff]   ;;  %v10264_v22 = vld [vmem:[#allocation5 + $0xd48] ss:$88 sps:$4 sm:$0xff]  }
 0x245   : > { %5155 = vmatprep.subr.bf16.mxu0 %v10191_v23  ;;  %v10267_v23 = vld [vmem:[#allocation5 + $0xd50] ss:$88 sps:$4 sm:$0xff]  }
 0x247   : > { %5074 = vmatpush1.bf16.msra.mxu1 %v10186_v24  ;;  %v10272_v24 = vld [vmem:[#allocation5 + $0xdfc] ss:$88 sps:$4 sm:$0xff]  }
 0x248   : > { %5156 = vmatpush1.bf16.msra.mxu0 %v10189_v25  ;;  %5075 = vmatprep.subr.bf16.mxu1 %v10194_v26  ;;  %v10275_v25 = vld [vmem:[#allocation5 + $0xe04] ss:$88 sps:$4 sm:$0xff]   ;;  %v10270_v26 = vld [vmem:[#allocation5 + $0xdf8] ss:$88 sps:$4 sm:$0xff]  }
 0x249   : > { %5157 = vmatprep.subr.bf16.mxu0 %v10197_v27  ;;  %v10273_v27 = vld [vmem:[#allocation5 + $0xe00] ss:$88 sps:$4 sm:$0xff]  }
 0x24b   : > { %5076 = vmatpush1.bf16.msra.mxu1 %v10192_v28  ;;  %v10278_v28 = vld [vmem:[#allocation5 + $0xeac] ss:$88 sps:$4 sm:$0xff]  }
 0x24c   : > { %5158 = vmatpush1.bf16.msra.mxu0 %v10195_v29  ;;  %5077 = vmatprep.subr.bf16.mxu1 %v10200_v30  ;;  %v10281_v29 = vld [vmem:[#allocation5 + $0xeb4] ss:$88 sps:$4 sm:$0xff]   ;;  %v10276_v30 = vld [vmem:[#allocation5 + $0xea8] ss:$88 sps:$4 sm:$0xff]  }
 0x24d   : > { %5159 = vmatprep.subr.bf16.mxu0 %v10203_v31  ;;  %v10279_v31 = vld [vmem:[#allocation5 + $0xeb0] ss:$88 sps:$4 sm:$0xff]  }
 0x24f   : > { %5078 = vmatpush1.bf16.msra.mxu1 %v10198_v32  ;;  %v10284_v32 = vld [vmem:[#allocation5 + $0xf5c] ss:$88 sps:$4 sm:$0xff]  }
 0x250   : > { %5160 = vmatpush1.bf16.msra.mxu0 %v10201_v33  ;;  %5079 = vmatprep.subr.bf16.mxu1 %v10206_v34  ;;  %v10287_v33 = vld [vmem:[#allocation5 + $0xf64] ss:$88 sps:$4 sm:$0xff]  }
 0x251   : > { %5161 = vmatprep.subr.bf16.mxu0 %v10209_v35 }
 0x253   : > { %5080 = vmatpush1.bf16.msra.mxu1 %v10204_v36 }
 0x254   : > { %5162 = vmatpush1.bf16.msra.mxu0 %v10207_v37  ;;  %5081 = vmatprep.subr.bf16.mxu1 %v10212_v38 }
 0x255   : > { %5163 = vmatprep.subr.bf16.mxu0 %v10215_v39 }
 0x257   : > { %5082 = vmatpush1.bf16.msra.mxu1 %v10210_v40  ;;  %v10282_v40 = vld [vmem:[#allocation5 + $0xf58] ss:$88 sps:$4 sm:$0xff]  }
 0x258   : > { %5164 = vmatpush1.bf16.msra.mxu0 %v10213_v41  ;;  %5083 = vmatprep.subr.bf16.mxu1 %v10218_v42  ;;  %v10285_v41 = vld [vmem:[#allocation5 + $0xf60] ss:$88 sps:$4 sm:$0xff]  }
 0x259   : > { %5165 = vmatprep.subr.bf16.mxu0 %v10221_v43 }
 0x25b   : > { %5084 = vmatpush1.bf16.msra.mxu1 %v10216_v44  ;;  %v10290_v44 = vld [vmem:[#allocation5 + $0x100c] ss:$88 sps:$4 sm:$0xff]  }
 0x25c   : > { %5166 = vmatpush1.bf16.msra.mxu0 %v10219_v45  ;;  %5085 = vmatprep.subr.bf16.mxu1 %v10224_v48  ;;  %v10293_v45 = vld [vmem:[#allocation5 + $0x1014] ss:$88 sps:$4 sm:$0xff]   ;;  %v10288_v48 = vld [vmem:[#allocation5 + $0x1008] ss:$88 sps:$4 sm:$0xff]  }
 0x25d   : > { %5167 = vmatprep.subr.bf16.mxu0 %v10227_v49  ;;  %v10291_v49 = vld [vmem:[#allocation5 + $0x1010] ss:$88 sps:$4 sm:$0xff]  }
 0x25f   : > { %5086 = vmatpush1.bf16.msra.mxu1 %v10222_v50  ;;  %v10296_v50 = vld [vmem:[#allocation5 + $0x10bc] ss:$88 sps:$4 sm:$0xff]  }
 0x260   : > { %5168 = vmatpush1.bf16.msra.mxu0 %v10225_v53  ;;  %5087 = vmatprep.subr.bf16.mxu1 %v10230_v54  ;;  %v10299_v53 = vld [vmem:[#allocation5 + $0x10c4] ss:$88 sps:$4 sm:$0xff]   ;;  %v10294_v54 = vld [vmem:[#allocation5 + $0x10b8] ss:$88 sps:$4 sm:$0xff]  }
 0x261   : > { %5169 = vmatprep.subr.bf16.mxu0 %v10233_v55  ;;  %v10297_v55 = vld [vmem:[#allocation5 + $0x10c0] ss:$88 sps:$4 sm:$0xff]  }
 0x263   : > { %5088 = vmatpush1.bf16.msra.mxu1 %v10228_v56  ;;  %v10302_v56 = vld [vmem:[#allocation5 + $0x116c] ss:$88 sps:$4 sm:$0xff]  }
 0x264   : > { %5170 = vmatpush1.bf16.msra.mxu0 %v10231_v57  ;;  %5089 = vmatprep.subr.bf16.mxu1 %v10236_v58  ;;  %v10305_v57 = vld [vmem:[#allocation5 + $0x1174] ss:$88 sps:$4 sm:$0xff]   ;;  %v10300_v58 = vld [vmem:[#allocation5 + $0x1168] ss:$88 sps:$4 sm:$0xff]  }
 0x265   : > { %5171 = vmatprep.subr.bf16.mxu0 %v10239_v59  ;;  %v10303_v59 = vld [vmem:[#allocation5 + $0x1170] ss:$88 sps:$4 sm:$0xff]  }
 0x267   : > { %5090 = vmatpush1.bf16.msra.mxu1 %v10234_v60  ;;  %v10308_v60 = vld [vmem:[#allocation5 + $0x121c] ss:$88 sps:$4 sm:$0xff]  }
 0x268   : > { %5172 = vmatpush1.bf16.msra.mxu0 %v10237_v61  ;;  %5091 = vmatprep.subr.bf16.mxu1 %v10242_v62  ;;  %v10311_v61 = vld [vmem:[#allocation5 + $0x1224] ss:$88 sps:$4 sm:$0xff]   ;;  %v10306_v62 = vld [vmem:[#allocation5 + $0x1218] ss:$88 sps:$4 sm:$0xff]  }
 0x269   : > { %5173 = vmatprep.subr.bf16.mxu0 %v10245_v63  ;;  %v10309_v63 = vld [vmem:[#allocation5 + $0x1220] ss:$88 sps:$4 sm:$0xff]  }
 0x26b   : > { %5092 = vmatpush1.bf16.msra.mxu1 %v10240_v0  ;;  %v10314_v0 = vld [vmem:[#allocation5 + $0x12cc] ss:$88 sps:$4 sm:$0xff]  }
 0x26c   : > { %5174 = vmatpush1.bf16.msra.mxu0 %v10243_v1  ;;  %5102 = vmatprep.subr.bf16.mxu1 %v10248_v2  ;;  %v10317_v1 = vld [vmem:[#allocation5 + $0x12d4] ss:$88 sps:$4 sm:$0xff]   ;;  %v10312_v2 = vld [vmem:[#allocation5 + $0x12c8] ss:$88 sps:$4 sm:$0xff]  }
 0x26d   : > { %5184 = vmatprep.subr.bf16.mxu0 %v10251_v3  ;;  %v10315_v3 = vld [vmem:[#allocation5 + $0x12d0] ss:$88 sps:$4 sm:$0xff]  }
 0x26e   : > { %5094 = vmatmul.mubr.bf16.vlgmr.msra.gmra.mrb[16].mxu1 %v11516_v6 }
 0x26f   : > { %5176 = vmatmul.mubr.bf16.vlgmr.msra.gmra.mrb[16].mxu0 %v11516_v6  ;;  %5103 = vmatpush1.bf16.msra.mxu1 %v10246_v10  ;;  %v10320_v10 = vld [vmem:[#allocation5 + $0x137c] ss:$88 sps:$4 sm:$0xff]  }
 0x270   : > { %5185 = vmatpush1.bf16.msra.mxu0 %v10249_v11  ;;  %5104 = vmatprep.subr.bf16.mxu1 %v10254_v12  ;;  %v10323_v11 = vld [vmem:[#allocation5 + $0x1384] ss:$88 sps:$4 sm:$0xff]   ;;  %v10318_v12 = vld [vmem:[#allocation5 + $0x1378] ss:$88 sps:$4 sm:$0xff]  }
 0x271   : > { %5186 = vmatprep.subr.bf16.mxu0 %v10257_v13  ;;  %5134 = vmatprep.mubr.bf16.mxu1 %v11512_v51  ;;  %v10321_v13 = vld [vmem:[#allocation5 + $0x1380] ss:$88 sps:$4 sm:$0xff]  }
 0x272   : > { %5216 = vmatprep.mubr.bf16.mxu0 %v11512_v51 }
 0x273   : > { %5105 = vmatpush1.bf16.msra.mxu1 %v10252_v14  ;;  %v10326_v14 = vld [vmem:[#allocation5 + $0x142c] ss:$88 sps:$4 sm:$0xff]  }
 0x274   : > { %5187 = vmatpush1.bf16.msra.mxu0 %v10255_v15  ;;  %5106 = vmatprep.subr.bf16.mxu1 %v10260_v16  ;;  %v10329_v15 = vld [vmem:[#allocation5 + $0x1434] ss:$88 sps:$4 sm:$0xff]   ;;  %v10324_v16 = vld [vmem:[#allocation5 + $0x1428] ss:$88 sps:$4 sm:$0xff]  }
 0x275   : > { %5188 = vmatprep.subr.bf16.mxu0 %v10263_v17  ;;  %v10327_v17 = vld [vmem:[#allocation5 + $0x1430] ss:$88 sps:$4 sm:$0xff]  }
 0x277   : > { %5107 = vmatpush1.bf16.msra.mxu1 %v10258_v18  ;;  %v10332_v18 = vld [vmem:[#allocation5 + $0x14dc] ss:$88 sps:$4 sm:$0xff]  }
 0x278   : > { %5189 = vmatpush1.bf16.msra.mxu0 %v10261_v19  ;;  %5108 = vmatprep.subr.bf16.mxu1 %v10266_v20  ;;  %v10335_v19 = vld [vmem:[#allocation5 + $0x14e4] ss:$88 sps:$4 sm:$0xff]   ;;  %v10330_v20 = vld [vmem:[#allocation5 + $0x14d8] ss:$88 sps:$4 sm:$0xff]  }
 0x279   : > { %5190 = vmatprep.subr.bf16.mxu0 %v10269_v21  ;;  %v10333_v21 = vld [vmem:[#allocation5 + $0x14e0] ss:$88 sps:$4 sm:$0xff]  }
 0x27b   : > { %5109 = vmatpush1.bf16.msra.mxu1 %v10264_v22  ;;  %v10338_v22 = vld [vmem:[#allocation5 + $0x158c] ss:$88 sps:$4 sm:$0xff]  }
 0x27c   : > { %5191 = vmatpush1.bf16.msra.mxu0 %v10267_v23  ;;  %5110 = vmatprep.subr.bf16.mxu1 %v10272_v24  ;;  %v10341_v23 = vld [vmem:[#allocation5 + $0x1594] ss:$88 sps:$4 sm:$0xff]   ;;  %v10336_v24 = vld [vmem:[#allocation5 + $0x1588] ss:$88 sps:$4 sm:$0xff]  }
 0x27d   : > { %5192 = vmatprep.subr.bf16.mxu0 %v10275_v25  ;;  %v10339_v25 = vld [vmem:[#allocation5 + $0x1590] ss:$88 sps:$4 sm:$0xff]  }
 0x27f   : > { %5111 = vmatpush1.bf16.msra.mxu1 %v10270_v26  ;;  %v10344_v26 = vld [vmem:[#allocation5 + $0x4c] ss:$88 sps:$4 sm:$0xff]  }
 0x280   : > { %5193 = vmatpush1.bf16.msra.mxu0 %v10273_v27  ;;  %5112 = vmatprep.subr.bf16.mxu1 %v10278_v28  ;;  %v10347_v27 = vld [vmem:[#allocation5 + $0x54] ss:$88 sps:$4 sm:$0xff]   ;;  %v10342_v28 = vld [vmem:[#allocation5 + $0x48] ss:$88 sps:$4 sm:$0xff]  }
 0x281   : > { %5194 = vmatprep.subr.bf16.mxu0 %v10281_v29  ;;  %v11564_v34 = vpop.f32.mrb[8].mxu1  ;;  %v10345_v29 = vld [vmem:[#allocation5 + $0x50] ss:$88 sps:$4 sm:$0xff]  }
 0x282   : > { %v11566_v35 = vpop.f32.mrb[8].mxu0  ;;  %v11568_v36 = vpop.f32.mrb[9].mxu1 }
 0x283   : > { %v11570_v37 = vpop.f32.mrb[9].mxu0  ;;  %v4812_v38 = vpop.f32.mrb[10].mxu1  ;;  %5113 = vmatpush1.bf16.msra.mxu1 %v10276_v30  ;;  %v10350_v30 = vld [vmem:[#allocation5 + $0xfc] ss:$88 sps:$4 sm:$0xff]  }
 0x284   : > { %v4894_v39 = vpop.f32.mrb[10].mxu0  ;;  %5195 = vmatpush1.bf16.msra.mxu0 %v10279_v31  ;;  %v4813_v42 = vpop.f32.mrb[11].mxu1  ;;  %5114 = vmatprep.subr.bf16.mxu1 %v10284_v32  ;;  %v10353_v31 = vld [vmem:[#allocation5 + $0x104] ss:$88 sps:$4 sm:$0xff]   ;;  %v10348_v32 = vld [vmem:[#allocation5 + $0xf8] ss:$88 sps:$4 sm:$0xff]  }
 0x285   : > { %v4895_v43 = vpop.f32.mrb[11].mxu0  ;;  %5196 = vmatprep.subr.bf16.mxu0 %v10287_v33  ;;  %v10351_v33 = vld [vmem:[#allocation5 + $0x100] ss:$88 sps:$4 sm:$0xff]   ;;  %v10356_v38 = vld [vmem:[#allocation5 + $0x1ac] ss:$88 sps:$4 sm:$0xff]  }
 0x286   : > { %v10359_v39 = vld [vmem:[#allocation5 + $0x1b4] ss:$88 sps:$4 sm:$0xff]   ;;  %v10365_v43 = vld [vmem:[#allocation5 + $0x264] ss:$88 sps:$4 sm:$0xff]  }
 0x287   : > { %5115 = vmatpush1.bf16.msra.mxu1 %v10282_v40  ;;  %v10354_v40 = vld [vmem:[#allocation5 + $0x1a8] ss:$88 sps:$4 sm:$0xff]   ;;  %v10362_v42 = vld [vmem:[#allocation5 + $0x25c] ss:$88 sps:$4 sm:$0xff]  }
 0x288   : > { %5197 = vmatpush1.bf16.msra.mxu0 %v10285_v41  ;;  %5116 = vmatprep.subr.bf16.mxu1 %v10290_v44  ;;  %v10357_v41 = vld [vmem:[#allocation5 + $0x1b0] ss:$88 sps:$4 sm:$0xff]  }
 0x289   : > { %5198 = vmatprep.subr.bf16.mxu0 %v10293_v45  ;;  %v10360_v44 = vld [vmem:[#allocation5 + $0x258] ss:$88 sps:$4 sm:$0xff]  }
 0x28a   : > { %v10363_v45 = vld [vmem:[#allocation5 + $0x260] ss:$88 sps:$4 sm:$0xff]  }
 0x28b   : > { %5117 = vmatpush1.bf16.msra.mxu1 %v10288_v48  ;;  %v10368_v48 = vld [vmem:[#allocation5 + $0x30c] ss:$88 sps:$4 sm:$0xff]  }
 0x28c   : > { %5199 = vmatpush1.bf16.msra.mxu0 %v10291_v49  ;;  %5118 = vmatprep.subr.bf16.mxu1 %v10296_v50  ;;  %v10371_v49 = vld [vmem:[#allocation5 + $0x314] ss:$88 sps:$4 sm:$0xff]   ;;  %v10366_v50 = vld [vmem:[#allocation5 + $0x308] ss:$88 sps:$4 sm:$0xff]  }
 0x28d   : > { %5200 = vmatprep.subr.bf16.mxu0 %v10299_v53  ;;  %v10369_v53 = vld [vmem:[#allocation5 + $0x310] ss:$88 sps:$4 sm:$0xff]  }
 0x28f   : > { %5119 = vmatpush1.bf16.msra.mxu1 %v10294_v54  ;;  %v10377_v54 = vld [vmem:[#allocation5 + $0x3c4] ss:$88 sps:$4 sm:$0xff]  }
 0x290   : > { %5201 = vmatpush1.bf16.msra.mxu0 %v10297_v55  ;;  %5120 = vmatprep.subr.bf16.mxu1 %v10302_v56  ;;  %v10372_v55 = vld [vmem:[#allocation5 + $0x3b8] ss:$88 sps:$4 sm:$0xff]  }
 0x291   : > { %5202 = vmatprep.subr.bf16.mxu0 %v10305_v57  ;;  %v10375_v56 = vld [vmem:[#allocation5 + $0x3c0] ss:$88 sps:$4 sm:$0xff]   ;;  %v10380_v57 = vld [vmem:[#allocation5 + $0x46c] ss:$88 sps:$4 sm:$0xff]  }
 0x293   : > { %5121 = vmatpush1.bf16.msra.mxu1 %v10300_v58  ;;  %v10383_v58 = vld [vmem:[#allocation5 + $0x474] ss:$88 sps:$4 sm:$0xff]  }
 0x294   : > { %5203 = vmatpush1.bf16.msra.mxu0 %v10303_v59  ;;  %5122 = vmatprep.subr.bf16.mxu1 %v10308_v60  ;;  %v10378_v59 = vld [vmem:[#allocation5 + $0x468] ss:$88 sps:$4 sm:$0xff]  }
 0x295   : > { %5204 = vmatprep.subr.bf16.mxu0 %v10311_v61  ;;  %v10381_v60 = vld [vmem:[#allocation5 + $0x470] ss:$88 sps:$4 sm:$0xff]   ;;  %v10386_v61 = vld [vmem:[#allocation5 + $0x51c] ss:$88 sps:$4 sm:$0xff]  }
 0x297   : > { %5123 = vmatpush1.bf16.msra.mxu1 %v10306_v62  ;;  %v10389_v62 = vld [vmem:[#allocation5 + $0x524] ss:$88 sps:$4 sm:$0xff]  }
 0x298   : > { %5205 = vmatpush1.bf16.msra.mxu0 %v10309_v63  ;;  %5124 = vmatprep.subr.bf16.mxu1 %v10314_v0  ;;  %v10384_v63 = vld [vmem:[#allocation5 + $0x518] ss:$88 sps:$4 sm:$0xff]  }
 0x299   : > { %5206 = vmatprep.subr.bf16.mxu0 %v10317_v1  ;;  %v10387_v0 = vld [vmem:[#allocation5 + $0x520] ss:$88 sps:$4 sm:$0xff]   ;;  %v10392_v1 = vld [vmem:[#allocation5 + $0x5cc] ss:$88 sps:$4 sm:$0xff]  }
 0x29b   : > { %5125 = vmatpush1.bf16.msra.mxu1 %v10312_v2  ;;  %v10395_v2 = vld [vmem:[#allocation5 + $0x5d4] ss:$88 sps:$4 sm:$0xff]  }
 0x29c   : > { %5207 = vmatpush1.bf16.msra.mxu0 %v10315_v3  ;;  %5126 = vmatprep.subr.bf16.mxu1 %v10320_v10  ;;  %v10390_v3 = vld [vmem:[#allocation5 + $0x5c8] ss:$88 sps:$4 sm:$0xff]  }
 0x29d   : > { %5208 = vmatprep.subr.bf16.mxu0 %v10323_v11  ;;  %v10393_v10 = vld [vmem:[#allocation5 + $0x5d0] ss:$88 sps:$4 sm:$0xff]   ;;  %v10398_v11 = vld [vmem:[#allocation5 + $0x67c] ss:$88 sps:$4 sm:$0xff]  }
 0x29f   : > { %5127 = vmatpush1.bf16.msra.mxu1 %v10318_v12  ;;  %v10401_v12 = vld [vmem:[#allocation5 + $0x684] ss:$88 sps:$4 sm:$0xff]  }
 0x2a0   : > { %5209 = vmatpush1.bf16.msra.mxu0 %v10321_v13  ;;  %5128 = vmatprep.subr.bf16.mxu1 %v10326_v14  ;;  %v10396_v13 = vld [vmem:[#allocation5 + $0x678] ss:$88 sps:$4 sm:$0xff]  }
 0x2a1   : > { %5210 = vmatprep.subr.bf16.mxu0 %v10329_v15  ;;  %v10399_v14 = vld [vmem:[#allocation5 + $0x680] ss:$88 sps:$4 sm:$0xff]   ;;  %v10404_v15 = vld [vmem:[#allocation5 + $0x72c] ss:$88 sps:$4 sm:$0xff]  }
 0x2a3   : > { %5129 = vmatpush1.bf16.msra.mxu1 %v10324_v16  ;;  %v10407_v16 = vld [vmem:[#allocation5 + $0x734] ss:$88 sps:$4 sm:$0xff]  }
 0x2a4   : > { %5211 = vmatpush1.bf16.msra.mxu0 %v10327_v17  ;;  %5130 = vmatprep.subr.bf16.mxu1 %v10332_v18  ;;  %v10402_v17 = vld [vmem:[#allocation5 + $0x728] ss:$88 sps:$4 sm:$0xff]  }
 0x2a5   : > { %5212 = vmatprep.subr.bf16.mxu0 %v10335_v19  ;;  %v10405_v18 = vld [vmem:[#allocation5 + $0x730] ss:$88 sps:$4 sm:$0xff]   ;;  %v10410_v19 = vld [vmem:[#allocation5 + $0x7dc] ss:$88 sps:$4 sm:$0xff]  }
 0x2a7   : > { %5131 = vmatpush1.bf16.msra.mxu1 %v10330_v20  ;;  %v10413_v20 = vld [vmem:[#allocation5 + $0x7e4] ss:$88 sps:$4 sm:$0xff]  }
 0x2a8   : > { %5213 = vmatpush1.bf16.msra.mxu0 %v10333_v21  ;;  %5132 = vmatprep.subr.bf16.mxu1 %v10338_v22  ;;  %v10408_v21 = vld [vmem:[#allocation5 + $0x7d8] ss:$88 sps:$4 sm:$0xff]  }
 0x2a9   : > { %5214 = vmatprep.subr.bf16.mxu0 %v10341_v23  ;;  %v10411_v22 = vld [vmem:[#allocation5 + $0x7e0] ss:$88 sps:$4 sm:$0xff]   ;;  %v10416_v23 = vld [vmem:[#allocation5 + $0x88c] ss:$88 sps:$4 sm:$0xff]  }
 0x2ab   : > { %5133 = vmatpush1.bf16.msra.mxu1 %v10336_v24  ;;  %v10419_v24 = vld [vmem:[#allocation5 + $0x894] ss:$88 sps:$4 sm:$0xff]  }
 0x2ac   : > { %5215 = vmatpush1.bf16.msra.mxu0 %v10339_v25  ;;  %5225 = vmatprep.subr.bf16.mxu1 %v10344_v26  ;;  %v10414_v25 = vld [vmem:[#allocation5 + $0x888] ss:$88 sps:$4 sm:$0xff]  }
 0x2ad   : > { %5307 = vmatprep.subr.bf16.mxu0 %v10347_v27  ;;  %v10417_v26 = vld [vmem:[#allocation5 + $0x890] ss:$88 sps:$4 sm:$0xff]   ;;  %v10422_v27 = vld [vmem:[#allocation5 + $0x93c] ss:$88 sps:$4 sm:$0xff]  }
 0x2ae   : > { %5135 = vmatmul.mubr.bf16.vlgmr.msra.gmra.mrb[16].mxu1 %v11518_v7 }
 0x2af   : > { %5217 = vmatmul.mubr.bf16.vlgmr.msra.gmra.mrb[16].mxu0 %v11518_v7  ;;  %5226 = vmatpush1.bf16.msra.mxu1 %v10342_v28  ;;  %v10425_v28 = vld [vmem:[#allocation5 + $0x944] ss:$88 sps:$4 sm:$0xff]  }
 0x2b0   : > { %5308 = vmatpush1.bf16.msra.mxu0 %v10345_v29  ;;  %5227 = vmatprep.subr.bf16.mxu1 %v10350_v30  ;;  %v8934_v29 = vmul.f32 -1.442695, %v11536_v46  ;;  %v8935_v30 = vmul.f32 -1.442695, %v11538_v52 }
 0x2b1   : > { %5309 = vmatprep.subr.bf16.mxu0 %v10353_v31  ;;  %5257 = vmatprep.mubr.bf16.mxu1 %v11509_v47  ;;  %v8936_v31 = vmul.f32 -1.442695, %v11548_v4 }
 0x2b2   : > { %5339 = vmatprep.mubr.bf16.mxu0 %v11509_v47  ;;  %v10374_v47 = vld [vmem:[#allocation5 + $0x3bc] ss:$88 sps:$4 sm:$0xff]   ;;  %11062 = vpow2.f32 %v8934_v29 }
 0x2b3   : > { %5228 = vmatpush1.bf16.msra.mxu1 %v10348_v32  ;;  %v10420_v32 = vld [vmem:[#allocation5 + $0x938] ss:$88 sps:$4 sm:$0xff]   ;;  %11064 = vpow2.f32 %v8935_v30 }
 0x2b4   : > { %5310 = vmatpush1.bf16.msra.mxu0 %v10351_v33  ;;  %5229 = vmatprep.subr.bf16.mxu1 %v10356_v38  ;;  %v10423_v33 = vld [vmem:[#allocation5 + $0x940] ss:$88 sps:$4 sm:$0xff]   ;;  %v10428_v38 = vld [vmem:[#allocation5 + $0x9ec] ss:$88 sps:$4 sm:$0xff]   ;;  %11066 = vpow2.f32 %v8936_v31 }
 0x2b5   : > { %5311 = vmatprep.subr.bf16.mxu0 %v10359_v39  ;;  %v10431_v39 = vld [vmem:[#allocation5 + $0x9f4] ss:$88 sps:$4 sm:$0xff]  }
 0x2b7   : > { %5230 = vmatpush1.bf16.msra.mxu1 %v10354_v40  ;;  %v10426_v40 = vld [vmem:[#allocation5 + $0x9e8] ss:$88 sps:$4 sm:$0xff]  }
 0x2b8   : > { %5312 = vmatpush1.bf16.msra.mxu0 %v10357_v41  ;;  %5231 = vmatprep.subr.bf16.mxu1 %v10362_v42  ;;  %v10429_v41 = vld [vmem:[#allocation5 + $0x9f0] ss:$88 sps:$4 sm:$0xff]   ;;  %v10434_v42 = vld [vmem:[#allocation5 + $0xa9c] ss:$88 sps:$4 sm:$0xff]  }
 0x2b9   : > { %5313 = vmatprep.subr.bf16.mxu0 %v10365_v43  ;;  %v10437_v43 = vld [vmem:[#allocation5 + $0xaa4] ss:$88 sps:$4 sm:$0xff]  }
 0x2bb   : > { %5232 = vmatpush1.bf16.msra.mxu1 %v10360_v44  ;;  %v10432_v44 = vld [vmem:[#allocation5 + $0xa98] ss:$88 sps:$4 sm:$0xff]  }
 0x2bc   : > { %5314 = vmatpush1.bf16.msra.mxu0 %v10363_v45  ;;  %5233 = vmatprep.subr.bf16.mxu1 %v10368_v48  ;;  %v10435_v45 = vld [vmem:[#allocation5 + $0xaa0] ss:$88 sps:$4 sm:$0xff]   ;;  %v10440_v48 = vld [vmem:[#allocation5 + $0xb4c] ss:$88 sps:$4 sm:$0xff]  }
 0x2bd   : > { %5315 = vmatprep.subr.bf16.mxu0 %v10371_v49  ;;  %v10443_v49 = vld [vmem:[#allocation5 + $0xb54] ss:$88 sps:$4 sm:$0xff]  }
 0x2bf   : > { %5234 = vmatpush1.bf16.msra.mxu1 %v10366_v50  ;;  %v11063_v50 = vpop.eup %11062 }
 0x2c0   : > { %5316 = vmatpush1.bf16.msra.mxu0 %v10369_v53  ;;  %5235 = vmatprep.subr.bf16.mxu1 %v10374_v47  ;;  %v10438_v53 = vld [vmem:[#allocation5 + $0xb48] ss:$88 sps:$4 sm:$0xff]  }
 0x2c1   : > { %5317 = vmatprep.subr.bf16.mxu0 %v10377_v54  ;;  %v10441_v47 = vld [vmem:[#allocation5 + $0xb50] ss:$88 sps:$4 sm:$0xff]   ;;  %v11065_v54 = vpop.eup %11064 }
 0x2c3   : > { %5236 = vmatpush1.bf16.msra.mxu1 %v10372_v55  ;;  %v10446_v55 = vld [vmem:[#allocation5 + $0xbfc] ss:$88 sps:$4 sm:$0xff]  }
 0x2c4   : > { %5318 = vmatpush1.bf16.msra.mxu0 %v10375_v56  ;;  %5237 = vmatprep.subr.bf16.mxu1 %v10380_v57  ;;  %v10449_v56 = vld [vmem:[#allocation5 + $0xc04] ss:$88 sps:$4 sm:$0xff]   ;;  %v11067_v57 = vpop.eup %11066 }
 0x2c5   : > { %5319 = vmatprep.subr.bf16.mxu0 %v10383_v58  ;;  %v5422_v58 = vadd.f32 1.0, %v11063_v50  ;;  %v10489_v50 = vld [vmem:[#allocation5 + $0x10d0] ss:$88 sps:$4 sm:$0xff]  }
 0x2c7   : > { %5238 = vmatpush1.bf16.msra.mxu1 %v10378_v59  ;;  %v5423_v59 = vadd.f32 1.0, %v11065_v54  ;;  %11068 = vrcp.f32 %v5422_v58  ;;  %v10492_v54 = vld [vmem:[#allocation5 + $0x1178] ss:$88 sps:$4 sm:$0xff]   ;;  %v10498_v58 = vld [vmem:[#allocation5 + $0x1228] ss:$88 sps:$4 sm:$0xff]  }
 0x2c8   : > { %5320 = vmatpush1.bf16.msra.mxu0 %v10381_v60  ;;  %5239 = vmatprep.subr.bf16.mxu1 %v10386_v61  ;;  %v10444_v60 = vld [vmem:[#allocation5 + $0xbf8] ss:$88 sps:$4 sm:$0xff]  }
 0x2c9   : > { %5321 = vmatprep.subr.bf16.mxu0 %v10389_v62  ;;  %v10447_v61 = vld [vmem:[#allocation5 + $0xc00] ss:$88 sps:$4 sm:$0xff]   ;;  %v5424_v62 = vadd.f32 1.0, %v11067_v57  ;;  %11070 = vrcp.f32 %v5423_v59  ;;  %v10503_v57 = vld [vmem:[#allocation5 + $0x1234] ss:$88 sps:$4 sm:$0xff]  }
 0x2ca   : > { %v10501_v59 = vld [vmem:[#allocation5 + $0x1230] ss:$88 sps:$4 sm:$0xff]  }
 0x2cb   : > { %5240 = vmatpush1.bf16.msra.mxu1 %v10384_v63  ;;  %v10452_v63 = vld [vmem:[#allocation5 + $0xcac] ss:$88 sps:$4 sm:$0xff]   ;;  %11072 = vrcp.f32 %v5424_v62  ;;  %v10504_v62 = vld [vmem:[#allocation5 + $0x12d8] ss:$88 sps:$4 sm:$0xff]  }
 0x2cc   : > { %5322 = vmatpush1.bf16.msra.mxu0 %v10387_v0  ;;  %5241 = vmatprep.subr.bf16.mxu1 %v10392_v1  ;;  %v10455_v0 = vld [vmem:[#allocation5 + $0xcb4] ss:$88 sps:$4 sm:$0xff]   ;;  %v10450_v1 = vld [vmem:[#allocation5 + $0xca8] ss:$88 sps:$4 sm:$0xff]  }
 0x2cd   : > { %5323 = vmatprep.subr.bf16.mxu0 %v10395_v2  ;;  %v10458_v2 = vld [vmem:[#allocation5 + $0xd5c] ss:$88 sps:$4 sm:$0xff]  }
 0x2cf   : > { %5242 = vmatpush1.bf16.msra.mxu1 %v10390_v3  ;;  %v10461_v3 = vld [vmem:[#allocation5 + $0xd64] ss:$88 sps:$4 sm:$0xff]  }
 0x2d0   : > { %5324 = vmatpush1.bf16.msra.mxu0 %v10393_v10  ;;  %5243 = vmatprep.subr.bf16.mxu1 %v10398_v11  ;;  %v10456_v10 = vld [vmem:[#allocation5 + $0xd58] ss:$88 sps:$4 sm:$0xff]  }
 0x2d1   : > { %5325 = vmatprep.subr.bf16.mxu0 %v10401_v12  ;;  %v10459_v11 = vld [vmem:[#allocation5 + $0xd60] ss:$88 sps:$4 sm:$0xff]   ;;  %v10464_v12 = vld [vmem:[#allocation5 + $0xe0c] ss:$88 sps:$4 sm:$0xff]  }
 0x2d3   : > { %5244 = vmatpush1.bf16.msra.mxu1 %v10396_v13  ;;  %v10467_v13 = vld [vmem:[#allocation5 + $0xe14] ss:$88 sps:$4 sm:$0xff]  }
 0x2d4   : > { %5326 = vmatpush1.bf16.msra.mxu0 %v10399_v14  ;;  %5245 = vmatprep.subr.bf16.mxu1 %v10404_v15  ;;  %v10465_v14 = vld [vmem:[#allocation5 + $0xe10] ss:$88 sps:$4 sm:$0xff]   ;;  %v11069_v15 = vpop.eup %11068 }
 0x2d5   : > { %5327 = vmatprep.subr.bf16.mxu0 %v10407_v16  ;;  %v10470_v16 = vld [vmem:[#allocation5 + $0xebc] ss:$88 sps:$4 sm:$0xff]  }
 0x2d7   : > { %5246 = vmatpush1.bf16.msra.mxu1 %v10402_v17  ;;  %v10473_v17 = vld [vmem:[#allocation5 + $0xec4] ss:$88 sps:$4 sm:$0xff]  }
 0x2d8   : > { %5328 = vmatpush1.bf16.msra.mxu0 %v10405_v18  ;;  %5247 = vmatprep.subr.bf16.mxu1 %v10410_v19  ;;  %v11071_v18 = vpop.eup %11070 }
 0x2d9   : > { %5329 = vmatprep.subr.bf16.mxu0 %v10413_v20  ;;  %v11073_v19 = vpop.eup %11072  ;;  %v10468_v20 = vld [vmem:[#allocation5 + $0xeb8] ss:$88 sps:$4 sm:$0xff]  }
 0x2db   : > { %5248 = vmatpush1.bf16.msra.mxu1 %v10408_v21  ;;  %v10471_v21 = vld [vmem:[#allocation5 + $0xec0] ss:$88 sps:$4 sm:$0xff]  }
 0x2dc   : > { %5330 = vmatpush1.bf16.msra.mxu0 %v10411_v22  ;;  %5249 = vmatprep.subr.bf16.mxu1 %v10416_v23  ;;  %v5456_v22 = vmul.f32 %v11071_v18, %v11538_v52  ;;  %v10476_v23 = vld [vmem:[#allocation5 + $0xf6c] ss:$88 sps:$4 sm:$0xff]   ;;  %v10528_v18 = vld [vmem:[#allocation5 + $0x1598] ss:$88 sps:$4 sm:$0xff]  }
 0x2dd   : > { %5331 = vmatprep.subr.bf16.mxu0 %v10419_v24  ;;  %v10479_v24 = vld [vmem:[#allocation5 + $0xf74] ss:$88 sps:$4 sm:$0xff]  }
 0x2df   : > { %5250 = vmatpush1.bf16.msra.mxu1 %v10414_v25  ;;  %v5457_v25 = vmul.f32 %v11073_v19, %v11548_v4  ;;  %v10531_v19 = vld [vmem:[#allocation5 + $0x15a0] ss:$88 sps:$4 sm:$0xff]  }
 0x2e0   : > { %5332 = vmatpush1.bf16.msra.mxu0 %v10417_v26  ;;  %5251 = vmatprep.subr.bf16.mxu1 %v10422_v27 }
 0x2e1   : > { %5333 = vmatprep.subr.bf16.mxu0 %v10425_v28  ;;  %v5455_v28 = vmul.f32 %v11069_v15, %v11536_v46  ;;  %v10485_v46 = vld [vmem:[#allocation5 + $0x1024] ss:$88 sps:$4 sm:$0xff]   ;;  %v10525_v15 = vld [vmem:[#allocation5 + $0x14f0] ss:$88 sps:$4 sm:$0xff]  }
 0x2e3   : > { %5252 = vmatpush1.bf16.msra.mxu1 %v10420_v32 }
 0x2e4   : > { %5334 = vmatpush1.bf16.msra.mxu0 %v10423_v33  ;;  %5253 = vmatprep.subr.bf16.mxu1 %v10428_v38 }
 0x2e5   : > { %5335 = vmatprep.subr.bf16.mxu0 %v10431_v39  ;;  %v10474_v39 = vld [vmem:[#allocation5 + $0xf68] ss:$88 sps:$4 sm:$0xff]  }
 0x2e7   : > { %5254 = vmatpush1.bf16.msra.mxu1 %v10426_v40  ;;  %v10477_v40 = vld [vmem:[#allocation5 + $0xf70] ss:$88 sps:$4 sm:$0xff]  }
 0x2e8   : > { %5336 = vmatpush1.bf16.msra.mxu0 %v10429_v41  ;;  %5255 = vmatprep.subr.bf16.mxu1 %v10434_v42  ;;  %v10482_v42 = vld [vmem:[#allocation5 + $0x101c] ss:$88 sps:$4 sm:$0xff]  }
 0x2e9   : > { %5337 = vmatprep.subr.bf16.mxu0 %v10437_v43  ;;  %v10480_v43 = vld [vmem:[#allocation5 + $0x1018] ss:$88 sps:$4 sm:$0xff]  }
 0x2eb   : > { %5256 = vmatpush1.bf16.msra.mxu1 %v10432_v44  ;;  %v10483_v44 = vld [vmem:[#allocation5 + $0x1020] ss:$88 sps:$4 sm:$0xff]  }
 0x2ec   : > { %5338 = vmatpush1.bf16.msra.mxu0 %v10435_v45  ;;  %5266 = vmatprep.subr.bf16.mxu1 %v10440_v48  ;;  %v10488_v45 = vld [vmem:[#allocation5 + $0x10cc] ss:$88 sps:$4 sm:$0xff]  }
 0x2ed   : > { %5348 = vmatprep.subr.bf16.mxu0 %v10443_v49  ;;  %v10491_v48 = vld [vmem:[#allocation5 + $0x10d4] ss:$88 sps:$4 sm:$0xff]   ;;  %v10486_v49 = vld [vmem:[#allocation5 + $0x10c8] ss:$88 sps:$4 sm:$0xff]  }
 0x2ee   : > { %5258 = vmatmul.mubr.bf16.vlgmr.msra.gmra.mrb[20].mxu1 %v11516_v6 }
 0x2ef   : > { %5340 = vmatmul.mubr.bf16.vlgmr.msra.gmra.mrb[20].mxu0 %v11516_v6  ;;  %5267 = vmatpush1.bf16.msra.mxu1 %v10438_v53  ;;  %v10453_v6 = vld [vmem:[#allocation5 + $0xcb0] ss:$88 sps:$4 sm:$0xff]   ;;  %v10494_v53 = vld [vmem:[#allocation5 + $0x117c] ss:$88 sps:$4 sm:$0xff]  }
 0x2f0   : > { %5349 = vmatpush1.bf16.msra.mxu0 %v10441_v47  ;;  %5268 = vmatprep.subr.bf16.mxu1 %v10446_v55  ;;  %v10497_v47 = vld [vmem:[#allocation5 + $0x1184] ss:$88 sps:$4 sm:$0xff]   ;;  %v10495_v55 = vld [vmem:[#allocation5 + $0x1180] ss:$88 sps:$4 sm:$0xff]  }
 0x2f1   : > { %5350 = vmatprep.subr.bf16.mxu0 %v10449_v56  ;;  %5298 = vmatprep.mubr.bf16.mxu1 %v11512_v51  ;;  %v10500_v56 = vld [vmem:[#allocation5 + $0x122c] ss:$88 sps:$4 sm:$0xff]  }
 0x2f2   : > { %5380 = vmatprep.mubr.bf16.mxu0 %v11512_v51  ;;  %v10462_v51 = vld [vmem:[#allocation5 + $0xe08] ss:$88 sps:$4 sm:$0xff]  }
 0x2f3   : > { %5269 = vmatpush1.bf16.msra.mxu1 %v10444_v60  ;;  %v10506_v60 = vld [vmem:[#allocation5 + $0x12dc] ss:$88 sps:$4 sm:$0xff]  }
 0x2f4   : > { %5351 = vmatpush1.bf16.msra.mxu0 %v10447_v61  ;;  %5270 = vmatprep.subr.bf16.mxu1 %v10452_v63  ;;  %v10509_v61 = vld [vmem:[#allocation5 + $0x12e4] ss:$88 sps:$4 sm:$0xff]   ;;  %v10507_v63 = vld [vmem:[#allocation5 + $0x12e0] ss:$88 sps:$4 sm:$0xff]  }
 0x2f5   : > { %5352 = vmatprep.subr.bf16.mxu0 %v10455_v0  ;;  %v10512_v0 = vld [vmem:[#allocation5 + $0x138c] ss:$88 sps:$4 sm:$0xff]  }
 0x2f7   : > { %5271 = vmatpush1.bf16.msra.mxu1 %v10450_v1  ;;  %v10515_v1 = vld [vmem:[#allocation5 + $0x1394] ss:$88 sps:$4 sm:$0xff]  }
 0x2f8   : > { %5353 = vmatpush1.bf16.msra.mxu0 %v10453_v6  ;;  %5272 = vmatprep.subr.bf16.mxu1 %v10458_v2  ;;  %v10510_v6 = vld [vmem:[#allocation5 + $0x1388] ss:$88 sps:$4 sm:$0xff]  }
 0x2f9   : > { %5354 = vmatprep.subr.bf16.mxu0 %v10461_v3  ;;  %v10513_v2 = vld [vmem:[#allocation5 + $0x1390] ss:$88 sps:$4 sm:$0xff]   ;;  %v10518_v3 = vld [vmem:[#allocation5 + $0x143c] ss:$88 sps:$4 sm:$0xff]  }
 0x2fb   : > { %5273 = vmatpush1.bf16.msra.mxu1 %v10456_v10  ;;  %v10521_v10 = vld [vmem:[#allocation5 + $0x1444] ss:$88 sps:$4 sm:$0xff]  }
 0x2fc   : > { %5355 = vmatpush1.bf16.msra.mxu0 %v10459_v11  ;;  %5274 = vmatprep.subr.bf16.mxu1 %v10464_v12  ;;  %v10516_v11 = vld [vmem:[#allocation5 + $0x1438] ss:$88 sps:$4 sm:$0xff]  }
 0x2fd   : > { %5356 = vmatprep.subr.bf16.mxu0 %v10467_v13  ;;  %v10519_v12 = vld [vmem:[#allocation5 + $0x1440] ss:$88 sps:$4 sm:$0xff]   ;;  %v10524_v13 = vld [vmem:[#allocation5 + $0x14ec] ss:$88 sps:$4 sm:$0xff]  }
 0x2ff   : > { %5275 = vmatpush1.bf16.msra.mxu1 %v10462_v51  ;;  %v10527_v51 = vld [vmem:[#allocation5 + $0x14f4] ss:$88 sps:$4 sm:$0xff]  }
 0x300   : > { %5357 = vmatpush1.bf16.msra.mxu0 %v10465_v14  ;;  %5276 = vmatprep.subr.bf16.mxu1 %v10470_v16  ;;  %v10522_v14 = vld [vmem:[#allocation5 + $0x14e8] ss:$88 sps:$4 sm:$0xff]   ;;  %v10530_v16 = vld [vmem:[#allocation5 + $0x159c] ss:$88 sps:$4 sm:$0xff]  }
 0x301   : > { %5358 = vmatprep.subr.bf16.mxu0 %v10473_v17  ;;  %v11585_v26 = vpop.f32.mrb[12].mxu1  ;;  %v10533_v17 = vld [vmem:[#allocation5 + $0x15a4] ss:$88 sps:$4 sm:$0xff]  }
 0x302   : > { %v5054_v27 = vpop.f32.mrb[12].mxu0  ;;  %v4974_v30 = vpop.f32.mrb[13].mxu1 }
 0x303   : > { %v11588_v29 = vmul.f32 %v5456_v22, %v5054_v27  ;;  %v5056_v31 = vpop.f32.mrb[13].mxu0  ;;  %v11590_v32 = vmul.f32 %v5455_v28, %v4974_v30  ;;  %v4976_v52 = vpop.f32.mrb[14].mxu1  ;;  %5277 = vmatpush1.bf16.msra.mxu1 %v10468_v20  ;;  %v10536_v20 = vld [vmem:[#allocation7 + $0x4] ss:$16 sps:$4 sm:$0xff]   ;;  %v10534_v22 = vld [vmem:[#allocation7] ss:$16 sps:$4 sm:$0xff]  }
 0x304   : > { %v11592_v33 = vmul.f32 %v5457_v25, %v5056_v31  ;;  %v5058_v38 = vpop.f32.mrb[14].mxu0  ;;  %5359 = vmatpush1.bf16.msra.mxu0 %v10471_v21  ;;  %v4977_v4 = vpop.f32.mrb[15].mxu1  ;;  %5278 = vmatprep.subr.bf16.mxu1 %v10476_v23  ;;  %v10539_v21 = vld [vmem:[#allocation7 + $0xc] ss:$16 sps:$4 sm:$0xff]   ;;  %v10537_v23 = vld [vmem:[#allocation7 + $0x8] ss:$16 sps:$4 sm:$0xff]  }
 0x305   : > { %v5059_v41 = vpop.f32.mrb[15].mxu0  ;;  %5360 = vmatprep.subr.bf16.mxu0 %v10479_v24  ;;  %v5478_v24 = vpack.c.bf16 %v11588_v29, %v11588_v29  ;;  %v10542_v25 = vld [vmem:[#allocation7 + $0x24] ss:$16 sps:$4 sm:$0xff]   ;;  %v10545_v27 = vld [vmem:[#allocation7 + $0x2c] ss:$16 sps:$4 sm:$0xff]  }
 0x306   : > { %v10540_v28 = vld [vmem:[#allocation7 + $0x20] ss:$16 sps:$4 sm:$0xff]   ;;  %v10543_v30 = vld [vmem:[#allocation7 + $0x28] ss:$16 sps:$4 sm:$0xff]   ;;  %v10548_v31 = vld [vmem:[#allocation7 + $0x44] ss:$16 sps:$4 sm:$0xff]  }
 0x307   : > { %5279 = vmatpush1.bf16.msra.mxu1 %v10474_v39  ;;  %v10551_v52 = vld [vmem:[#allocation7 + $0x4c] ss:$16 sps:$4 sm:$0xff]   ;;  %v10546_v38 = vld [vmem:[#allocation7 + $0x40] ss:$16 sps:$4 sm:$0xff]   ;;  %v10549_v29 = vld [vmem:[#allocation7 + $0x48] ss:$16 sps:$4 sm:$0xff]  }
 0x308   : > { %5361 = vmatpush1.bf16.msra.mxu0 %v10477_v40  ;;  %5280 = vmatprep.subr.bf16.mxu1 %v10482_v42  ;;  %v10554_v39 = vld [vmem:[#allocation7 + $0x64] ss:$16 sps:$4 sm:$0xff]   ;;  %v10557_v40 = vld [vmem:[#allocation7 + $0x6c] ss:$16 sps:$4 sm:$0xff]   ;;  %v10555_v4 = vld [vmem:[#allocation7 + $0x68] ss:$16 sps:$4 sm:$0xff]  }
 0x309   : > { %5362 = vmatprep.subr.bf16.mxu0 %v10485_v46  ;;  %v10560_v41 = vld [vmem:[#allocation7 + $0x84] ss:$16 sps:$4 sm:$0xff]   ;;  %v10563_v42 = vld [vmem:[#allocation7 + $0x8c] ss:$16 sps:$4 sm:$0xff]   ;;  %v10558_v46 = vld [vmem:[#allocation7 + $0x80] ss:$16 sps:$4 sm:$0xff]  }
 0x30b   : > { %5281 = vmatpush1.bf16.msra.mxu1 %v10480_v43  ;;  %v10561_v43 = vld [vmem:[#allocation7 + $0x88] ss:$16 sps:$4 sm:$0xff]  }
 0x30c   : > { %5363 = vmatpush1.bf16.msra.mxu0 %v10483_v44  ;;  %5282 = vmatprep.subr.bf16.mxu1 %v10488_v45  ;;  %v10566_v44 = vld [vmem:[#allocation7 + $0xa4] ss:$16 sps:$4 sm:$0xff]   ;;  %v10569_v45 = vld [vmem:[#allocation7 + $0xac] ss:$16 sps:$4 sm:$0xff]  }
 0x30d   : > { %5364 = vmatprep.subr.bf16.mxu0 %v10491_v48  ;;  %v10564_v48 = vld [vmem:[#allocation7 + $0xa0] ss:$16 sps:$4 sm:$0xff]  }
 0x30f   : > { %5283 = vmatpush1.bf16.msra.mxu1 %v10486_v49  ;;  %v10567_v49 = vld [vmem:[#allocation7 + $0xa8] ss:$16 sps:$4 sm:$0xff]  }
 0x310   : > { %5365 = vmatpush1.bf16.msra.mxu0 %v10489_v50  ;;  %5284 = vmatprep.subr.bf16.mxu1 %v10494_v53  ;;  %v10572_v50 = vld [vmem:[#allocation7 + $0xc4] ss:$16 sps:$4 sm:$0xff]   ;;  %v10575_v53 = vld [vmem:[#allocation7 + $0xcc] ss:$16 sps:$4 sm:$0xff]  }
 0x311   : > { %5366 = vmatprep.subr.bf16.mxu0 %v10497_v47  ;;  %v10570_v47 = vld [vmem:[#allocation7 + $0xc0] ss:$16 sps:$4 sm:$0xff]  }
 0x313   : > { %5285 = vmatpush1.bf16.msra.mxu1 %v10492_v54  ;;  %v10573_v54 = vld [vmem:[#allocation7 + $0xc8] ss:$16 sps:$4 sm:$0xff]  }
 0x314   : > { %5367 = vmatpush1.bf16.msra.mxu0 %v10495_v55  ;;  %5286 = vmatprep.subr.bf16.mxu1 %v10500_v56  ;;  %v10578_v55 = vld [vmem:[#allocation7 + $0xe4] ss:$16 sps:$4 sm:$0xff]   ;;  %v10581_v56 = vld [vmem:[#allocation7 + $0xec] ss:$16 sps:$4 sm:$0xff]  }
 0x315   : > { %5368 = vmatprep.subr.bf16.mxu0 %v10503_v57  ;;  %v10576_v57 = vld [vmem:[#allocation7 + $0xe0] ss:$16 sps:$4 sm:$0xff]  }
 0x317   : > { %5287 = vmatpush1.bf16.msra.mxu1 %v10498_v58  ;;  %v10579_v58 = vld [vmem:[#allocation7 + $0xe8] ss:$16 sps:$4 sm:$0xff]  }
 0x318   : > { %5369 = vmatpush1.bf16.msra.mxu0 %v10501_v59  ;;  %5288 = vmatprep.subr.bf16.mxu1 %v10506_v60  ;;  %v10584_v59 = vld [vmem:[#allocation7 + $0x104] ss:$16 sps:$4 sm:$0xff]   ;;  %v10587_v60 = vld [vmem:[#allocation7 + $0x10c] ss:$16 sps:$4 sm:$0xff]  }
 0x319   : > { %5370 = vmatprep.subr.bf16.mxu0 %v10509_v61  ;;  %v10582_v61 = vld [vmem:[#allocation7 + $0x100] ss:$16 sps:$4 sm:$0xff]  }
 0x31b   : > { %5289 = vmatpush1.bf16.msra.mxu1 %v10504_v62  ;;  %v10585_v62 = vld [vmem:[#allocation7 + $0x108] ss:$16 sps:$4 sm:$0xff]  }
 0x31c   : > { %5371 = vmatpush1.bf16.msra.mxu0 %v10507_v63  ;;  %5290 = vmatprep.subr.bf16.mxu1 %v10512_v0  ;;  %v10590_v63 = vld [vmem:[#allocation7 + $0x124] ss:$16 sps:$4 sm:$0xff]   ;;  %v10593_v0 = vld [vmem:[#allocation7 + $0x12c] ss:$16 sps:$4 sm:$0xff]  }
 0x31d   : > { %5372 = vmatprep.subr.bf16.mxu0 %v10515_v1  ;;  %v10588_v1 = vld [vmem:[#allocation7 + $0x120] ss:$16 sps:$4 sm:$0xff]  }
 0x31f   : > { %5291 = vmatpush1.bf16.msra.mxu1 %v10510_v6  ;;  %v10591_v6 = vld [vmem:[#allocation7 + $0x128] ss:$16 sps:$4 sm:$0xff]  }
 0x320   : > { %5373 = vmatpush1.bf16.msra.mxu0 %v10513_v2  ;;  %5292 = vmatprep.subr.bf16.mxu1 %v10518_v3  ;;  %v10596_v2 = vld [vmem:[#allocation7 + $0x144] ss:$16 sps:$4 sm:$0xff]   ;;  %v10599_v3 = vld [vmem:[#allocation7 + $0x14c] ss:$16 sps:$4 sm:$0xff]  }
 0x321   : > { %5374 = vmatprep.subr.bf16.mxu0 %v10521_v10  ;;  %v10594_v10 = vld [vmem:[#allocation7 + $0x140] ss:$16 sps:$4 sm:$0xff]  }
 0x323   : > { %5293 = vmatpush1.bf16.msra.mxu1 %v10516_v11  ;;  %v10597_v11 = vld [vmem:[#allocation7 + $0x148] ss:$16 sps:$4 sm:$0xff]  }
 0x324   : > { %5375 = vmatpush1.bf16.msra.mxu0 %v10519_v12  ;;  %5294 = vmatprep.subr.bf16.mxu1 %v10524_v13  ;;  %v10602_v12 = vld [vmem:[#allocation7 + $0x164] ss:$16 sps:$4 sm:$0xff]   ;;  %v10605_v13 = vld [vmem:[#allocation7 + $0x16c] ss:$16 sps:$4 sm:$0xff]  }
 0x325   : > { %5376 = vmatprep.subr.bf16.mxu0 %v10527_v51  ;;  %v10600_v51 = vld [vmem:[#allocation7 + $0x160] ss:$16 sps:$4 sm:$0xff]  }
 0x327   : > { %5295 = vmatpush1.bf16.msra.mxu1 %v10522_v14  ;;  %v10603_v14 = vld [vmem:[#allocation7 + $0x168] ss:$16 sps:$4 sm:$0xff]  }
 0x328   : > { %5377 = vmatpush1.bf16.msra.mxu0 %v10525_v15  ;;  %5296 = vmatprep.subr.bf16.mxu1 %v10530_v16  ;;  %v10608_v15 = vld [vmem:[#allocation7 + $0x184] ss:$16 sps:$4 sm:$0xff]   ;;  %v10611_v16 = vld [vmem:[#allocation7 + $0x18c] ss:$16 sps:$4 sm:$0xff]  }
 0x329   : > { %5378 = vmatprep.subr.bf16.mxu0 %v10533_v17  ;;  %v10606_v17 = vld [vmem:[#allocation7 + $0x180] ss:$16 sps:$4 sm:$0xff]  }
 0x32b   : > { %5297 = vmatpush1.bf16.msra.mxu1 %v10528_v18  ;;  %v8938_v18 = vmul.f32 -1.442695, %v11550_v5 }
 0x32c   : > { %5379 = vmatpush1.bf16.msra.mxu0 %v10531_v19  ;;  %7600 = vmatprep.subr.bf16.mxu1 %v10536_v20  ;;  %v10609_v19 = vld [vmem:[#allocation7 + $0x188] ss:$16 sps:$4 sm:$0xff]   ;;  %v10614_v20 = vld [vmem:[#allocation7 + $0x1a4] ss:$16 sps:$4 sm:$0xff]  }
 0x32d   : > { %7846 = vmatprep.subr.bf16.mxu0 %v10539_v21  ;;  %v8937_v21 = vmul.f32 -1.442695, %v11552_v8  ;;  %11074 = vpow2.f32 %v8938_v18  ;;  %v10663_v18 = vld [vmem:[#allocation7 + $0x2a8] ss:$16 sps:$4 sm:$0xff]  }
 0x32e   : > { %5299 = vmatmul.mubr.bf16.vlgmr.msra.gmra.mrb[20].mxu1 %v11518_v7 }
 0x32f   : > { %5381 = vmatmul.mubr.bf16.vlgmr.msra.gmra.mrb[20].mxu0 %v11518_v7  ;;  %7601 = vmatpush1.bf16.msra.mxu1 %v10534_v22  ;;  %v10552_v7 = vld [vmem:[#allocation7 + $0x60] ss:$16 sps:$4 sm:$0xff]   ;;  %v10617_v22 = vld [vmem:[#allocation7 + $0x1ac] ss:$16 sps:$4 sm:$0xff]   ;;  %11076 = vpow2.f32 %v8937_v21 }
 0x330   : > { %7632 = vmatprep.mubr.bf16.mxu1 %v5478_v24  ;;  %7847 = vmatpush1.bf16.msra.mxu0 %v10537_v23  ;;  %v8939_v23 = vmul.f32 -1.442695, %v11554_v9 }
 0x331   : > { %7878 = vmatprep.mubr.bf16.mxu0 %v5478_v24  ;;  %7602 = vmatprep.subr.bf16.mxu1 %v10542_v25  ;;  %v8940_v24 = vmul.f32 -1.442695, %v11564_v34  ;;  %v10612_v25 = vld [vmem:[#allocation7 + $0x1a0] ss:$16 sps:$4 sm:$0xff]  }
 0x332   : > { %7848 = vmatprep.subr.bf16.mxu0 %v10545_v27  ;;  %v10615_v27 = vld [vmem:[#allocation7 + $0x1a8] ss:$16 sps:$4 sm:$0xff]   ;;  %11078 = vpow2.f32 %v8939_v23 }
 0x333   : > { %7603 = vmatpush1.bf16.msra.mxu1 %v10540_v28  ;;  %v10620_v28 = vld [vmem:[#allocation7 + $0x1c4] ss:$16 sps:$4 sm:$0xff]   ;;  %11080 = vpow2.f32 %v8940_v24  ;;  %v10671_v24 = vld [vmem:[#allocation7 + $0x2cc] ss:$16 sps:$4 sm:$0xff]  }
 0x334   : > { %7849 = vmatpush1.bf16.msra.mxu0 %v10543_v30  ;;  %7604 = vmatprep.subr.bf16.mxu1 %v10548_v31  ;;  %v10623_v30 = vld [vmem:[#allocation7 + $0x1cc] ss:$16 sps:$4 sm:$0xff]   ;;  %v10618_v31 = vld [vmem:[#allocation7 + $0x1c0] ss:$16 sps:$4 sm:$0xff]  }
 0x335   : > { %7850 = vmatprep.subr.bf16.mxu0 %v10551_v52  ;;  %v10621_v52 = vld [vmem:[#allocation7 + $0x1c8] ss:$16 sps:$4 sm:$0xff]  }
 0x337   : > { %7605 = vmatpush1.bf16.msra.mxu1 %v10546_v38  ;;  %v10626_v38 = vld [vmem:[#allocation7 + $0x1e4] ss:$16 sps:$4 sm:$0xff]  }
 0x338   : > { %7851 = vmatpush1.bf16.msra.mxu0 %v10549_v29  ;;  %7606 = vmatprep.subr.bf16.mxu1 %v10554_v39  ;;  %v10629_v29 = vld [vmem:[#allocation7 + $0x1ec] ss:$16 sps:$4 sm:$0xff]   ;;  %v10624_v39 = vld [vmem:[#allocation7 + $0x1e0] ss:$16 sps:$4 sm:$0xff]  }
 0x339   : > { %7852 = vmatprep.subr.bf16.mxu0 %v10557_v40  ;;  %v10627_v40 = vld [vmem:[#allocation7 + $0x1e8] ss:$16 sps:$4 sm:$0xff]  }
 0x33b   : > { %7607 = vmatpush1.bf16.msra.mxu1 %v10552_v7  ;;  %v10632_v7 = vld [vmem:[#allocation7 + $0x204] ss:$16 sps:$4 sm:$0xff]  }
 0x33c   : > { %7853 = vmatpush1.bf16.msra.mxu0 %v10555_v4  ;;  %7608 = vmatprep.subr.bf16.mxu1 %v10560_v41  ;;  %v10635_v4 = vld [vmem:[#allocation7 + $0x20c] ss:$16 sps:$4 sm:$0xff]   ;;  %v11075_v41 = vpop.eup %11074 }
 0x33d   : > { %7854 = vmatprep.subr.bf16.mxu0 %v10563_v42  ;;  %v11077_v42 = vpop.eup %11076 }
 0x33f   : > { %7609 = vmatpush1.bf16.msra.mxu1 %v10558_v46  ;;  %v10630_v46 = vld [vmem:[#allocation7 + $0x200] ss:$16 sps:$4 sm:$0xff]  }
 0x340   : > { %7855 = vmatpush1.bf16.msra.mxu0 %v10561_v43  ;;  %7610 = vmatprep.subr.bf16.mxu1 %v10566_v44  ;;  %v11079_v43 = vpop.eup %11078  ;;  %v5477_v44 = vpack.c.bf16 %v11590_v32, %v11590_v32  ;;  %v10647_v32 = vld [vmem:[#allocation7 + $0x24c] ss:$16 sps:$4 sm:$0xff]  }
 0x341   : > { %7856 = vmatprep.subr.bf16.mxu0 %v10569_v45  ;;  %v10633_v45 = vld [vmem:[#allocation7 + $0x208] ss:$16 sps:$4 sm:$0xff]  }
 0x343   : > { %7611 = vmatpush1.bf16.msra.mxu1 %v10564_v48  ;;  %v10638_v48 = vld [vmem:[#allocation7 + $0x224] ss:$16 sps:$4 sm:$0xff]  }
 0x344   : > { %7857 = vmatpush1.bf16.msra.mxu0 %v10567_v49  ;;  %7612 = vmatprep.subr.bf16.mxu1 %v10572_v50  ;;  %v11081_v49 = vpop.eup %11080  ;;  %v5426_v50 = vadd.f32 1.0, %v11075_v41  ;;  %v10675_v41 = vld [vmem:[#allocation7 + $0x2e8] ss:$16 sps:$4 sm:$0xff]  }
 0x345   : > { %7858 = vmatprep.subr.bf16.mxu0 %v10575_v53  ;;  %v10641_v53 = vld [vmem:[#allocation7 + $0x22c] ss:$16 sps:$4 sm:$0xff]  }
 0x346   : > { %11082 = vrcp.f32 %v5426_v50  ;;  %v10687_v50 = vld [vmem:[#allocation7 + $0x328] ss:$16 sps:$4 sm:$0xff]  }
 0x347   : > { %7613 = vmatpush1.bf16.msra.mxu1 %v10570_v47  ;;  %v5425_v47 = vadd.f32 1.0, %v11077_v42  ;;  %v10680_v42 = vld [vmem:[#allocation7 + $0x304] ss:$16 sps:$4 sm:$0xff]  }
 0x348   : > { %7859 = vmatpush1.bf16.msra.mxu0 %v10573_v54  ;;  %7614 = vmatprep.subr.bf16.mxu1 %v10578_v55  ;;  %v5427_v54 = vadd.f32 1.0, %v11079_v43  ;;  %v10636_v55 = vld [vmem:[#allocation7 + $0x220] ss:$16 sps:$4 sm:$0xff]  }
 0x349   : > { %7860 = vmatprep.subr.bf16.mxu0 %v10581_v56  ;;  %v5428_v56 = vadd.f32 1.0, %v11081_v49  ;;  %11084 = vrcp.f32 %v5425_v47  ;;  %v10678_v43 = vld [vmem:[#allocation7 + $0x300] ss:$16 sps:$4 sm:$0xff]   ;;  %v10695_v47 = vld [vmem:[#allocation7 + $0x34c] ss:$16 sps:$4 sm:$0xff]  }
 0x34a   : > { %11086 = vrcp.f32 %v5427_v54  ;;  %v10684_v49 = vld [vmem:[#allocation7 + $0x320] ss:$16 sps:$4 sm:$0xff]  }
 0x34b   : > { %7615 = vmatpush1.bf16.msra.mxu1 %v10576_v57  ;;  %v10639_v57 = vld [vmem:[#allocation7 + $0x228] ss:$16 sps:$4 sm:$0xff]   ;;  %11088 = vrcp.f32 %v5428_v56  ;;  %v10690_v54 = vld [vmem:[#allocation7 + $0x340] ss:$16 sps:$4 sm:$0xff]   ;;  %v10698_v56 = vld [vmem:[#allocation7 + $0x364] ss:$16 sps:$4 sm:$0xff]  }
 0x34c   : > { %7861 = vmatpush1.bf16.msra.mxu0 %v10579_v58  ;;  %7616 = vmatprep.subr.bf16.mxu1 %v10584_v59  ;;  %v10644_v58 = vld [vmem:[#allocation7 + $0x244] ss:$16 sps:$4 sm:$0xff]   ;;  %v10642_v59 = vld [vmem:[#allocation7 + $0x240] ss:$16 sps:$4 sm:$0xff]  }
 0x34d   : > { %7862 = vmatprep.subr.bf16.mxu0 %v10587_v60  ;;  %v10645_v60 = vld [vmem:[#allocation7 + $0x248] ss:$16 sps:$4 sm:$0xff]  }
 0x34f   : > { %7617 = vmatpush1.bf16.msra.mxu1 %v10582_v61  ;;  %v10650_v61 = vld [vmem:[#allocation7 + $0x264] ss:$16 sps:$4 sm:$0xff]  }
 0x350   : > { %7863 = vmatpush1.bf16.msra.mxu0 %v10585_v62  ;;  %7618 = vmatprep.subr.bf16.mxu1 %v10590_v63  ;;  %v10653_v62 = vld [vmem:[#allocation7 + $0x26c] ss:$16 sps:$4 sm:$0xff]   ;;  %v10648_v63 = vld [vmem:[#allocation7 + $0x260] ss:$16 sps:$4 sm:$0xff]  }
 0x351   : > { %7864 = vmatprep.subr.bf16.mxu0 %v10593_v0  ;;  %v10651_v0 = vld [vmem:[#allocation7 + $0x268] ss:$16 sps:$4 sm:$0xff]  }
 0x353   : > { %7619 = vmatpush1.bf16.msra.mxu1 %v10588_v1  ;;  %v10656_v1 = vld [vmem:[#allocation7 + $0x284] ss:$16 sps:$4 sm:$0xff]  }
 0x354   : > { %7865 = vmatpush1.bf16.msra.mxu0 %v10591_v6  ;;  %7620 = vmatprep.subr.bf16.mxu1 %v10596_v2  ;;  %v10659_v6 = vld [vmem:[#allocation7 + $0x28c] ss:$16 sps:$4 sm:$0xff]   ;;  %v11083_v2 = vpop.eup %11082 }
 0x355   : > { %7866 = vmatprep.subr.bf16.mxu0 %v10599_v3  ;;  %v10654_v3 = vld [vmem:[#allocation7 + $0x280] ss:$16 sps:$4 sm:$0xff]  }
 0x357   : > { %7621 = vmatpush1.bf16.msra.mxu1 %v10594_v10  ;;  %v11085_v10 = vpop.eup %11084 }
 0x358   : > { %7867 = vmatpush1.bf16.msra.mxu0 %v10597_v11  ;;  %7622 = vmatprep.subr.bf16.mxu1 %v10602_v12  ;;  %v10657_v11 = vld [vmem:[#allocation7 + $0x288] ss:$16 sps:$4 sm:$0xff]   ;;  %v10662_v12 = vld [vmem:[#allocation7 + $0x2a4] ss:$16 sps:$4 sm:$0xff]  }
 0x359   : > { %7868 = vmatprep.subr.bf16.mxu0 %v10605_v13  ;;  %v11087_v13 = vpop.eup %11086 }
 0x35b   : > { %7623 = vmatpush1.bf16.msra.mxu1 %v10600_v51  ;;  %v10665_v51 = vld [vmem:[#allocation7 + $0x2ac] ss:$16 sps:$4 sm:$0xff]  }
 0x35c   : > { %7869 = vmatpush1.bf16.msra.mxu0 %v10603_v14  ;;  %7624 = vmatprep.subr.bf16.mxu1 %v10608_v15  ;;  %v11089_v14 = vpop.eup %11088  ;;  %v10660_v15 = vld [vmem:[#allocation7 + $0x2a0] ss:$16 sps:$4 sm:$0xff]  }
 0x35d   : > { %7870 = vmatprep.subr.bf16.mxu0 %v10611_v16  ;;  %v5458_v16 = vmul.f32 %v11085_v10, %v11552_v8  ;;  %v5461_v21 = vmul.f32 %v11089_v14, %v11564_v34  ;;  %v10714_v10 = vld [vmem:[#allocation7 + $0x3c0] ss:$16 sps:$4 sm:$0xff]   ;;  %v10723_v14 = vld [vmem:[#allocation7 + $0x3e8] ss:$16 sps:$4 sm:$0xff]  }
 0x35f   : > { %7625 = vmatpush1.bf16.msra.mxu1 %v10606_v17  ;;  %v5460_v17 = vmul.f32 %v11087_v13, %v11554_v9  ;;  %v10725_v13 = vld [vmem:[#allocation7 + $0x3ec] ss:$16 sps:$4 sm:$0xff]  }
 0x360   : > { %7871 = vmatpush1.bf16.msra.mxu0 %v10609_v19  ;;  %7626 = vmatprep.subr.bf16.mxu1 %v10614_v20  ;;  %v10668_v19 = vld [vmem:[#allocation7 + $0x2c4] ss:$16 sps:$4 sm:$0xff]   ;;  %v5459_v20 = vmul.f32 %v11083_v2, %v11550_v5 }
 0x361   : > { %7872 = vmatprep.subr.bf16.mxu0 %v10617_v22  ;;  %v10716_v2 = vld [vmem:[#allocation7 + $0x3c4] ss:$16 sps:$4 sm:$0xff]  }
 0x363   : > { %7627 = vmatpush1.bf16.msra.mxu1 %v10612_v25 }
 0x364   : > { %7873 = vmatpush1.bf16.msra.mxu0 %v10615_v27  ;;  %7628 = vmatprep.subr.bf16.mxu1 %v10620_v28 }
 0x365   : > { %7874 = vmatprep.subr.bf16.mxu0 %v10623_v30 }
 0x367   : > { %7629 = vmatpush1.bf16.msra.mxu1 %v10618_v31 }
 0x368   : > { %7875 = vmatpush1.bf16.msra.mxu0 %v10621_v52  ;;  %7630 = vmatprep.subr.bf16.mxu1 %v10626_v38  ;;  %v10666_v38 = vld [vmem:[#allocation7 + $0x2c0] ss:$16 sps:$4 sm:$0xff]  }
 0x369   : > { %7876 = vmatprep.subr.bf16.mxu0 %v10629_v29 }
 0x36b   : > { %7631 = vmatpush1.bf16.msra.mxu1 %v10624_v39  ;;  %v10669_v39 = vld [vmem:[#allocation7 + $0x2c8] ss:$16 sps:$4 sm:$0xff]  }
 0x36c   : > { %7877 = vmatpush1.bf16.msra.mxu0 %v10627_v40  ;;  %7641 = vmatprep.subr.bf16.mxu1 %v10632_v7  ;;  %v10674_v40 = vld [vmem:[#allocation7 + $0x2e4] ss:$16 sps:$4 sm:$0xff]   ;;  %v10677_v7 = vld [vmem:[#allocation7 + $0x2ec] ss:$16 sps:$4 sm:$0xff]  }
 0x36d   : > { %7887 = vmatprep.subr.bf16.mxu0 %v10635_v4  ;;  %v10672_v4 = vld [vmem:[#allocation7 + $0x2e0] ss:$16 sps:$4 sm:$0xff]  }
 0x36e   : > { %7633 = vmatmul.mubr.bf16.vlgmr.msra.gmra.mrb[24].mxu1 %v5477_v44 }
 0x36f   : > { %7879 = vmatmul.mubr.bf16.vlgmr.msra.gmra.mrb[24].mxu0 %v5477_v44  ;;  %7642 = vmatpush1.bf16.msra.mxu1 %v10630_v46  ;;  %v10683_v46 = vld [vmem:[#allocation7 + $0x30c] ss:$16 sps:$4 sm:$0xff]   ;;  %v10681_v44 = vld [vmem:[#allocation7 + $0x308] ss:$16 sps:$4 sm:$0xff]  }
 0x370   : > { %7888 = vmatpush1.bf16.msra.mxu0 %v10633_v45  ;;  %7643 = vmatprep.subr.bf16.mxu1 %v10638_v48  ;;  %v10686_v45 = vld [vmem:[#allocation7 + $0x324] ss:$16 sps:$4 sm:$0xff]   ;;  %v10689_v48 = vld [vmem:[#allocation7 + $0x32c] ss:$16 sps:$4 sm:$0xff]  }
 0x371   : > { %7889 = vmatprep.subr.bf16.mxu0 %v10641_v53  ;;  %v10692_v53 = vld [vmem:[#allocation7 + $0x344] ss:$16 sps:$4 sm:$0xff]  }
 0x373   : > { %7644 = vmatpush1.bf16.msra.mxu1 %v10636_v55  ;;  %v10693_v55 = vld [vmem:[#allocation7 + $0x348] ss:$16 sps:$4 sm:$0xff]  }
 0x374   : > { %7890 = vmatpush1.bf16.msra.mxu0 %v10639_v57  ;;  %7645 = vmatprep.subr.bf16.mxu1 %v10644_v58  ;;  %v10701_v57 = vld [vmem:[#allocation7 + $0x36c] ss:$16 sps:$4 sm:$0xff]   ;;  %v10696_v58 = vld [vmem:[#allocation7 + $0x360] ss:$16 sps:$4 sm:$0xff]  }
 0x375   : > { %7891 = vmatprep.subr.bf16.mxu0 %v10647_v32  ;;  %v10699_v32 = vld [vmem:[#allocation7 + $0x368] ss:$16 sps:$4 sm:$0xff]  }
 0x377   : > { %7646 = vmatpush1.bf16.msra.mxu1 %v10642_v59  ;;  %v10704_v59 = vld [vmem:[#allocation7 + $0x384] ss:$16 sps:$4 sm:$0xff]  }
 0x378   : > { %7892 = vmatpush1.bf16.msra.mxu0 %v10645_v60  ;;  %7647 = vmatprep.subr.bf16.mxu1 %v10650_v61  ;;  %v10707_v60 = vld [vmem:[#allocation7 + $0x38c] ss:$16 sps:$4 sm:$0xff]   ;;  %v10702_v61 = vld [vmem:[#allocation7 + $0x380] ss:$16 sps:$4 sm:$0xff]  }
 0x379   : > { %7893 = vmatprep.subr.bf16.mxu0 %v10653_v62  ;;  %v10705_v62 = vld [vmem:[#allocation7 + $0x388] ss:$16 sps:$4 sm:$0xff]  }
 0x37b   : > { %7648 = vmatpush1.bf16.msra.mxu1 %v10648_v63  ;;  %v10710_v63 = vld [vmem:[#allocation7 + $0x3a4] ss:$16 sps:$4 sm:$0xff]  }
 0x37c   : > { %7894 = vmatpush1.bf16.msra.mxu0 %v10651_v0  ;;  %7649 = vmatprep.subr.bf16.mxu1 %v10656_v1  ;;  %v10713_v0 = vld [vmem:[#allocation7 + $0x3ac] ss:$16 sps:$4 sm:$0xff]   ;;  %v10708_v1 = vld [vmem:[#allocation7 + $0x3a0] ss:$16 sps:$4 sm:$0xff]  }
 0x37d   : > { %7895 = vmatprep.subr.bf16.mxu0 %v10659_v6  ;;  %v10711_v6 = vld [vmem:[#allocation7 + $0x3a8] ss:$16 sps:$4 sm:$0xff]  }
 0x37f   : > { %7650 = vmatpush1.bf16.msra.mxu1 %v10654_v3  ;;  %v10719_v3 = vld [vmem:[#allocation7 + $0x3cc] ss:$16 sps:$4 sm:$0xff]  }
 0x380   : > { %7896 = vmatpush1.bf16.msra.mxu0 %v10657_v11  ;;  %7651 = vmatprep.subr.bf16.mxu1 %v10662_v12  ;;  %v10717_v11 = vld [vmem:[#allocation7 + $0x3c8] ss:$16 sps:$4 sm:$0xff]   ;;  %v10722_v12 = vld [vmem:[#allocation7 + $0x3e4] ss:$16 sps:$4 sm:$0xff]  }
 0x381   : > { %v5136_v22 = vpop.f32.mrb[16].mxu1  ;;  %7897 = vmatprep.subr.bf16.mxu0 %v10665_v51  ;;  %v10720_v51 = vld [vmem:[#allocation7 + $0x3e0] ss:$16 sps:$4 sm:$0xff]  }
 0x382   : > { %v5218_v23 = vpop.f32.mrb[16].mxu0  ;;  %v5469_v25 = vmul.f32 %v5458_v16, %v5136_v22  ;;  %v5138_v28 = vpop.f32.mrb[17].mxu1  ;;  %v10731_v16 = vld [vmem:[#allocation7 + $0x40c] ss:$16 sps:$4 sm:$0xff]  }
 0x383   : > { %v11608_v27 = vmul.f32 %v5460_v17, %v5218_v23  ;;  %v5220_v30 = vpop.f32.mrb[17].mxu0  ;;  %v11610_v8 = vmul.f32 %v5459_v20, %v5138_v28  ;;  %v5140_v31 = vpop.f32.mrb[18].mxu1  ;;  %7652 = vmatpush1.bf16.msra.mxu1 %v10660_v15  ;;  %v10728_v15 = vld [vmem:[#allocation7 + $0x404] ss:$16 sps:$4 sm:$0xff]   ;;  %v10726_v17 = vld [vmem:[#allocation7 + $0x400] ss:$16 sps:$4 sm:$0xff]  }
 0x384   : > { %v11612_v9 = vmul.f32 %v5461_v21, %v5220_v30  ;;  %v5222_v52 = vpop.f32.mrb[18].mxu0  ;;  %v5480_v5 = vpack.c.bf16 %v5469_v25, %v5469_v25  ;;  %7898 = vmatpush1.bf16.msra.mxu0 %v10663_v18  ;;  %v5141_v34 = vpop.f32.mrb[19].mxu1  ;;  %7653 = vmatprep.subr.bf16.mxu1 %v10668_v19  ;;  %v5479_v18 = vpack.c.bf16 %v11592_v33, %v11592_v33  ;;  %v10729_v19 = vld [vmem:[#allocation7 + $0x408] ss:$16 sps:$4 sm:$0xff]   ;;  %v10734_v20 = vld [vmem:[#allocation7 + $0x424] ss:$16 sps:$4 sm:$0xff]  }
 0x385   : > { %v5223_v29 = vpop.f32.mrb[19].mxu0  ;;  %7899 = vmatprep.subr.bf16.mxu0 %v10671_v24  ;;  %v5482_v21 = vpack.c.bf16 %v11608_v27, %v11608_v27  ;;  %v10737_v22 = vld [vmem:[#allocation7 + $0x42c] ss:$16 sps:$4 sm:$0xff]   ;;  %v10732_v23 = vld [vmem:[#allocation7 + $0x420] ss:$16 sps:$4 sm:$0xff]  }
 0x386   : > { %7673 = vmatprep.mubr.bf16.mxu1 %v5480_v5  ;;  %7919 = vmatprep.mubr.bf16.mxu0 %v5480_v5  ;;  %v10735_v24 = vld [vmem:[#allocation7 + $0x428] ss:$16 sps:$4 sm:$0xff]   ;;  %v10740_v25 = vld [vmem:[#allocation7 + $0x444] ss:$16 sps:$4 sm:$0xff]   ;;  %v10743_v33 = vld [vmem:[#allocation7 + $0x44c] ss:$16 sps:$4 sm:$0xff]  }
 0x387   : > { %7654 = vmatpush1.bf16.msra.mxu1 %v10666_v38  ;;  %v10738_v28 = vld [vmem:[#allocation7 + $0x440] ss:$16 sps:$4 sm:$0xff]   ;;  %v10741_v30 = vld [vmem:[#allocation7 + $0x448] ss:$16 sps:$4 sm:$0xff]   ;;  %v10746_v31 = vld [vmem:[#allocation7 + $0x464] ss:$16 sps:$4 sm:$0xff]  }
 0x388   : > { %7900 = vmatpush1.bf16.msra.mxu0 %v10669_v39  ;;  %7655 = vmatprep.subr.bf16.mxu1 %v10674_v40  ;;  %v10749_v27 = vld [vmem:[#allocation7 + $0x46c] ss:$16 sps:$4 sm:$0xff]   ;;  %v10744_v52 = vld [vmem:[#allocation7 + $0x460] ss:$16 sps:$4 sm:$0xff]   ;;  %v10747_v38 = vld [vmem:[#allocation7 + $0x468] ss:$16 sps:$4 sm:$0xff]  }
 0x389   : > { %7901 = vmatprep.subr.bf16.mxu0 %v10677_v7  ;;  %v10752_v5 = vld [vmem:[#allocation7 + $0x484] ss:$16 sps:$4 sm:$0xff]   ;;  %v10755_v34 = vld [vmem:[#allocation7 + $0x48c] ss:$16 sps:$4 sm:$0xff]   ;;  %v10750_v29 = vld [vmem:[#allocation7 + $0x480] ss:$16 sps:$4 sm:$0xff]  }
 0x38a   : > { %v10753_v39 = vld [vmem:[#allocation7 + $0x488] ss:$16 sps:$4 sm:$0xff]   ;;  %v10758_v40 = vld [vmem:[#allocation7 + $0x4a4] ss:$16 sps:$4 sm:$0xff]   ;;  %v10761_v7 = vld [vmem:[#allocation7 + $0x4ac] ss:$16 sps:$4 sm:$0xff]  }
 0x38b   : > { %7656 = vmatpush1.bf16.msra.mxu1 %v10672_v4  ;;  %v10756_v4 = vld [vmem:[#allocation7 + $0x4a0] ss:$16 sps:$4 sm:$0xff]  }
 0x38c   : > { %7902 = vmatpush1.bf16.msra.mxu0 %v10675_v41  ;;  %7657 = vmatprep.subr.bf16.mxu1 %v10680_v42  ;;  %v10759_v41 = vld [vmem:[#allocation7 + $0x4a8] ss:$16 sps:$4 sm:$0xff]   ;;  %v10764_v42 = vld [vmem:[#allocation7 + $0x4c4] ss:$16 sps:$4 sm:$0xff]  }
 0x38d   : > { %7903 = vmatprep.subr.bf16.mxu0 %v10683_v46  ;;  %v10767_v46 = vld [vmem:[#allocation7 + $0x4cc] ss:$16 sps:$4 sm:$0xff]  }
 0x38f   : > { %7658 = vmatpush1.bf16.msra.mxu1 %v10678_v43  ;;  %v10762_v43 = vld [vmem:[#allocation7 + $0x4c0] ss:$16 sps:$4 sm:$0xff]  }
 0x390   : > { %7904 = vmatpush1.bf16.msra.mxu0 %v10681_v44  ;;  %7659 = vmatprep.subr.bf16.mxu1 %v10686_v45  ;;  %v10765_v44 = vld [vmem:[#allocation7 + $0x4c8] ss:$16 sps:$4 sm:$0xff]   ;;  %v10770_v45 = vld [vmem:[#allocation7 + $0x4e4] ss:$16 sps:$4 sm:$0xff]  }
 0x391   : > { %7905 = vmatprep.subr.bf16.mxu0 %v10689_v48  ;;  %v10773_v48 = vld [vmem:[#allocation7 + $0x4ec] ss:$16 sps:$4 sm:$0xff]  }
 0x393   : > { %7660 = vmatpush1.bf16.msra.mxu1 %v10684_v49  ;;  %v10768_v49 = vld [vmem:[#allocation7 + $0x4e0] ss:$16 sps:$4 sm:$0xff]  }
 0x394   : > { %7906 = vmatpush1.bf16.msra.mxu0 %v10687_v50  ;;  %7661 = vmatprep.subr.bf16.mxu1 %v10692_v53  ;;  %v10771_v50 = vld [vmem:[#allocation7 + $0x4e8] ss:$16 sps:$4 sm:$0xff]   ;;  %v10776_v53 = vld [vmem:[#allocation7 + $0x504] ss:$16 sps:$4 sm:$0xff]  }
 0x395   : > { %7907 = vmatprep.subr.bf16.mxu0 %v10695_v47  ;;  %v10779_v47 = vld [vmem:[#allocation7 + $0x50c] ss:$16 sps:$4 sm:$0xff]  }
 0x397   : > { %7662 = vmatpush1.bf16.msra.mxu1 %v10690_v54  ;;  %v10774_v54 = vld [vmem:[#allocation7 + $0x500] ss:$16 sps:$4 sm:$0xff]  }
 0x398   : > { %7908 = vmatpush1.bf16.msra.mxu0 %v10693_v55  ;;  %7663 = vmatprep.subr.bf16.mxu1 %v10698_v56  ;;  %v10777_v55 = vld [vmem:[#allocation7 + $0x508] ss:$16 sps:$4 sm:$0xff]   ;;  %v10782_v56 = vld [vmem:[#allocation7 + $0x524] ss:$16 sps:$4 sm:$0xff]  }
 0x399   : > { %7909 = vmatprep.subr.bf16.mxu0 %v10701_v57  ;;  %v10785_v57 = vld [vmem:[#allocation7 + $0x52c] ss:$16 sps:$4 sm:$0xff]  }
 0x39b   : > { %7664 = vmatpush1.bf16.msra.mxu1 %v10696_v58  ;;  %v10780_v58 = vld [vmem:[#allocation7 + $0x520] ss:$16 sps:$4 sm:$0xff]  }
 0x39c   : > { %7910 = vmatpush1.bf16.msra.mxu0 %v10699_v32  ;;  %7665 = vmatprep.subr.bf16.mxu1 %v10704_v59  ;;  %v10783_v32 = vld [vmem:[#allocation7 + $0x528] ss:$16 sps:$4 sm:$0xff]   ;;  %v10788_v59 = vld [vmem:[#allocation7 + $0x544] ss:$16 sps:$4 sm:$0xff]  }
 0x39d   : > { %7911 = vmatprep.subr.bf16.mxu0 %v10707_v60  ;;  %v10791_v60 = vld [vmem:[#allocation7 + $0x54c] ss:$16 sps:$4 sm:$0xff]  }
 0x39f   : > { %7666 = vmatpush1.bf16.msra.mxu1 %v10702_v61  ;;  %v10786_v61 = vld [vmem:[#allocation7 + $0x540] ss:$16 sps:$4 sm:$0xff]  }
 0x3a0   : > { %7912 = vmatpush1.bf16.msra.mxu0 %v10705_v62  ;;  %7667 = vmatprep.subr.bf16.mxu1 %v10710_v63  ;;  %v10789_v62 = vld [vmem:[#allocation7 + $0x548] ss:$16 sps:$4 sm:$0xff]   ;;  %v10794_v63 = vld [vmem:[#allocation7 + $0x564] ss:$16 sps:$4 sm:$0xff]  }
 0x3a1   : > { %7913 = vmatprep.subr.bf16.mxu0 %v10713_v0  ;;  %v10797_v0 = vld [vmem:[#allocation7 + $0x56c] ss:$16 sps:$4 sm:$0xff]  }
 0x3a3   : > { %7668 = vmatpush1.bf16.msra.mxu1 %v10708_v1  ;;  %v10792_v1 = vld [vmem:[#allocation7 + $0x560] ss:$16 sps:$4 sm:$0xff]  }
 0x3a4   : > { %7914 = vmatpush1.bf16.msra.mxu0 %v10711_v6  ;;  %7669 = vmatprep.subr.bf16.mxu1 %v10716_v2  ;;  %v10795_v6 = vld [vmem:[#allocation7 + $0x568] ss:$16 sps:$4 sm:$0xff]   ;;  %v10800_v2 = vld [vmem:[#allocation7 + $0x584] ss:$16 sps:$4 sm:$0xff]  }
 0x3a5   : > { %7915 = vmatprep.subr.bf16.mxu0 %v10719_v3  ;;  %v10803_v3 = vld [vmem:[#allocation7 + $0x58c] ss:$16 sps:$4 sm:$0xff]  }
 0x3a7   : > { %7670 = vmatpush1.bf16.msra.mxu1 %v10714_v10  ;;  %v10798_v10 = vld [vmem:[#allocation7 + $0x580] ss:$16 sps:$4 sm:$0xff]  }
 0x3a8   : > { %7916 = vmatpush1.bf16.msra.mxu0 %v10717_v11  ;;  %7671 = vmatprep.subr.bf16.mxu1 %v10722_v12  ;;  %v8942_v11 = vmul.f32 -1.442695, %v11566_v35  ;;  %v10801_v12 = vld [vmem:[#allocation7 + $0x588] ss:$16 sps:$4 sm:$0xff]  }
 0x3a9   : > { %7917 = vmatprep.subr.bf16.mxu0 %v10725_v13  ;;  %v10806_v13 = vld [vmem:[#allocation7 + $0x5a4] ss:$16 sps:$4 sm:$0xff]  }
 0x3aa   : > { %11090 = vpow2.f32 %v8942_v11 }
 0x3ab   : > { %7672 = vmatpush1.bf16.msra.mxu1 %v10720_v51  ;;  %v8941_v51 = vmul.f32 -1.442695, %v11568_v36 }
 0x3ac   : > { %7918 = vmatpush1.bf16.msra.mxu0 %v10723_v14  ;;  %7682 = vmatprep.subr.bf16.mxu1 %v10728_v15  ;;  %v10809_v14 = vld [vmem:[#allocation7 + $0x5ac] ss:$16 sps:$4 sm:$0xff]   ;;  %v8943_v15 = vmul.f32 -1.442695, %v11570_v37 }
 0x3ad   : > { %7928 = vmatprep.subr.bf16.mxu0 %v10731_v16  ;;  %v8944_v16 = vmul.f32 -1.442695, %v11585_v26  ;;  %11092 = vpow2.f32 %v8941_v51 }
 0x3ae   : > { %7674 = vmatmul.mubr.bf16.vlgmr.msra.gmra.mrb[24].mxu1 %v5479_v18  ;;  %11094 = vpow2.f32 %v8943_v15 }
 0x3af   : > { %7920 = vmatmul.mubr.bf16.vlgmr.msra.gmra.mrb[24].mxu0 %v5479_v18  ;;  %7683 = vmatpush1.bf16.msra.mxu1 %v10726_v17  ;;  %v10804_v17 = vld [vmem:[#allocation7 + $0x5a0] ss:$16 sps:$4 sm:$0xff]   ;;  %v10807_v18 = vld [vmem:[#allocation7 + $0x5a8] ss:$16 sps:$4 sm:$0xff]   ;;  %11096 = vpow2.f32 %v8944_v16 }
 0x3b0   : > { %7714 = vmatprep.mubr.bf16.mxu1 %v5482_v21  ;;  %7929 = vmatpush1.bf16.msra.mxu0 %v10729_v19  ;;  %v10812_v19 = vld [vmem:[#allocation7 + $0x5c4] ss:$16 sps:$4 sm:$0xff]  }
 0x3b1   : > { %7960 = vmatprep.mubr.bf16.mxu0 %v5482_v21  ;;  %7684 = vmatprep.subr.bf16.mxu1 %v10734_v20  ;;  %v10815_v20 = vld [vmem:[#allocation7 + $0x5cc] ss:$16 sps:$4 sm:$0xff]   ;;  %v10810_v21 = vld [vmem:[#allocation7 + $0x5c0] ss:$16 sps:$4 sm:$0xff]  }
 0x3b2   : > { %7930 = vmatprep.subr.bf16.mxu0 %v10737_v22  ;;  %v10813_v22 = vld [vmem:[#allocation7 + $0x5c8] ss:$16 sps:$4 sm:$0xff]  }
 0x3b3   : > { %7685 = vmatpush1.bf16.msra.mxu1 %v10732_v23  ;;  %v10818_v23 = vld [vmem:[#allocation7 + $0x5e4] ss:$16 sps:$4 sm:$0xff]  }
 0x3b4   : > { %7931 = vmatpush1.bf16.msra.mxu0 %v10735_v24  ;;  %7686 = vmatprep.subr.bf16.mxu1 %v10740_v25  ;;  %v10821_v24 = vld [vmem:[#allocation7 + $0x5ec] ss:$16 sps:$4 sm:$0xff]   ;;  %v10816_v25 = vld [vmem:[#allocation7 + $0x5e0] ss:$16 sps:$4 sm:$0xff]  }
 0x3b5   : > { %7932 = vmatprep.subr.bf16.mxu0 %v10743_v33  ;;  %v10819_v33 = vld [vmem:[#allocation7 + $0x5e8] ss:$16 sps:$4 sm:$0xff]  }
 0x3b7   : > { %7687 = vmatpush1.bf16.msra.mxu1 %v10738_v28  ;;  %v10824_v28 = vld [vmem:[#allocation7 + $0x604] ss:$16 sps:$4 sm:$0xff]  }
 0x3b8   : > { %7933 = vmatpush1.bf16.msra.mxu0 %v10741_v30  ;;  %7688 = vmatprep.subr.bf16.mxu1 %v10746_v31  ;;  %v10827_v30 = vld [vmem:[#allocation7 + $0x60c] ss:$16 sps:$4 sm:$0xff]   ;;  %v11091_v31 = vpop.eup %11090 }
 0x3b9   : > { %7934 = vmatprep.subr.bf16.mxu0 %v10749_v27  ;;  %v11093_v27 = vpop.eup %11092 }
 0x3bb   : > { %7689 = vmatpush1.bf16.msra.mxu1 %v10744_v52  ;;  %v10822_v52 = vld [vmem:[#allocation7 + $0x600] ss:$16 sps:$4 sm:$0xff]  }
 0x3bc   : > { %7935 = vmatpush1.bf16.msra.mxu0 %v10747_v38  ;;  %7690 = vmatprep.subr.bf16.mxu1 %v10752_v5  ;;  %v11095_v38 = vpop.eup %11094  ;;  %v5481_v5 = vpack.c.bf16 %v11610_v8, %v11610_v8  ;;  %v10839_v8 = vld [vmem:[#allocation7 + $0x64c] ss:$16 sps:$4 sm:$0xff]  }
 0x3bd   : > { %7936 = vmatprep.subr.bf16.mxu0 %v10755_v34  ;;  %v10825_v34 = vld [vmem:[#allocation7 + $0x608] ss:$16 sps:$4 sm:$0xff]  }
 0x3bf   : > { %7691 = vmatpush1.bf16.msra.mxu1 %v10750_v29  ;;  %v10830_v29 = vld [vmem:[#allocation7 + $0x624] ss:$16 sps:$4 sm:$0xff]  }
 0x3c0   : > { %7937 = vmatpush1.bf16.msra.mxu0 %v10753_v39  ;;  %7692 = vmatprep.subr.bf16.mxu1 %v10758_v40  ;;  %v11097_v39 = vpop.eup %11096  ;;  %v5430_v40 = vadd.f32 1.0, %v11091_v31  ;;  %v10873_v31 = vld [vmem:[#allocation7 + $0x708] ss:$16 sps:$4 sm:$0xff]  }
 0x3c1   : > { %7938 = vmatprep.subr.bf16.mxu0 %v10761_v7  ;;  %v10833_v7 = vld [vmem:[#allocation7 + $0x62c] ss:$16 sps:$4 sm:$0xff]  }
 0x3c2   : > { %11098 = vrcp.f32 %v5430_v40  ;;  %v10885_v40 = vld [vmem:[#allocation7 + $0x748] ss:$16 sps:$4 sm:$0xff]  }
 0x3c3   : > { %7693 = vmatpush1.bf16.msra.mxu1 %v10756_v4  ;;  %v5429_v4 = vadd.f32 1.0, %v11093_v27  ;;  %v10878_v27 = vld [vmem:[#allocation7 + $0x724] ss:$16 sps:$4 sm:$0xff]  }
 0x3c4   : > { %7939 = vmatpush1.bf16.msra.mxu0 %v10759_v41  ;;  %7694 = vmatprep.subr.bf16.mxu1 %v10764_v42  ;;  %v5431_v41 = vadd.f32 1.0, %v11095_v38  ;;  %v10828_v42 = vld [vmem:[#allocation7 + $0x620] ss:$16 sps:$4 sm:$0xff]  }
 0x3c5   : > { %7940 = vmatprep.subr.bf16.mxu0 %v10767_v46  ;;  %v5432_v46 = vadd.f32 1.0, %v11097_v39  ;;  %11100 = vrcp.f32 %v5429_v4  ;;  %v10876_v38 = vld [vmem:[#allocation7 + $0x720] ss:$16 sps:$4 sm:$0xff]   ;;  %v10893_v4 = vld [vmem:[#allocation7 + $0x76c] ss:$16 sps:$4 sm:$0xff]  }
 0x3c6   : > { %11102 = vrcp.f32 %v5431_v41  ;;  %v10882_v39 = vld [vmem:[#allocation7 + $0x740] ss:$16 sps:$4 sm:$0xff]  }
 0x3c7   : > { %7695 = vmatpush1.bf16.msra.mxu1 %v10762_v43  ;;  %v10831_v43 = vld [vmem:[#allocation7 + $0x628] ss:$16 sps:$4 sm:$0xff]   ;;  %11104 = vrcp.f32 %v5432_v46  ;;  %v10888_v41 = vld [vmem:[#allocation7 + $0x760] ss:$16 sps:$4 sm:$0xff]   ;;  %v10896_v46 = vld [vmem:[#allocation7 + $0x784] ss:$16 sps:$4 sm:$0xff]  }
 0x3c8   : > { %7941 = vmatpush1.bf16.msra.mxu0 %v10765_v44  ;;  %7696 = vmatprep.subr.bf16.mxu1 %v10770_v45  ;;  %v10836_v44 = vld [vmem:[#allocation7 + $0x644] ss:$16 sps:$4 sm:$0xff]   ;;  %v10834_v45 = vld [vmem:[#allocation7 + $0x640] ss:$16 sps:$4 sm:$0xff]  }
 0x3c9   : > { %7942 = vmatprep.subr.bf16.mxu0 %v10773_v48  ;;  %v10837_v48 = vld [vmem:[#allocation7 + $0x648] ss:$16 sps:$4 sm:$0xff]  }
 0x3cb   : > { %7697 = vmatpush1.bf16.msra.mxu1 %v10768_v49  ;;  %v10842_v49 = vld [vmem:[#allocation7 + $0x664] ss:$16 sps:$4 sm:$0xff]  }
 0x3cc   : > { %7943 = vmatpush1.bf16.msra.mxu0 %v10771_v50  ;;  %7698 = vmatprep.subr.bf16.mxu1 %v10776_v53  ;;  %v10845_v50 = vld [vmem:[#allocation7 + $0x66c] ss:$16 sps:$4 sm:$0xff]   ;;  %v10840_v53 = vld [vmem:[#allocation7 + $0x660] ss:$16 sps:$4 sm:$0xff]  }
 0x3cd   : > { %7944 = vmatprep.subr.bf16.mxu0 %v10779_v47  ;;  %v10843_v47 = vld [vmem:[#allocation7 + $0x668] ss:$16 sps:$4 sm:$0xff]  }
 0x3cf   : > { %7699 = vmatpush1.bf16.msra.mxu1 %v10774_v54  ;;  %v10848_v54 = vld [vmem:[#allocation7 + $0x684] ss:$16 sps:$4 sm:$0xff]  }
 0x3d0   : > { %7945 = vmatpush1.bf16.msra.mxu0 %v10777_v55  ;;  %7700 = vmatprep.subr.bf16.mxu1 %v10782_v56  ;;  %v10851_v55 = vld [vmem:[#allocation7 + $0x68c] ss:$16 sps:$4 sm:$0xff]   ;;  %v11099_v56 = vpop.eup %11098 }
 0x3d1   : > { %7946 = vmatprep.subr.bf16.mxu0 %v10785_v57  ;;  %v10846_v57 = vld [vmem:[#allocation7 + $0x680] ss:$16 sps:$4 sm:$0xff]  }
 0x3d3   : > { %7701 = vmatpush1.bf16.msra.mxu1 %v10780_v58  ;;  %v11101_v58 = vpop.eup %11100 }
 0x3d4   : > { %7947 = vmatpush1.bf16.msra.mxu0 %v10783_v32  ;;  %7702 = vmatprep.subr.bf16.mxu1 %v10788_v59  ;;  %v10849_v32 = vld [vmem:[#allocation7 + $0x688] ss:$16 sps:$4 sm:$0xff]   ;;  %v10854_v59 = vld [vmem:[#allocation7 + $0x6a4] ss:$16 sps:$4 sm:$0xff]  }
 0x3d5   : > { %7948 = vmatprep.subr.bf16.mxu0 %v10791_v60  ;;  %v11103_v60 = vpop.eup %11102 }
 0x3d7   : > { %7703 = vmatpush1.bf16.msra.mxu1 %v10786_v61  ;;  %v10857_v61 = vld [vmem:[#allocation7 + $0x6ac] ss:$16 sps:$4 sm:$0xff]  }
 0x3d8   : > { %7949 = vmatpush1.bf16.msra.mxu0 %v10789_v62  ;;  %7704 = vmatprep.subr.bf16.mxu1 %v10794_v63  ;;  %v11105_v62 = vpop.eup %11104  ;;  %v10852_v63 = vld [vmem:[#allocation7 + $0x6a0] ss:$16 sps:$4 sm:$0xff]  }
 0x3d9   : > { %7950 = vmatprep.subr.bf16.mxu0 %v10797_v0  ;;  %v5462_v0 = vmul.f32 %v11101_v58, %v11568_v36  ;;  %v10912_v58 = vld [vmem:[#allocation7 + $0x7e0] ss:$16 sps:$4 sm:$0xff]  }
 0x3db   : > { %7705 = vmatpush1.bf16.msra.mxu1 %v10792_v1  ;;  %v5464_v1 = vmul.f32 %v11103_v60, %v11570_v37  ;;  %v10923_v60 = vld [vmem:[#allocation7 + $0x80c] ss:$16 sps:$4 sm:$0xff]  }
 0x3dc   : > { %7951 = vmatpush1.bf16.msra.mxu0 %v10795_v6  ;;  %7706 = vmatprep.subr.bf16.mxu1 %v10800_v2  ;;  %v10855_v6 = vld [vmem:[#allocation7 + $0x6a8] ss:$16 sps:$4 sm:$0xff]   ;;  %v10860_v2 = vld [vmem:[#allocation7 + $0x6c4] ss:$16 sps:$4 sm:$0xff]  }
 0x3dd   : > { %7952 = vmatprep.subr.bf16.mxu0 %v10803_v3  ;;  %v5463_v3 = vmul.f32 %v11099_v56, %v11566_v35  ;;  %v10914_v56 = vld [vmem:[#allocation7 + $0x7e4] ss:$16 sps:$4 sm:$0xff]  }
 0x3df   : > { %7707 = vmatpush1.bf16.msra.mxu1 %v10798_v10  ;;  %v5465_v10 = vmul.f32 %v11105_v62, %v11585_v26  ;;  %v5483_v62 = vpack.c.bf16 %v11612_v9, %v11612_v9  ;;  %v10935_v9 = vld [vmem:[#allocation7 + $0x84c] ss:$16 sps:$4 sm:$0xff]  }
 0x3e0   : > { %7953 = vmatpush1.bf16.msra.mxu0 %v10801_v12  ;;  %7708 = vmatprep.subr.bf16.mxu1 %v10806_v13  ;;  %v10863_v13 = vld [vmem:[#allocation7 + $0x6cc] ss:$16 sps:$4 sm:$0xff]  }
 0x3e1   : > { %7954 = vmatprep.subr.bf16.mxu0 %v10809_v14 }
 0x3e3   : > { %7709 = vmatpush1.bf16.msra.mxu1 %v10804_v17 }
 0x3e4   : > { %7955 = vmatpush1.bf16.msra.mxu0 %v10807_v18  ;;  %7710 = vmatprep.subr.bf16.mxu1 %v10812_v19  ;;  %v10858_v19 = vld [vmem:[#allocation7 + $0x6c0] ss:$16 sps:$4 sm:$0xff]  }
 0x3e5   : > { %7956 = vmatprep.subr.bf16.mxu0 %v10815_v20 }
 0x3e7   : > { %7711 = vmatpush1.bf16.msra.mxu1 %v10810_v21  ;;  %v10861_v21 = vld [vmem:[#allocation7 + $0x6c8] ss:$16 sps:$4 sm:$0xff]  }
 0x3e8   : > { %7957 = vmatpush1.bf16.msra.mxu0 %v10813_v22  ;;  %7712 = vmatprep.subr.bf16.mxu1 %v10818_v23  ;;  %v10866_v22 = vld [vmem:[#allocation7 + $0x6e4] ss:$16 sps:$4 sm:$0xff]   ;;  %v10869_v23 = vld [vmem:[#allocation7 + $0x6ec] ss:$16 sps:$4 sm:$0xff]  }
 0x3e9   : > { %7958 = vmatprep.subr.bf16.mxu0 %v10821_v24  ;;  %v10864_v24 = vld [vmem:[#allocation7 + $0x6e0] ss:$16 sps:$4 sm:$0xff]  }
 0x3eb   : > { %7713 = vmatpush1.bf16.msra.mxu1 %v10816_v25  ;;  %v10867_v25 = vld [vmem:[#allocation7 + $0x6e8] ss:$16 sps:$4 sm:$0xff]  }
 0x3ec   : > { %7959 = vmatpush1.bf16.msra.mxu0 %v10819_v33  ;;  %7723 = vmatprep.subr.bf16.mxu1 %v10824_v28  ;;  %v10872_v33 = vld [vmem:[#allocation7 + $0x704] ss:$16 sps:$4 sm:$0xff]   ;;  %v10875_v28 = vld [vmem:[#allocation7 + $0x70c] ss:$16 sps:$4 sm:$0xff]  }
 0x3ed   : > { %7969 = vmatprep.subr.bf16.mxu0 %v10827_v30  ;;  %v10870_v30 = vld [vmem:[#allocation7 + $0x700] ss:$16 sps:$4 sm:$0xff]  }
 0x3ee   : > { %7715 = vmatmul.mubr.bf16.vlgmr.msra.gmra.mrb[24].mxu1 %v5481_v5 }
 0x3ef   : > { %7961 = vmatmul.mubr.bf16.vlgmr.msra.gmra.mrb[24].mxu0 %v5481_v5  ;;  %7724 = vmatpush1.bf16.msra.mxu1 %v10822_v52  ;;  %v10881_v52 = vld [vmem:[#allocation7 + $0x72c] ss:$16 sps:$4 sm:$0xff]   ;;  %v10879_v5 = vld [vmem:[#allocation7 + $0x728] ss:$16 sps:$4 sm:$0xff]  }
 0x3f0   : > { %7970 = vmatpush1.bf16.msra.mxu0 %v10825_v34  ;;  %7725 = vmatprep.subr.bf16.mxu1 %v10830_v29  ;;  %v10884_v34 = vld [vmem:[#allocation7 + $0x744] ss:$16 sps:$4 sm:$0xff]   ;;  %v10887_v29 = vld [vmem:[#allocation7 + $0x74c] ss:$16 sps:$4 sm:$0xff]  }
 0x3f1   : > { %7971 = vmatprep.subr.bf16.mxu0 %v10833_v7  ;;  %v10890_v7 = vld [vmem:[#allocation7 + $0x764] ss:$16 sps:$4 sm:$0xff]  }
 0x3f3   : > { %7726 = vmatpush1.bf16.msra.mxu1 %v10828_v42  ;;  %v10891_v42 = vld [vmem:[#allocation7 + $0x768] ss:$16 sps:$4 sm:$0xff]  }
 0x3f4   : > { %7972 = vmatpush1.bf16.msra.mxu0 %v10831_v43  ;;  %7727 = vmatprep.subr.bf16.mxu1 %v10836_v44  ;;  %v10899_v43 = vld [vmem:[#allocation7 + $0x78c] ss:$16 sps:$4 sm:$0xff]   ;;  %v10894_v44 = vld [vmem:[#allocation7 + $0x780] ss:$16 sps:$4 sm:$0xff]  }
 0x3f5   : > { %7973 = vmatprep.subr.bf16.mxu0 %v10839_v8  ;;  %v10897_v8 = vld [vmem:[#allocation7 + $0x788] ss:$16 sps:$4 sm:$0xff]  }
 0x3f7   : > { %7728 = vmatpush1.bf16.msra.mxu1 %v10834_v45  ;;  %v10902_v45 = vld [vmem:[#allocation7 + $0x7a4] ss:$16 sps:$4 sm:$0xff]  }
 0x3f8   : > { %7974 = vmatpush1.bf16.msra.mxu0 %v10837_v48  ;;  %7729 = vmatprep.subr.bf16.mxu1 %v10842_v49  ;;  %v10905_v48 = vld [vmem:[#allocation7 + $0x7ac] ss:$16 sps:$4 sm:$0xff]   ;;  %v10900_v49 = vld [vmem:[#allocation7 + $0x7a0] ss:$16 sps:$4 sm:$0xff]  }
 0x3f9   : > { %7975 = vmatprep.subr.bf16.mxu0 %v10845_v50  ;;  %v10903_v50 = vld [vmem:[#allocation7 + $0x7a8] ss:$16 sps:$4 sm:$0xff]  }
 0x3fb   : > { %7730 = vmatpush1.bf16.msra.mxu1 %v10840_v53  ;;  %v10908_v53 = vld [vmem:[#allocation7 + $0x7c4] ss:$16 sps:$4 sm:$0xff]  }
 0x3fc   : > { %7976 = vmatpush1.bf16.msra.mxu0 %v10843_v47  ;;  %7731 = vmatprep.subr.bf16.mxu1 %v10848_v54  ;;  %v10911_v47 = vld [vmem:[#allocation7 + $0x7cc] ss:$16 sps:$4 sm:$0xff]   ;;  %v10906_v54 = vld [vmem:[#allocation7 + $0x7c0] ss:$16 sps:$4 sm:$0xff]  }
 0x3fd   : > { %7977 = vmatprep.subr.bf16.mxu0 %v10851_v55  ;;  %v10909_v55 = vld [vmem:[#allocation7 + $0x7c8] ss:$16 sps:$4 sm:$0xff]  }
 0x3ff   : > { %7732 = vmatpush1.bf16.msra.mxu1 %v10846_v57  ;;  %v10917_v57 = vld [vmem:[#allocation7 + $0x7ec] ss:$16 sps:$4 sm:$0xff]  }
 0x400   : > { %7978 = vmatpush1.bf16.msra.mxu0 %v10849_v32  ;;  %7733 = vmatprep.subr.bf16.mxu1 %v10854_v59  ;;  %v10915_v32 = vld [vmem:[#allocation7 + $0x7e8] ss:$16 sps:$4 sm:$0xff]   ;;  %v10920_v59 = vld [vmem:[#allocation7 + $0x804] ss:$16 sps:$4 sm:$0xff]  }
 0x401   : > { %v5300_v11 = vpop.f32.mrb[20].mxu1  ;;  %7979 = vmatprep.subr.bf16.mxu0 %v10857_v61  ;;  %v10918_v61 = vld [vmem:[#allocation7 + $0x800] ss:$16 sps:$4 sm:$0xff]  }
 0x402   : > { %v5382_v12 = vpop.f32.mrb[20].mxu0  ;;  %v5473_v51 = vmul.f32 %v5462_v0, %v5300_v11  ;;  %v5302_v15 = vpop.f32.mrb[21].mxu1  ;;  %v10926_v0 = vld [vmem:[#allocation7 + $0x824] ss:$16 sps:$4 sm:$0xff]   ;;  %v10930_v11 = vld [vmem:[#allocation7 + $0x840] ss:$16 sps:$4 sm:$0xff]  }
 0x403   : > { %v11628_v14 = vmul.f32 %v5464_v1, %v5382_v12  ;;  %v5384_v16 = vpop.f32.mrb[21].mxu0  ;;  %v11630_v36 = vmul.f32 %v5463_v3, %v5302_v15  ;;  %v5304_v17 = vpop.f32.mrb[22].mxu1  ;;  %7734 = vmatpush1.bf16.msra.mxu1 %v10852_v63  ;;  %v10921_v63 = vld [vmem:[#allocation7 + $0x808] ss:$16 sps:$4 sm:$0xff]  }
 0x404   : > { %v11632_v37 = vmul.f32 %v5465_v10, %v5384_v16  ;;  %v5386_v18 = vpop.f32.mrb[22].mxu0  ;;  %v5484_v35 = vpack.c.bf16 %v5473_v51, %v5473_v51  ;;  %7980 = vmatpush1.bf16.msra.mxu0 %v10855_v6  ;;  %v5305_v26 = vpop.f32.mrb[23].mxu1  ;;  %7735 = vmatprep.subr.bf16.mxu1 %v10860_v2  ;;  %v10929_v6 = vld [vmem:[#allocation7 + $0x82c] ss:$16 sps:$4 sm:$0xff]   ;;  %v10924_v2 = vld [vmem:[#allocation7 + $0x820] ss:$16 sps:$4 sm:$0xff]  }
 0x405   : > { %v5387_v20 = vpop.f32.mrb[23].mxu0  ;;  %7981 = vmatprep.subr.bf16.mxu0 %v10863_v13  ;;  %v5486_v1 = vpack.c.bf16 %v11628_v14, %v11628_v14  ;;  %v10927_v3 = vld [vmem:[#allocation7 + $0x828] ss:$16 sps:$4 sm:$0xff]   ;;  %v10932_v10 = vld [vmem:[#allocation7 + $0x844] ss:$16 sps:$4 sm:$0xff]  }
 0x406   : > { %7755 = vmatprep.mubr.bf16.mxu1 %v5484_v35  ;;  %8001 = vmatprep.mubr.bf16.mxu0 %v5484_v35  ;;  %v10933_v12 = vld [vmem:[#allocation7 + $0x848] ss:$16 sps:$4 sm:$0xff]   ;;  %v10938_v13 = vld [vmem:[#allocation7 + $0x864] ss:$16 sps:$4 sm:$0xff]   ;;  %v10941_v51 = vld [vmem:[#allocation7 + $0x86c] ss:$16 sps:$4 sm:$0xff]  }
 0x407   : > { %7736 = vmatpush1.bf16.msra.mxu1 %v10858_v19  ;;  %v10936_v14 = vld [vmem:[#allocation7 + $0x860] ss:$16 sps:$4 sm:$0xff]   ;;  %v10939_v15 = vld [vmem:[#allocation7 + $0x868] ss:$16 sps:$4 sm:$0xff]   ;;  %v10944_v16 = vld [vmem:[#allocation7 + $0x884] ss:$16 sps:$4 sm:$0xff]  }
 0x408   : > { %7982 = vmatpush1.bf16.msra.mxu0 %v10861_v21  ;;  %7737 = vmatprep.subr.bf16.mxu1 %v10866_v22  ;;  %v10947_v17 = vld [vmem:[#allocation7 + $0x88c] ss:$16 sps:$4 sm:$0xff]   ;;  %v10942_v18 = vld [vmem:[#allocation7 + $0x880] ss:$16 sps:$4 sm:$0xff]   ;;  %v10945_v19 = vld [vmem:[#allocation7 + $0x888] ss:$16 sps:$4 sm:$0xff]  }
 0x409   : > { %7983 = vmatprep.subr.bf16.mxu0 %v10869_v23  ;;  %v10950_v35 = vld [vmem:[#allocation7 + $0x8a4] ss:$16 sps:$4 sm:$0xff]   ;;  %v10953_v26 = vld [vmem:[#allocation7 + $0x8ac] ss:$16 sps:$4 sm:$0xff]   ;;  %v10948_v20 = vld [vmem:[#allocation7 + $0x8a0] ss:$16 sps:$4 sm:$0xff]  }
 0x40a   : > { %v10951_v21 = vld [vmem:[#allocation7 + $0x8a8] ss:$16 sps:$4 sm:$0xff]   ;;  %v10956_v22 = vld [vmem:[#allocation7 + $0x8c4] ss:$16 sps:$4 sm:$0xff]   ;;  %v10959_v23 = vld [vmem:[#allocation7 + $0x8cc] ss:$16 sps:$4 sm:$0xff]  }
 0x40b   : > { %7738 = vmatpush1.bf16.msra.mxu1 %v10864_v24  ;;  %v10954_v24 = vld [vmem:[#allocation7 + $0x8c0] ss:$16 sps:$4 sm:$0xff]  }
 0x40c   : > { %7984 = vmatpush1.bf16.msra.mxu0 %v10867_v25  ;;  %7739 = vmatprep.subr.bf16.mxu1 %v10872_v33  ;;  %v10957_v25 = vld [vmem:[#allocation7 + $0x8c8] ss:$16 sps:$4 sm:$0xff]   ;;  %v10962_v33 = vld [vmem:[#allocation7 + $0x8e4] ss:$16 sps:$4 sm:$0xff]  }
 0x40d   : > { %7985 = vmatprep.subr.bf16.mxu0 %v10875_v28  ;;  %v10965_v28 = vld [vmem:[#allocation7 + $0x8ec] ss:$16 sps:$4 sm:$0xff]  }
 0x40f   : > { %7740 = vmatpush1.bf16.msra.mxu1 %v10870_v30  ;;  %v10960_v30 = vld [vmem:[#allocation7 + $0x8e0] ss:$16 sps:$4 sm:$0xff]  }
 0x410   : > { %7986 = vmatpush1.bf16.msra.mxu0 %v10873_v31  ;;  %7741 = vmatprep.subr.bf16.mxu1 %v10878_v27  ;;  %v10963_v31 = vld [vmem:[#allocation7 + $0x8e8] ss:$16 sps:$4 sm:$0xff]   ;;  %v10968_v27 = vld [vmem:[#allocation7 + $0x904] ss:$16 sps:$4 sm:$0xff]  }
 0x411   : > { %7987 = vmatprep.subr.bf16.mxu0 %v10881_v52  ;;  %v10971_v52 = vld [vmem:[#allocation7 + $0x90c] ss:$16 sps:$4 sm:$0xff]  }
 0x413   : > { %7742 = vmatpush1.bf16.msra.mxu1 %v10876_v38  ;;  %v10966_v38 = vld [vmem:[#allocation7 + $0x900] ss:$16 sps:$4 sm:$0xff]  }
 0x414   : > { %7988 = vmatpush1.bf16.msra.mxu0 %v10879_v5  ;;  %7743 = vmatprep.subr.bf16.mxu1 %v10884_v34  ;;  %v10969_v5 = vld [vmem:[#allocation7 + $0x908] ss:$16 sps:$4 sm:$0xff]   ;;  %v10974_v34 = vld [vmem:[#allocation7 + $0x924] ss:$16 sps:$4 sm:$0xff]  }
 0x415   : > { %7989 = vmatprep.subr.bf16.mxu0 %v10887_v29  ;;  %v10977_v29 = vld [vmem:[#allocation7 + $0x92c] ss:$16 sps:$4 sm:$0xff]  }
 0x417   : > { %7744 = vmatpush1.bf16.msra.mxu1 %v10882_v39  ;;  %v10972_v39 = vld [vmem:[#allocation7 + $0x920] ss:$16 sps:$4 sm:$0xff]  }
 0x418   : > { %7990 = vmatpush1.bf16.msra.mxu0 %v10885_v40  ;;  %7745 = vmatprep.subr.bf16.mxu1 %v10890_v7  ;;  %v10975_v40 = vld [vmem:[#allocation7 + $0x928] ss:$16 sps:$4 sm:$0xff]   ;;  %v10980_v7 = vld [vmem:[#allocation7 + $0x944] ss:$16 sps:$4 sm:$0xff]  }
 0x419   : > { %7991 = vmatprep.subr.bf16.mxu0 %v10893_v4  ;;  %v10983_v4 = vld [vmem:[#allocation7 + $0x94c] ss:$16 sps:$4 sm:$0xff]  }
 0x41b   : > { %7746 = vmatpush1.bf16.msra.mxu1 %v10888_v41  ;;  %v10978_v41 = vld [vmem:[#allocation7 + $0x940] ss:$16 sps:$4 sm:$0xff]  }
 0x41c   : > { %7992 = vmatpush1.bf16.msra.mxu0 %v10891_v42  ;;  %7747 = vmatprep.subr.bf16.mxu1 %v10896_v46  ;;  %v10981_v42 = vld [vmem:[#allocation7 + $0x948] ss:$16 sps:$4 sm:$0xff]   ;;  %v10986_v46 = vld [vmem:[#allocation7 + $0x964] ss:$16 sps:$4 sm:$0xff]  }
 0x41d   : > { %7993 = vmatprep.subr.bf16.mxu0 %v10899_v43  ;;  %v10989_v43 = vld [vmem:[#allocation7 + $0x96c] ss:$16 sps:$4 sm:$0xff]  }
 0x41f   : > { %7748 = vmatpush1.bf16.msra.mxu1 %v10894_v44  ;;  %v10984_v44 = vld [vmem:[#allocation7 + $0x960] ss:$16 sps:$4 sm:$0xff]  }
 0x420   : > { %7994 = vmatpush1.bf16.msra.mxu0 %v10897_v8  ;;  %7749 = vmatprep.subr.bf16.mxu1 %v10902_v45  ;;  %v10987_v8 = vld [vmem:[#allocation7 + $0x968] ss:$16 sps:$4 sm:$0xff]   ;;  %v10992_v45 = vld [vmem:[#allocation7 + $0x984] ss:$16 sps:$4 sm:$0xff]  }
 0x421   : > { %7995 = vmatprep.subr.bf16.mxu0 %v10905_v48  ;;  %v10995_v48 = vld [vmem:[#allocation7 + $0x98c] ss:$16 sps:$4 sm:$0xff]  }
 0x423   : > { %7750 = vmatpush1.bf16.msra.mxu1 %v10900_v49  ;;  %v10990_v49 = vld [vmem:[#allocation7 + $0x980] ss:$16 sps:$4 sm:$0xff]  }
 0x424   : > { %7996 = vmatpush1.bf16.msra.mxu0 %v10903_v50  ;;  %7751 = vmatprep.subr.bf16.mxu1 %v10908_v53  ;;  %v10993_v50 = vld [vmem:[#allocation7 + $0x988] ss:$16 sps:$4 sm:$0xff]   ;;  %v10998_v53 = vld [vmem:[#allocation7 + $0x9a4] ss:$16 sps:$4 sm:$0xff]  }
 0x425   : > { %7997 = vmatprep.subr.bf16.mxu0 %v10911_v47  ;;  %v11001_v47 = vld [vmem:[#allocation7 + $0x9ac] ss:$16 sps:$4 sm:$0xff]  }
 0x427   : > { %7752 = vmatpush1.bf16.msra.mxu1 %v10906_v54  ;;  %v10996_v54 = vld [vmem:[#allocation7 + $0x9a0] ss:$16 sps:$4 sm:$0xff]  }
 0x428   : > { %7998 = vmatpush1.bf16.msra.mxu0 %v10909_v55  ;;  %7753 = vmatprep.subr.bf16.mxu1 %v10914_v56  ;;  %v10999_v55 = vld [vmem:[#allocation7 + $0x9a8] ss:$16 sps:$4 sm:$0xff]   ;;  %v11004_v56 = vld [vmem:[#allocation7 + $0x9c4] ss:$16 sps:$4 sm:$0xff]  }
 0x429   : > { %7999 = vmatprep.subr.bf16.mxu0 %v10917_v57  ;;  %v11007_v57 = vld [vmem:[#allocation7 + $0x9cc] ss:$16 sps:$4 sm:$0xff]  }
 0x42b   : > { %7754 = vmatpush1.bf16.msra.mxu1 %v10912_v58  ;;  %v11002_v58 = vld [vmem:[#allocation7 + $0x9c0] ss:$16 sps:$4 sm:$0xff]  }
 0x42c   : > { %8000 = vmatpush1.bf16.msra.mxu0 %v10915_v32  ;;  %7764 = vmatprep.subr.bf16.mxu1 %v10920_v59  ;;  %v11005_v32 = vld [vmem:[#allocation7 + $0x9c8] ss:$16 sps:$4 sm:$0xff]   ;;  %v11010_v59 = vld [vmem:[#allocation7 + $0x9e4] ss:$16 sps:$4 sm:$0xff]  }
 0x42d   : > { %8010 = vmatprep.subr.bf16.mxu0 %v10923_v60  ;;  %v11013_v60 = vld [vmem:[#allocation7 + $0x9ec] ss:$16 sps:$4 sm:$0xff]  }
 0x42e   : > { %7756 = vmatmul.mubr.bf16.vlgmr.msra.gmra.mrb[24].mxu1 %v5483_v62 }
 0x42f   : > { %8002 = vmatmul.mubr.bf16.vlgmr.msra.gmra.mrb[24].mxu0 %v5483_v62  ;;  %7765 = vmatpush1.bf16.msra.mxu1 %v10918_v61  ;;  %v11008_v61 = vld [vmem:[#allocation7 + $0x9e0] ss:$16 sps:$4 sm:$0xff]   ;;  %v11011_v62 = vld [vmem:[#allocation7 + $0x9e8] ss:$16 sps:$4 sm:$0xff]  }
 0x430   : > { %7796 = vmatprep.mubr.bf16.mxu1 %v5486_v1  ;;  %8011 = vmatpush1.bf16.msra.mxu0 %v10921_v63  ;;  %v11016_v63 = vld [vmem:[#allocation7 + $0xa04] ss:$16 sps:$4 sm:$0xff]  }
 0x431   : > { %8042 = vmatprep.mubr.bf16.mxu0 %v5486_v1  ;;  %7766 = vmatprep.subr.bf16.mxu1 %v10926_v0  ;;  %v11019_v0 = vld [vmem:[#allocation7 + $0xa0c] ss:$16 sps:$4 sm:$0xff]   ;;  %v11014_v1 = vld [vmem:[#allocation7 + $0xa00] ss:$16 sps:$4 sm:$0xff]  }
 0x432   : > { %8012 = vmatprep.subr.bf16.mxu0 %v10929_v6  ;;  %v5485_v6 = vpack.c.bf16 %v11630_v36, %v11630_v36  ;;  %v11026_v36 = vld [vmem:[#allocation7 + $0xa40] ss:$16 sps:$4 sm:$0xff]  }
 0x433   : > { %7767 = vmatpush1.bf16.msra.mxu1 %v10924_v2  ;;  %v11017_v2 = vld [vmem:[#allocation7 + $0xa08] ss:$16 sps:$4 sm:$0xff]  }
 0x434   : > { %8013 = vmatpush1.bf16.msra.mxu0 %v10927_v3  ;;  %7768 = vmatprep.subr.bf16.mxu1 %v10932_v10  ;;  %v11022_v3 = vld [vmem:[#allocation7 + $0xa24] ss:$16 sps:$4 sm:$0xff]   ;;  %v11025_v10 = vld [vmem:[#allocation7 + $0xa2c] ss:$16 sps:$4 sm:$0xff]  }
 0x435   : > { %8014 = vmatprep.subr.bf16.mxu0 %v10935_v9  ;;  %v11020_v9 = vld [vmem:[#allocation7 + $0xa20] ss:$16 sps:$4 sm:$0xff]  }
 0x437   : > { %7769 = vmatpush1.bf16.msra.mxu1 %v10930_v11  ;;  %v11023_v11 = vld [vmem:[#allocation7 + $0xa28] ss:$16 sps:$4 sm:$0xff]  }
 0x438   : > { %8015 = vmatpush1.bf16.msra.mxu0 %v10933_v12  ;;  %7770 = vmatprep.subr.bf16.mxu1 %v10938_v13  ;;  %v11028_v12 = vld [vmem:[#allocation7 + $0xa44] ss:$16 sps:$4 sm:$0xff]   ;;  %v11031_v13 = vld [vmem:[#allocation7 + $0xa4c] ss:$16 sps:$4 sm:$0xff]  }
 0x439   : > { %8016 = vmatprep.subr.bf16.mxu0 %v10941_v51  ;;  %v11287_v51 = vmov 0  }
 0x43b   : > { %7771 = vmatpush1.bf16.msra.mxu1 %v10936_v14  ;;  %v11029_v14 = vld [vmem:[#allocation7 + $0xa48] ss:$16 sps:$4 sm:$0xff]  }
 0x43c   : > { %8017 = vmatpush1.bf16.msra.mxu0 %v10939_v15  ;;  %7772 = vmatprep.subr.bf16.mxu1 %v10944_v16  ;;  %v11034_v15 = vld [vmem:[#allocation7 + $0xa64] ss:$16 sps:$4 sm:$0xff]   ;;  %v11037_v16 = vld [vmem:[#allocation7 + $0xa6c] ss:$16 sps:$4 sm:$0xff]  }
 0x43d   : > { %8018 = vmatprep.subr.bf16.mxu0 %v10947_v17  ;;  %v11032_v17 = vld [vmem:[#allocation7 + $0xa60] ss:$16 sps:$4 sm:$0xff]  }
 0x43f   : > { %7773 = vmatpush1.bf16.msra.mxu1 %v10942_v18  ;;  %v11035_v18 = vld [vmem:[#allocation7 + $0xa68] ss:$16 sps:$4 sm:$0xff]  }
 0x440   : > { %8019 = vmatpush1.bf16.msra.mxu0 %v10945_v19  ;;  %7774 = vmatprep.subr.bf16.mxu1 %v10950_v35  ;;  %v11040_v19 = vld [vmem:[#allocation7 + $0xa84] ss:$16 sps:$4 sm:$0xff]   ;;  %v11043_v35 = vld [vmem:[#allocation7 + $0xa8c] ss:$16 sps:$4 sm:$0xff]  }
 0x441   : > { %8020 = vmatprep.subr.bf16.mxu0 %v10953_v26  ;;  %v11038_v26 = vld [vmem:[#allocation7 + $0xa80] ss:$16 sps:$4 sm:$0xff]  }
 0x443   : > { %7775 = vmatpush1.bf16.msra.mxu1 %v10948_v20  ;;  %v11041_v20 = vld [vmem:[#allocation7 + $0xa88] ss:$16 sps:$4 sm:$0xff]  }
 0x444   : > { %8021 = vmatpush1.bf16.msra.mxu0 %v10951_v21  ;;  %7776 = vmatprep.subr.bf16.mxu1 %v10956_v22  ;;  %v11046_v21 = vld [vmem:[#allocation7 + $0xaa4] ss:$16 sps:$4 sm:$0xff]   ;;  %v11049_v22 = vld [vmem:[#allocation7 + $0xaac] ss:$16 sps:$4 sm:$0xff]  }
 0x445   : > { %8022 = vmatprep.subr.bf16.mxu0 %v10959_v23  ;;  %v11044_v23 = vld [vmem:[#allocation7 + $0xaa0] ss:$16 sps:$4 sm:$0xff]  }
 0x447   : > { %7777 = vmatpush1.bf16.msra.mxu1 %v10954_v24  ;;  %v11047_v24 = vld [vmem:[#allocation7 + $0xaa8] ss:$16 sps:$4 sm:$0xff]  }
 0x448   : > { %8023 = vmatpush1.bf16.msra.mxu0 %v10957_v25  ;;  %7778 = vmatprep.subr.bf16.mxu1 %v10962_v33  ;;  %v11052_v25 = vld [vmem:[#allocation7 + $0xac4] ss:$16 sps:$4 sm:$0xff]   ;;  %v11055_v33 = vld [vmem:[#allocation7 + $0xacc] ss:$16 sps:$4 sm:$0xff]  }
 0x449   : > { %8024 = vmatprep.subr.bf16.mxu0 %v10965_v28  ;;  %v11050_v28 = vld [vmem:[#allocation7 + $0xac0] ss:$16 sps:$4 sm:$0xff]  }
 0x44b   : > { %7779 = vmatpush1.bf16.msra.mxu1 %v10960_v30  ;;  %v11053_v30 = vld [vmem:[#allocation7 + $0xac8] ss:$16 sps:$4 sm:$0xff]  }
 0x44c   : > { %8025 = vmatpush1.bf16.msra.mxu0 %v10963_v31  ;;  %7780 = vmatprep.subr.bf16.mxu1 %v10968_v27  ;;  %v11058_v31 = vld [vmem:[#allocation7 + $0xae4] ss:$16 sps:$4 sm:$0xff]   ;;  %v11061_v27 = vld [vmem:[#allocation7 + $0xaec] ss:$16 sps:$4 sm:$0xff]  }
 0x44d   : > { %8026 = vmatprep.subr.bf16.mxu0 %v10971_v52  ;;  %v11056_v52 = vld [vmem:[#allocation7 + $0xae0] ss:$16 sps:$4 sm:$0xff]  }
 0x44f   : > { %7781 = vmatpush1.bf16.msra.mxu1 %v10966_v38  ;;  %v11059_v38 = vld [vmem:[#allocation7 + $0xae8] ss:$16 sps:$4 sm:$0xff]  }
 0x450   : > { %8027 = vmatpush1.bf16.msra.mxu0 %v10969_v5  ;;  %7782 = vmatprep.subr.bf16.mxu1 %v10974_v34  ;;  %v5487_v5 = vpack.c.bf16 %v11632_v37, %v11632_v37 }
 0x451   : > { %8028 = vmatprep.subr.bf16.mxu0 %v10977_v29 }
 0x453   : > { %7783 = vmatpush1.bf16.msra.mxu1 %v10972_v39 }
 0x454   : > { %8029 = vmatpush1.bf16.msra.mxu0 %v10975_v40  ;;  %7784 = vmatprep.subr.bf16.mxu1 %v10980_v7 }
 0x455   : > { %8030 = vmatprep.subr.bf16.mxu0 %v10983_v4 }
 0x457   : > { %7785 = vmatpush1.bf16.msra.mxu1 %v10978_v41 }
 0x458   : > { %8031 = vmatpush1.bf16.msra.mxu0 %v10981_v42  ;;  %7786 = vmatprep.subr.bf16.mxu1 %v10986_v46 }
 0x459   : > { %8032 = vmatprep.subr.bf16.mxu0 %v10989_v43 }
 0x45b   : > { %7787 = vmatpush1.bf16.msra.mxu1 %v10984_v44 }
 0x45c   : > { %8033 = vmatpush1.bf16.msra.mxu0 %v10987_v8  ;;  %7788 = vmatprep.subr.bf16.mxu1 %v10992_v45 }
 0x45d   : > { %8034 = vmatprep.subr.bf16.mxu0 %v10995_v48 }
 0x45f   : > { %7789 = vmatpush1.bf16.msra.mxu1 %v10990_v49 }
 0x460   : > { %8035 = vmatpush1.bf16.msra.mxu0 %v10993_v50  ;;  %7790 = vmatprep.subr.bf16.mxu1 %v10998_v53 }
 0x461   : > { %8036 = vmatprep.subr.bf16.mxu0 %v11001_v47 }
 0x463   : > { %7791 = vmatpush1.bf16.msra.mxu1 %v10996_v54 }
 0x464   : > { %8037 = vmatpush1.bf16.msra.mxu0 %v10999_v55  ;;  %7792 = vmatprep.subr.bf16.mxu1 %v11004_v56 }
 0x465   : > { %8038 = vmatprep.subr.bf16.mxu0 %v11007_v57 }
 0x467   : > { %7793 = vmatpush1.bf16.msra.mxu1 %v11002_v58 }
 0x468   : > { %8039 = vmatpush1.bf16.msra.mxu0 %v11005_v32  ;;  %7794 = vmatprep.subr.bf16.mxu1 %v11010_v59 }
 0x469   : > { %8040 = vmatprep.subr.bf16.mxu0 %v11013_v60 }
 0x46b   : > { %7795 = vmatpush1.bf16.msra.mxu1 %v11008_v61 }
 0x46c   : > { %8041 = vmatpush1.bf16.msra.mxu0 %v11011_v62  ;;  %7805 = vmatprep.subr.bf16.mxu1 %v11016_v63 }
 0x46d   : > { %8051 = vmatprep.subr.bf16.mxu0 %v11019_v0 }
 0x46e   : > { %7797 = vmatmul.mubr.bf16.vlgmr.msra.gmra.mrb[24].mxu1 %v5485_v6 }
 0x46f   : > { %8043 = vmatmul.mubr.bf16.vlgmr.msra.gmra.mrb[24].mxu0 %v5485_v6  ;;  %7806 = vmatpush1.bf16.msra.mxu1 %v11014_v1 }
 0x470   : > { %8052 = vmatpush1.bf16.msra.mxu0 %v11017_v2  ;;  %7807 = vmatprep.subr.bf16.mxu1 %v11022_v3 }
 0x471   : > { %8053 = vmatprep.subr.bf16.mxu0 %v11025_v10  ;;  %7837 = vmatprep.mubr.bf16.mxu1 %v11287_v51 }
 0x472   : > { %8083 = vmatprep.mubr.bf16.mxu0 %v11287_v51 }
 0x473   : > { %7808 = vmatpush1.bf16.msra.mxu1 %v11020_v9 }
 0x474   : > { %8054 = vmatpush1.bf16.msra.mxu0 %v11023_v11  ;;  %7809 = vmatprep.subr.bf16.mxu1 %v11028_v12 }
 0x475   : > { %8055 = vmatprep.subr.bf16.mxu0 %v11031_v13 }
 0x477   : > { %7810 = vmatpush1.bf16.msra.mxu1 %v11026_v36 }
 0x478   : > { %8056 = vmatpush1.bf16.msra.mxu0 %v11029_v14  ;;  %7811 = vmatprep.subr.bf16.mxu1 %v11034_v15 }
 0x479   : > { %8057 = vmatprep.subr.bf16.mxu0 %v11037_v16 }
 0x47b   : > { %7812 = vmatpush1.bf16.msra.mxu1 %v11032_v17 }
 0x47c   : > { %8058 = vmatpush1.bf16.msra.mxu0 %v11035_v18  ;;  %7813 = vmatprep.subr.bf16.mxu1 %v11040_v19 }
 0x47d   : > { %8059 = vmatprep.subr.bf16.mxu0 %v11043_v35 }
 0x47f   : > { %7814 = vmatpush1.bf16.msra.mxu1 %v11038_v26 }
 0x480   : > { %8060 = vmatpush1.bf16.msra.mxu0 %v11041_v20  ;;  %7815 = vmatprep.subr.bf16.mxu1 %v11046_v21 }
 0x481   : > { %8061 = vmatprep.subr.bf16.mxu0 %v11049_v22 }
 0x483   : > { %7816 = vmatpush1.bf16.msra.mxu1 %v11044_v23 }
 0x484   : > { %8062 = vmatpush1.bf16.msra.mxu0 %v11047_v24  ;;  %7817 = vmatprep.subr.bf16.mxu1 %v11052_v25 }
 0x485   : > { %8063 = vmatprep.subr.bf16.mxu0 %v11055_v33 }
 0x487   : > { %7818 = vmatpush1.bf16.msra.mxu1 %v11050_v28 }
 0x488   : > { %8064 = vmatpush1.bf16.msra.mxu0 %v11053_v30  ;;  %7819 = vmatprep.subr.bf16.mxu1 %v11058_v31 }
 0x489   : > { %8065 = vmatprep.subr.bf16.mxu0 %v11061_v27 }
 0x48b   : > { %7820 = vmatpush1.bf16.msra.mxu1 %v11056_v52 }
 0x48c   : > { %8066 = vmatpush1.bf16.msra.mxu0 %v11059_v38 }
 0x48e   : > { %7838 = vmatmul.mubr.bf16.vlgmr.msra.gmra.mrb[24].mxu1 %v5487_v5 }
 0x48f   : > { %8084 = vmatmul.mubr.bf16.vlgmr.msra.gmra.mrb[24].mxu0 %v5487_v5 }
 0x561   : > { %v7839_v34 = vpop.f32.mrb[24].mxu1 }
 0x562   : > { %8092 = vst [vmem:[%s244_s22] sm:$0xff] %v7839_v34  ;;  %v8085_v29 = vpop.f32.mrb[24].mxu0  ;;  %v7841_v39 = vpop.f32.mrb[25].mxu1 }
 0x563   : > { %8094 = vst [vmem:[%s244_s22 + $0x10] sm:$0xff] %v8085_v29  ;;  %8093 = vst [vmem:[%s244_s22 + $0x8] sm:$0xff] %v7841_v39  ;;  %v8087_v37 = vpop.f32.mrb[25].mxu0  ;;  %v7843_v40 = vpop.f32.mrb[26].mxu1 }
 0x564   : > { %8095 = vst [vmem:[%s244_s22 + $0x18] sm:$0xff] %v8087_v37  ;;  %v8089_v7 = vpop.f32.mrb[26].mxu0  ;;  %v7844_v4 = vpop.f32.mrb[27].mxu1 }
 0x565   : > { %v8090_v41 = vpop.f32.mrb[27].mxu0 }
 0x566   : > { %11205 = shalt.err (!%p11202_p11)
}
 0x567   : > { %s11206_s7 = scalar_lea.hbm %s11649_s10, 512  ;;  %s11210_s18 = scalar_lea.hbm %s11699_s3, 1024 }
 0x568   : > { %p11207_p0 = scmp.ne.s32.totalorder %s11649_s10, %s11206_s7  ;;  %p11211_p6 = scmp.lt.u32.totalorder %s11649_s10, %s11699_s3 }
 0x569   : > { %p11212_p7 = scmp.lt.u32.totalorder %s11210_s18, %s11206_s7  ;;  %p11214_p8 = scmp.lt.u32.totalorder %s11206_s7, %s11649_s10 }
 0x56a   : > { %p11208_p4 = pnand %p11207_p0, %p11714_p12 }
 0x56b   : > { %p11213_p2 = por %p11212_p7, %p11211_p6 }
 0x56c   : > { %p11209_p13 = pneg %p11208_p4 }
 0x56d   : > { %p11215_p1 = por %p11214_p8, %p11213_p2 }
 0x56f   : > { %p11216_p10 = pnand %p11215_p1, %p11209_p13 }
 0x571   : > { %11219 = shalt.err (!%p11216_p10)
}
 0x572   : > { %9396 = dma.vmem_to_hbm [thread:$0]  (%p11714_p12), %s11644_s24, 512, %s11649_s10, %s8097_s15  }
 0x573 PF: > { %s8123_s20 = sand.u32 1, %s11258_s12   ;;  %p11715_p3 = scmp.ne.s32.totalorder %s11707_s23, 0 }
 0x574   : > { %p11716_p5 = scmp.ge.s32.totalorder %s11278_s17, 2  ;;  %s8124_s22 = scalar_lea.sflag [#allocation4], %s8123_s20 }
 0x576   : > { %p9410_p9 = pnand %p11716_p5, %p11715_p3 }
 0x578   : > { %11253 = dma.done.wait (!%p9410_p9), %s8124_s22, 512  }
 0x579   : > { %11255 = vsyncadd (!%p9410_p9), %s8124_s22, 4294966784  ;;  %s20_s17 = sadd.s32 1, %s11278_s17   ;;  %s11717_s12 = smov %s11262_s13 }
 0x57a   : > { %p17_p11 = scmp.ge.s32.totalorder %s20_s17, 4   ;;  %s11718_s13 = smov %s11266_s14 }
 0x57b   : > { %s11719_s14 = smov %s11451_s5  ;;  %s11720_s15 = smov %s11274_s16 }
 0x57c   : > { %s11721_s16 = smov %s11723_s19  ;;  %19 = sbr.rel (!%p17_p11) target bundleno = 7 (0x7), region = 87 }
 0x583   :  { %8129 = vsyncpa [#allocation3], 1 }
 0x584   :  { %8131 = vsyncpa [#allocation3 + $0x1], 1 }
 0x585   :  { %8132 = vsyncpa [#allocation6], 1 }
 0x586   :  { %8133 = vsyncpa [#allocation4], 1 }
 0x587   :  { %8135 = vsyncpa [#allocation4 + $0x1], 1 }

</bundles_post_ra>
